<compile_context>
chip_gen: v7x
topology: tpu7x:2x2x1
jax: 0.10.0
libtpu: 0.0.40
codegen_flags: <defaults>
</compile_context>

<pallas_src>
import functools
import math

import jax
import jax.numpy as jnp
import numpy as np
from jax.experimental import pallas as pl
from jax.experimental.pallas import tpu as pltpu

# ----------------------------- configuration (scaled-down spectral sizes) --------------------
# Module defaults kept verbatim: input_dim=512, conv widths 512/256/n_mels=128.
# n_fft/hop/win are scaled 1024/256/1024 -> 256/64/256 so the demo stays small.
INPUT_DIM = 512
C1, C2 = 512, 256
N_MELS = 128
N_FFT, HOP, WIN = 256, 64, 256
SAMPLE_RATE = 16000
NFREQ = N_FFT // 2 + 1          # 129 one-sided bins
NFREQ_PAD = 256                 # freq axis padded to a lane multiple; padded bins are zero
NP2 = 2 * NFREQ_PAD             # [re | im] concatenated on the lane axis
R_OVERLAP = N_FFT // HOP        # 4
PAD = N_FFT // 2
GL_ITERS = 32                   # torchaudio GriffinLim default n_iter
MOMENTUM = 0.99                 # torchaudio GriffinLim default momentum
MOM_F = MOMENTUM / (1.0 + MOMENTUM)
BN_EPS = 1e-5


# ----------------------------- host-side spectral constants ----------------------------------
def _hann_periodic(n):
    i = np.arange(n)
    return (0.5 - 0.5 * np.cos(2.0 * np.pi * i / n)).astype(np.float32)


WINDOW_NP = _hann_periodic(WIN)                 # (N_FFT,)
WINDOW_ROW = WINDOW_NP[None, :]                 # (1, N_FFT)


def _dft_matrices():
    n = np.arange(N_FFT)[:, None].astype(np.float64)
    k = np.arange(NFREQ)[None, :].astype(np.float64)
    ang = 2.0 * np.pi * n * k / N_FFT           # (N_FFT, NFREQ)
    cos = np.zeros((N_FFT, NFREQ_PAD), np.float64)
    sin = np.zeros((N_FFT, NFREQ_PAD), np.float64)
    cos[:, :NFREQ] = np.cos(ang)
    sin[:, :NFREQ] = -np.sin(ang)               # rfft convention
    mfwd = np.concatenate([cos, sin], axis=1).astype(np.float32)     # (N_FFT, 2*NP)

    c = np.full((NFREQ,), 2.0)
    c[0] = 1.0
    c[-1] = 1.0
    icos = np.zeros((NFREQ_PAD, N_FFT), np.float64)
    isin = np.zeros((NFREQ_PAD, N_FFT), np.float64)
    icos[:NFREQ] = c[:, None] * np.cos(ang.T) / N_FFT
    isin[:NFREQ] = -c[:, None] * np.sin(ang.T) / N_FFT
    minv = np.concatenate([icos, isin], axis=0).astype(np.float32)   # (2*NP, N_FFT)
    return mfwd, minv


MFWD_NP, MINV_NP = _dft_matrices()


def _mel_filterbank():
    # torchaudio HTK mel filterbank, norm=None: (NFREQ, N_MELS)
    def hz_to_mel(f):
        return 2595.0 * np.log10(1.0 + f / 700.0)

    def mel_to_hz(m):
        return 700.0 * (10.0 ** (m / 2595.0) - 1.0)

    all_freqs = np.linspace(0.0, SAMPLE_RATE // 2, NFREQ)
    m_pts = np.linspace(hz_to_mel(0.0), hz_to_mel(SAMPLE_RATE / 2.0), N_MELS + 2)
    f_pts = mel_to_hz(m_pts)
    f_diff = f_pts[1:] - f_pts[:-1]
    slopes = f_pts[None, :] - all_freqs[:, None]
    down = -slopes[:, :-2] / f_diff[:-1]
    up = slopes[:, 2:] / f_diff[1:]
    return np.maximum(0.0, np.minimum(down, up))


# TODO(synk): torchaudio's (old) InverseMelScale runs an iterative SGD non-negative
# least-squares solve; here the least-squares solution is a precomputed pseudo-inverse
# matmul followed by clamp(min=0).
_FB = _mel_filterbank()
PINV_PAD = np.zeros((N_MELS, NFREQ_PAD), np.float32)
PINV_PAD[:, :NFREQ] = np.linalg.pinv(_FB, rcond=1e-2).astype(np.float32)


# ----------------------------------- Pallas kernels ------------------------------------------
def _shifted_taps(x, frames_per_item):
    """x: (T, C) rows are (item, time) flattened.  Returns (x[t-1], x[t+1]) with zero rows at
    each item's time boundaries.  Tile height is a multiple of frames_per_item, so the tile
    edge rows coincide with item boundaries and no halo is needed."""
    T, C = x.shape
    zero = jnp.zeros((1, C), x.dtype)
    xp = jnp.concatenate([zero, x[:-1, :]], axis=0)        # row t -> x[t-1]
    xn = jnp.concatenate([x[1:, :], zero], axis=0)         # row t -> x[t+1]
    row = jax.lax.broadcasted_iota(jnp.int32, (T, 1), 0)
    keep_p = ((row % frames_per_item) != 0).astype(x.dtype)
    keep_n = ((row % frames_per_item) != (frames_per_item - 1)).astype(x.dtype)
    return xp * keep_p, xn * keep_n


def _conv3(x, w_ref, frames_per_item):
    """Conv1d(kernel=3, padding=1) over time as three (T,Cin)@(Cin,Cout) matmuls with bf16
    operands and f32 accumulation (no bias)."""
    xp, xn = _shifted_taps(x, frames_per_item)
    out = jnp.dot(xp.astype(jnp.bfloat16), w_ref[0], preferred_element_type=jnp.float32)
    out += jnp.dot(x.astype(jnp.bfloat16), w_ref[1], preferred_element_type=jnp.float32)
    out += jnp.dot(xn.astype(jnp.bfloat16), w_ref[2], preferred_element_type=jnp.float32)
    return out


def _write_stats(stats_ref, h):
    s = jnp.sum(h, axis=0, keepdims=True)
    ss = jnp.sum(h * h, axis=0, keepdims=True)
    stats_ref[0] = jnp.concatenate([s, ss], axis=0)


def conv1_kernel(x_ref, w_ref, h_ref, stats_ref, *, frames_per_item):
    # Conv1d(input_dim -> 512); bias dropped (cancels exactly under training-mode BN).
    h = _conv3(x_ref[...], w_ref, frames_per_item)
    h_ref[...] = h
    _write_stats(stats_ref, h)


def conv2_kernel(h_ref, a_ref, b_ref, w_ref, h2_ref, stats_ref, *, frames_per_item):
    # BN1 (affine from pass-1 stats) + ReLU + Conv1d(512 -> 256); bias dropped.
    y = jnp.maximum(h_ref[...] * a_ref[...] + b_ref[...], 0.0)
    h2 = _conv3(y, w_ref, frames_per_item)
    h2_ref[...] = h2
    _write_stats(stats_ref, h2)


def conv3_kernel(h_ref, a_ref, b_ref, w_ref, bias_ref, pinv_ref, spec_ref, *, frames_per_item):
    # BN2 + ReLU + Conv1d(256 -> n_mels) + bias, then exp - 1e-5, clamp, inverse-mel, clamp.
    y = jnp.maximum(h_ref[...] * a_ref[...] + b_ref[...], 0.0)
    mel = _conv3(y, w_ref, frames_per_item) + bias_ref[...]
    mel = jnp.maximum(jnp.exp(mel) - 1e-5, 0.0)
    spec = jnp.dot(mel, pinv_ref[...], preferred_element_type=jnp.float32)
    spec_ref[...] = jnp.maximum(spec, 0.0)


def gl_synth_kernel(mag_ref, ang_ref, minv_ref, win_ref, fr_ref):
    # Windowed one-sided iDFT of (magnitude * phase), as one concatenated [re|im] matmul.
    mag = mag_ref[...]
    ang = ang_ref[...]
    c = jnp.concatenate([mag * ang[:, :NFREQ_PAD], mag * ang[:, NFREQ_PAD:]], axis=1)
    frames = jnp.dot(c, minv_ref[...], preferred_element_type=jnp.float32)
    fr_ref[...] = frames * win_ref[...]


def gl_analysis_kernel(fr_ref, win_ref, mfwd_ref, tprev_ref, ang_ref, reb_ref):
    # Windowed DFT (single [cos|sin] matmul) + Griffin-Lim momentum phase update.
    rebuilt = jnp.dot(fr_ref[...] * win_ref[...], mfwd_ref[...],
                      preferred_element_type=jnp.float32)
    t = rebuilt - MOM_F * tprev_ref[...]
    tre = t[:, :NFREQ_PAD]
    tim = t[:, NFREQ_PAD:]
    denom = jnp.sqrt(tre * tre + tim * tim) + 1e-16
    ang_ref[...] = jnp.concatenate([tre / denom, tim / denom], axis=1)
    reb_ref[...] = rebuilt


# ----------------------------------- glue helpers --------------------------------------------
def _row_tile(batch, frames):
    # Row tile = whole batch items, targeting ~256 rows (amortize per-step overhead, fill a
    # 256-wide MXU).  Must divide B*F and stay 8-aligned.
    ipt = max(1, min(batch, max(1, 256 // frames)))
    while batch % ipt:
        ipt -= 1
    tile = ipt * frames
    assert tile % 8 == 0, "per-item frame count must keep row tiles 8-aligned in this demo"
    return tile


@functools.lru_cache(maxsize=None)
def _ola_env_trim(frames):
    w2 = WINDOW_NP.astype(np.float64) ** 2
    env = np.zeros(((frames + R_OVERLAP - 1) * HOP,), np.float64)
    for f in range(frames):
        env[f * HOP: f * HOP + N_FFT] += w2
    return env[PAD: PAD + (frames - 1) * HOP].astype(np.float32)   # strictly positive


def _overlap_add(wframes):
    b, f = wframes.shape[0], wframes.shape[1]
    fr = wframes.reshape(b, f, R_OVERLAP, HOP)
    acc = jnp.zeros((b, f + R_OVERLAP - 1, HOP), wframes.dtype)
    for r in range(R_OVERLAP):
        acc = acc.at[:, r:r + f, :].add(fr[:, :, r, :])
    return acc.reshape(b, (f + R_OVERLAP - 1) * HOP)


def _istft_center(wframes):
    # torch.istft(center=True, length=None): overlap-add, trim n_fft//2, divide by the
    # (trimmed, strictly positive) squared-window envelope.
    f = wframes.shape[1]
    y = _overlap_add(wframes)
    return y[:, PAD:PAD + (f - 1) * HOP] / _ola_env_trim(f)[None, :]


def _frames_center(audio, frames):
    # torch.stft(center=True) framing: reflect pad by n_fft//2, hop-strided windows.
    idx = np.arange(frames)[:, None] * HOP + np.arange(N_FFT)[None, :]
    xpad = jnp.pad(audio, ((0, 0), (PAD, PAD)), mode="reflect")
    return xpad[:, idx]


def _bn_affine(stats, gamma, beta, n_rows):
    s = jnp.sum(stats, axis=0)                                     # (2, C) tiny reduction
    mean = s[0] / n_rows
    var = jnp.maximum(s[1] / n_rows - mean * mean, 0.0)            # biased, training-mode BN
    a = gamma[0] * jax.lax.rsqrt(var + BN_EPS)
    b = beta[0] - mean * a
    return a[None, :], b[None, :]


# --------------------------------------- forward ---------------------------------------------
def audio_reconstructor(features, params, ang0):
    """features: (B, F, input_dim) -> (audio (B, (F-1)*hop, 1), linear spec (B*F, NFREQ_PAD))."""
    B, F, _ = features.shape
    N = B * F
    tile = _row_tile(B, F)
    G = N // tile

    cparams = pltpu.CompilerParams(
        dimension_semantics=("parallel",),       # shard row tiles across v7x's two TensorCores
        vmem_limit_bytes=32 * 1024 * 1024,       # tiles sized well inside v7x's 64 MiB VMEM
    )

    def row_spec(c):
        return pl.BlockSpec((tile, c), lambda i: (i, 0))

    def bcast_spec(shape):
        nd = len(shape)
        return pl.BlockSpec(shape, lambda i: (0,) * nd)

    x_rows = features.reshape(N, INPUT_DIM)

    # ---- conv layer 1 (tiled rows; emits per-tile BN partial stats) ----
    h1, st1 = pl.pallas_call(
        functools.partial(conv1_kernel, frames_per_item=F),
        grid=(G,),
        in_specs=[row_spec(INPUT_DIM), bcast_spec((3, INPUT_DIM, C1))],
        out_specs=[row_spec(C1), pl.BlockSpec((1, 2, C1), lambda i: (i, 0, 0))],
        out_shape=[jax.ShapeDtypeStruct((N, C1), jnp.float32),
                   jax.ShapeDtypeStruct((G, 2, C1), jnp.float32)],
        compiler_params=cparams,
    )(x_rows, params["w1"])
    a1, b1 = _bn_affine(st1, params["g1"], params["beta1"], N)

    # ---- BN1 + ReLU + conv layer 2 ----
    h2, st2 = pl.pallas_call(
        functools.partial(conv2_kernel, frames_per_item=F),
        grid=(G,),
        in_specs=[row_spec(C1), bcast_spec((1, C1)), bcast_spec((1, C1)),
                  bcast_spec((3, C1, C2))],
        out_specs=[row_spec(C2), pl.BlockSpec((1, 2, C2), lambda i: (i, 0, 0))],
        out_shape=[jax.ShapeDtypeStruct((N, C2), jnp.float32),
                   jax.ShapeDtypeStruct((G, 2, C2), jnp.float32)],
        compiler_params=cparams,
    )(h1, a1, b1, params["w2"])
    a2, b2 = _bn_affine(st2, params["g2"], params["beta2"], N)

    # ---- BN2 + ReLU + conv layer 3 + exp/clamp + inverse-mel (fused) ----
    spec = pl.pallas_call(
        functools.partial(conv3_kernel, frames_per_item=F),
        grid=(G,),
        in_specs=[row_spec(C2), bcast_spec((1, C2)), bcast_spec((1, C2)),
                  bcast_spec((3, C2, N_MELS)), bcast_spec((1, N_MELS)),
                  bcast_spec((N_MELS, NFREQ_PAD))],
        out_specs=row_spec(NFREQ_PAD),
        out_shape=jax.ShapeDtypeStruct((N, NFREQ_PAD), jnp.float32),
        compiler_params=cparams,
    )(h2, a2, b2, params["w3"], params["b3"], PINV_PAD)

    # ---- Griffin-Lim (power=2.0 -> sqrt magnitudes) ----
    mag = jnp.sqrt(spec)

    def gl_synth(ang):
        return pl.pallas_call(
            gl_synth_kernel,
            grid=(G,),
            in_specs=[row_spec(NFREQ_PAD), row_spec(NP2),
                      bcast_spec((NP2, N_FFT)), bcast_spec((1, N_FFT))],
            out_specs=row_spec(N_FFT),
            out_shape=jax.ShapeDtypeStruct((N, N_FFT), jnp.float32),
            compiler_params=cparams,
        )(mag, ang, MINV_NP, WINDOW_ROW)

    def gl_analysis(frames_rows, tprev):
        return pl.pallas_call(
            gl_analysis_kernel,
            grid=(G,),
            in_specs=[row_spec(N_FFT), bcast_spec((1, N_FFT)),
                      bcast_spec((N_FFT, NP2)), row_spec(NP2)],
            out_specs=[row_spec(NP2), row_spec(NP2)],
            out_shape=[jax.ShapeDtypeStruct((N, NP2), jnp.float32),
                       jax.ShapeDtypeStruct((N, NP2), jnp.float32)],
            compiler_params=cparams,
        )(frames_rows, WINDOW_ROW, MFWD_NP, tprev)

    def gl_body(_, carry):
        ang, tprev = carry
        wframes = gl_synth(ang).reshape(B, F, N_FFT)
        audio = _istft_center(wframes)                    # overlap-add / envelope glue
        frames = _frames_center(audio, F).reshape(N, N_FFT)
        ang_new, rebuilt = gl_analysis(frames, tprev)
        return ang_new, rebuilt

    ang, _ = jax.lax.fori_loop(
        0, GL_ITERS, gl_body, (ang0, jnp.zeros((N, NP2), jnp.float32)))

    audio = _istft_center(gl_synth(ang).reshape(B, F, N_FFT))
    return audio[..., None], spec


# ------------------------------------ parameters ---------------------------------------------
def init_params(key):
    ks = jax.random.split(key, 6)

    def conv_w(k, cin, cout):
        bound = 1.0 / math.sqrt(cin * 3)
        # stored as (K, Cin, Cout) bf16 for the per-tap matmuls (f32 accumulation in-kernel)
        return jax.random.uniform(k, (3, cin, cout), jnp.float32, -bound, bound
                                  ).astype(jnp.bfloat16)

    def conv_b(k, cin, cout):
        bound = 1.0 / math.sqrt(cin * 3)
        return jax.random.uniform(k, (1, cout), jnp.float32, -bound, bound)

    return {
        "w1": conv_w(ks[0], INPUT_DIM, C1), "b1": conv_b(ks[1], INPUT_DIM, C1),
        "g1": jnp.ones((1, C1), jnp.float32), "beta1": jnp.zeros((1, C1), jnp.float32),
        "w2": conv_w(ks[2], C1, C2), "b2": conv_b(ks[3], C1, C2),
        "g2": jnp.ones((1, C2), jnp.float32), "beta2": jnp.zeros((1, C2), jnp.float32),
        "w3": conv_w(ks[4], C2, N_MELS), "b3": conv_b(ks[5], C2, N_MELS),
    }


# -------------------------------- pure-JAX reference -----------------------------------------
def reference(features, params, ang0):
    """Mirror of the module forward (including b1/b2, which cancel under training-mode BN),
    with the same bf16 matmul-operand policy as the kernels."""
    hp = jax.lax.Precision.HIGHEST
    B, F, _ = features.shape
    N = B * F

    def conv3_ref(xrows, w, bias):
        xr = xrows.reshape(B, F, -1)
        xp = jnp.pad(xr, ((0, 0), (1, 0), (0, 0)))[:, :F]
        xn = jnp.pad(xr, ((0, 0), (0, 1), (0, 0)))[:, 1:]

        def mm(a, wk):
            return jnp.einsum("btc,cd->btd",
                              a.astype(jnp.bfloat16).astype(jnp.float32),
                              wk.astype(jnp.float32), precision=hp)

        out = mm(xp, w[0]) + mm(xr, w[1]) + mm(xn, w[2]) + bias[0]
        return out.reshape(N, -1)

    def bn_relu_ref(h, gamma, beta):
        mean = jnp.mean(h, axis=0)
        var = jnp.maximum(jnp.mean(h * h, axis=0) - mean * mean, 0.0)
        a = gamma[0] * jax.lax.rsqrt(var + BN_EPS)
        return jnp.maximum((h - mean) * a + beta[0], 0.0)

    h = conv3_ref(features.reshape(N, INPUT_DIM), params["w1"], params["b1"])
    h = bn_relu_ref(h, params["g1"], params["beta1"])
    h = conv3_ref(h, params["w2"], params["b2"])
    h = bn_relu_ref(h, params["g2"], params["beta2"])
    mel = conv3_ref(h, params["w3"], params["b3"])
    mel = jnp.maximum(jnp.exp(mel) - 1e-5, 0.0)
    spec = jnp.maximum(
        jnp.einsum("nm,mf->nf", mel, jnp.asarray(PINV_PAD), precision=hp), 0.0)

    mag = jnp.sqrt(spec)

    def synth(ang):
        c = jnp.concatenate([mag * ang[:, :NFREQ_PAD], mag * ang[:, NFREQ_PAD:]], axis=1)
        frames = jnp.einsum("nk,kt->nt", c, jnp.asarray(MINV_NP), precision=hp)
        return (frames * WINDOW_NP[None, :]).reshape(B, F, N_FFT)

    def analysis(frames_rows, tprev):
        rebuilt = jnp.einsum("nt,tk->nk", frames_rows * WINDOW_NP[None, :],
                             jnp.asarray(MFWD_NP), precision=hp)
        t = rebuilt - MOM_F * tprev
        tre, tim = t[:, :NFREQ_PAD], t[:, NFREQ_PAD:]
        denom = jnp.sqrt(tre * tre + tim * tim) + 1e-16
        return jnp.concatenate([tre / denom, tim / denom], axis=1), rebuilt

    ang, tprev = ang0, jnp.zeros((N, NP2), jnp.float32)
    for _ in range(GL_ITERS):
        audio = _istft_center(synth(ang))
        frames = _frames_center(audio, F).reshape(N, N_FFT)
        ang, tprev = analysis(frames, tprev)

    audio = _istft_center(synth(ang))
    return audio[..., None], spec


# ------------------------------------------ main ---------------------------------------------
if __name__ == "__main__":
    key = jax.random.PRNGKey(0)
    pkey, fkey, phkey = jax.random.split(key, 3)
    params = init_params(pkey)

    B, F = 2, 16                                 # features: (batch, time_steps, input_dim)
    features = jax.random.normal(fkey, (B, F, INPUT_DIM), jnp.float32)

    # Deterministic random initial phase (GriffinLim rand_init), shared with the reference.
    # TODO(synk): torchaudio draws torch.rand complex64; here it is a unit-modulus phase.
    u = 2.0 * np.pi * jax.random.uniform(phkey, (B * F, NFREQ_PAD), jnp.float32)
    ang0 = jnp.concatenate([jnp.cos(u), jnp.sin(u)], axis=1)

    fwd = jax.jit(audio_reconstructor)
    audio, spec = jax.block_until_ready(fwd(features, params, ang0))
    assert audio.shape == (B, (F - 1) * HOP, 1), audio.shape

    ref_audio, ref_spec = jax.block_until_ready(jax.jit(reference)(features, params, ang0))

    spec_np, ref_spec_np = np.asarray(spec), np.asarray(ref_spec)
    scale = float(np.max(np.abs(ref_spec_np)) + 1e-6)
    np.testing.assert_allclose(spec_np, ref_spec_np, rtol=2e-2, atol=2e-2 * scale)
    spec_rel = np.linalg.norm(spec_np - ref_spec_np) / (np.linalg.norm(ref_spec_np) + 1e-12)
    assert spec_rel < 2e-2, spec_rel

    a_np, ra_np = np.asarray(audio), np.asarray(ref_audio)
    audio_rel = np.linalg.norm(a_np - ra_np) / (np.linalg.norm(ra_np) + 1e-12)
    assert audio_rel < 5e-2, audio_rel

    print("KERNEL_OK")
</pallas_src>

<mosaic_0001>
module attributes {stable_mosaic.version = 11 : i64} {
  func.func @conv1_kernel(%arg0: i32, %arg1: memref<32x512xf32, #tpu.memory_space<vmem>>, %arg2: memref<3x512x512xbf16, #tpu.memory_space<vmem>>, %arg3: memref<32x512xf32, #tpu.memory_space<vmem>>, %arg4: memref<1x2x512xf32, #tpu.memory_space<vmem>>) attributes {dimension_semantics = [#tpu.dimension_semantics<parallel>], iteration_bounds = array<i64: 1>, scalar_prefetch = 0 : i64, scratch_operands = 0 : i64, tpu.core_type = #tpu.core_type<tc>, window_params = [{transform_indices = @transform_0, window_bounds = array<i64: 32, 512>}, {pipeline_mode = #tpu.pipeline_mode<synchronous>, transform_indices = @transform_1, window_bounds = array<i64: 3, 512, 512>}, {transform_indices = @transform_2, window_bounds = array<i64: 32, 512>}, {transform_indices = @transform_3, window_bounds = array<i64: 1, 2, 512>}]} {
    %c0 = arith.constant 0 : index
    %c0_0 = arith.constant 0 : index
    %0 = vector.load %arg1[%c0, %c0_0] : memref<32x512xf32, #tpu.memory_space<vmem>>, vector<32x512xf32>
    %cst = arith.constant 0.000000e+00 : f32
    %1 = vector.broadcast %cst : f32 to vector<1x512xf32>
    %2 = vector.extract_strided_slice %0 {offsets = [0, 0], sizes = [31, 512], strides = [1, 1]} : vector<32x512xf32> to vector<31x512xf32>
    %3 = tpu.concatenate %1, %2 in 0 : vector<1x512xf32>, vector<31x512xf32> -> vector<32x512xf32>
    %4 = vector.extract_strided_slice %0 {offsets = [1, 0], sizes = [31, 512], strides = [1, 1]} : vector<32x512xf32> to vector<31x512xf32>
    %5 = tpu.concatenate %4, %1 in 0 : vector<31x512xf32>, vector<1x512xf32> -> vector<32x512xf32>
    %6 = tpu.iota {dimensions = array<i32: 0>} : vector<32x1xi32>
    %c16_i32 = arith.constant 16 : i32
    %c0_i32 = arith.constant 0 : i32
    %7 = arith.cmpi eq, %c16_i32, %c0_i32 : i32
    %c1_i32 = arith.constant 1 : i32
    %8 = arith.select %7, %c1_i32, %c16_i32 : i32
    %9 = vector.broadcast %8 : i32 to vector<32x1xi32>
    %10 = arith.remsi %6, %9 : vector<32x1xi32>
    %c0_i32_1 = arith.constant 0 : i32
    %11 = vector.broadcast %c0_i32_1 : i32 to vector<32x1xi32>
    %12 = arith.cmpi ne, %10, %11 : vector<32x1xi32>
    %c0_i32_2 = arith.constant 0 : i32
    %13 = vector.broadcast %c0_i32_2 : i32 to vector<32x1xi32>
    %14 = arith.cmpi slt, %10, %13 : vector<32x1xi32>
    %c0_i32_3 = arith.constant 0 : i32
    %15 = arith.cmpi slt, %8, %c0_i32_3 : i32
    %16 = vector.broadcast %15 : i1 to vector<32x1xi1>
    %17 = vector.broadcast %16 : vector<32x1xi1> to vector<32x1xi1>
    %18 = arith.xori %14, %17 : vector<32x1xi1>
    %19 = arith.andi %18, %12 : vector<32x1xi1>
    %20 = vector.broadcast %8 : i32 to vector<32x1xi32>
    %21 = arith.addi %10, %20 : vector<32x1xi32>
    %22 = arith.select %19, %21, %10 : vector<32x1xi1>, vector<32x1xi32>
    %c0_i32_4 = arith.constant 0 : i32
    %23 = vector.broadcast %c0_i32_4 : i32 to vector<32x1xi32>
    %24 = arith.cmpi ne, %22, %23 : vector<32x1xi32>
    %25 = arith.extui %24 : vector<32x1xi1> to vector<32x1xi32>
    %26 = arith.sitofp %25 : vector<32x1xi32> to vector<32x1xf32>
    %c16_i32_5 = arith.constant 16 : i32
    %c0_i32_6 = arith.constant 0 : i32
    %27 = arith.cmpi eq, %c16_i32_5, %c0_i32_6 : i32
    %c1_i32_7 = arith.constant 1 : i32
    %28 = arith.select %27, %c1_i32_7, %c16_i32_5 : i32
    %29 = vector.broadcast %28 : i32 to vector<32x1xi32>
    %30 = arith.remsi %6, %29 : vector<32x1xi32>
    %c0_i32_8 = arith.constant 0 : i32
    %31 = vector.broadcast %c0_i32_8 : i32 to vector<32x1xi32>
    %32 = arith.cmpi ne, %30, %31 : vector<32x1xi32>
    %c0_i32_9 = arith.constant 0 : i32
    %33 = vector.broadcast %c0_i32_9 : i32 to vector<32x1xi32>
    %34 = arith.cmpi slt, %30, %33 : vector<32x1xi32>
    %c0_i32_10 = arith.constant 0 : i32
    %35 = arith.cmpi slt, %28, %c0_i32_10 : i32
    %36 = vector.broadcast %35 : i1 to vector<32x1xi1>
    %37 = vector.broadcast %36 : vector<32x1xi1> to vector<32x1xi1>
    %38 = arith.xori %34, %37 : vector<32x1xi1>
    %39 = arith.andi %38, %32 : vector<32x1xi1>
    %40 = vector.broadcast %28 : i32 to vector<32x1xi32>
    %41 = arith.addi %30, %40 : vector<32x1xi32>
    %42 = arith.select %39, %41, %30 : vector<32x1xi1>, vector<32x1xi32>
    %c15_i32 = arith.constant 15 : i32
    %43 = vector.broadcast %c15_i32 : i32 to vector<32x1xi32>
    %44 = arith.cmpi ne, %42, %43 : vector<32x1xi32>
    %45 = arith.extui %44 : vector<32x1xi1> to vector<32x1xi32>
    %46 = arith.sitofp %45 : vector<32x1xi32> to vector<32x1xf32>
    %47 = vector.broadcast %26 : vector<32x1xf32> to vector<32x512xf32>
    %48 = arith.mulf %3, %47 : vector<32x512xf32>
    %49 = vector.broadcast %46 : vector<32x1xf32> to vector<32x512xf32>
    %50 = arith.mulf %5, %49 : vector<32x512xf32>
    %51 = arith.truncf %48 : vector<32x512xf32> to vector<32x512xbf16>
    %c0_11 = arith.constant 0 : index
    %c0_12 = arith.constant 0 : index
    %c0_13 = arith.constant 0 : index
    %52 = vector.load %arg2[%c0_11, %c0_12, %c0_13] : memref<3x512x512xbf16, #tpu.memory_space<vmem>>, vector<1x512x512xbf16>
    %53 = vector.shape_cast %52 : vector<1x512x512xbf16> to vector<512x512xbf16>
    %cst_14 = arith.constant dense<0.000000e+00> : vector<32x512xf32>
    %54 = tpu.matmul %51, %53, %cst_14 {dimension_numbers = #tpu.dot_dimension_numbers<[1], [0], [0], [1], [0, 0, 1, 1], [], []>} : vector<32x512xbf16>, vector<512x512xbf16>, vector<32x512xf32> -> vector<32x512xf32>
    %55 = arith.truncf %0 : vector<32x512xf32> to vector<32x512xbf16>
    %c1 = arith.constant 1 : index
    %c0_15 = arith.constant 0 : index
    %c0_16 = arith.constant 0 : index
    %56 = vector.load %arg2[%c1, %c0_15, %c0_16] : memref<3x512x512xbf16, #tpu.memory_space<vmem>>, vector<1x512x512xbf16>
    %57 = vector.shape_cast %56 : vector<1x512x512xbf16> to vector<512x512xbf16>
    %cst_17 = arith.constant dense<0.000000e+00> : vector<32x512xf32>
    %58 = tpu.matmul %55, %57, %cst_17 {dimension_numbers = #tpu.dot_dimension_numbers<[1], [0], [0], [1], [0, 0, 1, 1], [], []>} : vector<32x512xbf16>, vector<512x512xbf16>, vector<32x512xf32> -> vector<32x512xf32>
    %59 = arith.addf %54, %58 : vector<32x512xf32>
    %60 = arith.truncf %50 : vector<32x512xf32> to vector<32x512xbf16>
    %c2 = arith.constant 2 : index
    %c0_18 = arith.constant 0 : index
    %c0_19 = arith.constant 0 : index
    %61 = vector.load %arg2[%c2, %c0_18, %c0_19] : memref<3x512x512xbf16, #tpu.memory_space<vmem>>, vector<1x512x512xbf16>
    %62 = vector.shape_cast %61 : vector<1x512x512xbf16> to vector<512x512xbf16>
    %cst_20 = arith.constant dense<0.000000e+00> : vector<32x512xf32>
    %63 = tpu.matmul %60, %62, %cst_20 {dimension_numbers = #tpu.dot_dimension_numbers<[1], [0], [0], [1], [0, 0, 1, 1], [], []>} : vector<32x512xbf16>, vector<512x512xbf16>, vector<32x512xf32> -> vector<32x512xf32>
    %64 = arith.addf %59, %63 : vector<32x512xf32>
    %c0_21 = arith.constant 0 : index
    %c0_22 = arith.constant 0 : index
    %65 = vector.load %arg3[%c0_21, %c0_22] : memref<32x512xf32, #tpu.memory_space<vmem>>, vector<32x512xf32>
    tpu.vector_store %arg3[%c0_21, %c0_22], %64 {strides = array<i32>} : memref<32x512xf32, #tpu.memory_space<vmem>>, vector<32x512xf32>,
    %cst_23 = arith.constant dense<0.000000e+00> : vector<512xf32>
    %66 = vector.multi_reduction <add>, %64, %cst_23 [0] : vector<32x512xf32> to vector<512xf32>
    %67 = vector.shape_cast %66 : vector<512xf32> to vector<1x512xf32>
    %68 = arith.mulf %64, %64 : vector<32x512xf32>
    %cst_24 = arith.constant dense<0.000000e+00> : vector<512xf32>
    %69 = vector.multi_reduction <add>, %68, %cst_24 [0] : vector<32x512xf32> to vector<512xf32>
    %70 = vector.shape_cast %69 : vector<512xf32> to vector<1x512xf32>
    %71 = tpu.concatenate %67, %70 in 0 : vector<1x512xf32>, vector<1x512xf32> -> vector<2x512xf32>
    %c0_25 = arith.constant 0 : index
    %c0_26 = arith.constant 0 : index
    %c0_27 = arith.constant 0 : index
    %72 = vector.load %arg4[%c0_25, %c0_26, %c0_27] : memref<1x2x512xf32, #tpu.memory_space<vmem>>, vector<1x2x512xf32>
    %73 = vector.shape_cast %72 : vector<1x2x512xf32> to vector<2x512xf32>
    %74 = vector.shape_cast %71 : vector<2x512xf32> to vector<1x2x512xf32>
    tpu.vector_store %arg4[%c0_25, %c0_26, %c0_27], %74 {strides = array<i32>} : memref<1x2x512xf32, #tpu.memory_space<vmem>>, vector<1x2x512xf32>,
    return
  }
  func.func @transform_0(%arg0: i32) -> (i32, i32) {
    %c0_i32 = arith.constant 0 : i32
    %c0_i32_0 = arith.constant 0 : i32
    return %arg0, %c0_i32 : i32, i32
  }
  func.func @transform_1(%arg0: i32) -> (i32, i32, i32) {
    %c0_i32 = arith.constant 0 : i32
    %c0_i32_0 = arith.constant 0 : i32
    %c0_i32_1 = arith.constant 0 : i32
    %c0_i32_2 = arith.constant 0 : i32
    return %c0_i32, %c0_i32_0, %c0_i32_1 : i32, i32, i32
  }
  func.func @transform_2(%arg0: i32) -> (i32, i32) {
    %c0_i32 = arith.constant 0 : i32
    %c0_i32_0 = arith.constant 0 : i32
    return %arg0, %c0_i32 : i32, i32
  }
  func.func @transform_3(%arg0: i32) -> (i32, i32, i32) {
    %c0_i32 = arith.constant 0 : i32
    %c0_i32_0 = arith.constant 0 : i32
    %c0_i32_1 = arith.constant 0 : i32
    return %arg0, %c0_i32, %c0_i32_0 : i32, i32, i32
  }
}

module attributes {stable_mosaic.version = 11 : i64} {
  func.func @conv2_kernel(%arg0: i32, %arg1: memref<32x512xf32, #tpu.memory_space<vmem>>, %arg2: memref<1x512xf32, #tpu.memory_space<vmem>>, %arg3: memref<1x512xf32, #tpu.memory_space<vmem>>, %arg4: memref<3x512x256xbf16, #tpu.memory_space<vmem>>, %arg5: memref<32x256xf32, #tpu.memory_space<vmem>>, %arg6: memref<1x2x256xf32, #tpu.memory_space<vmem>>) attributes {dimension_semantics = [#tpu.dimension_semantics<parallel>], iteration_bounds = array<i64: 1>, scalar_prefetch = 0 : i64, scratch_operands = 0 : i64, tpu.core_type = #tpu.core_type<tc>, window_params = [{transform_indices = @transform_0, window_bounds = array<i64: 32, 512>}, {pipeline_mode = #tpu.pipeline_mode<synchronous>, transform_indices = @transform_1, window_bounds = array<i64: 1, 512>}, {pipeline_mode = #tpu.pipeline_mode<synchronous>, transform_indices = @transform_2, window_bounds = array<i64: 1, 512>}, {pipeline_mode = #tpu.pipeline_mode<synchronous>, transform_indices = @transform_3, window_bounds = array<i64: 3, 512, 256>}, {transform_indices = @transform_4, window_bounds = array<i64: 32, 256>}, {transform_indices = @transform_5, window_bounds = array<i64: 1, 2, 256>}]} {
    %c0 = arith.constant 0 : index
    %c0_0 = arith.constant 0 : index
    %0 = vector.load %arg1[%c0, %c0_0] : memref<32x512xf32, #tpu.memory_space<vmem>>, vector<32x512xf32>
    %c0_1 = arith.constant 0 : index
    %c0_2 = arith.constant 0 : index
    %1 = vector.load %arg2[%c0_1, %c0_2] : memref<1x512xf32, #tpu.memory_space<vmem>>, vector<1x512xf32>
    %2 = vector.broadcast %1 : vector<1x512xf32> to vector<32x512xf32>
    %3 = arith.mulf %0, %2 : vector<32x512xf32>
    %c0_3 = arith.constant 0 : index
    %c0_4 = arith.constant 0 : index
    %4 = vector.load %arg3[%c0_3, %c0_4] : memref<1x512xf32, #tpu.memory_space<vmem>>, vector<1x512xf32>
    %5 = vector.broadcast %4 : vector<1x512xf32> to vector<32x512xf32>
    %6 = arith.addf %3, %5 : vector<32x512xf32>
    %cst = arith.constant 0.000000e+00 : f32
    %7 = vector.broadcast %cst : f32 to vector<32x512xf32>
    %8 = arith.maximumf %6, %7 : vector<32x512xf32>
    %cst_5 = arith.constant 0.000000e+00 : f32
    %9 = vector.broadcast %cst_5 : f32 to vector<1x512xf32>
    %10 = vector.extract_strided_slice %8 {offsets = [0, 0], sizes = [31, 512], strides = [1, 1]} : vector<32x512xf32> to vector<31x512xf32>
    %11 = tpu.concatenate %9, %10 in 0 : vector<1x512xf32>, vector<31x512xf32> -> vector<32x512xf32>
    %12 = vector.extract_strided_slice %8 {offsets = [1, 0], sizes = [31, 512], strides = [1, 1]} : vector<32x512xf32> to vector<31x512xf32>
    %13 = tpu.concatenate %12, %9 in 0 : vector<31x512xf32>, vector<1x512xf32> -> vector<32x512xf32>
    %14 = tpu.iota {dimensions = array<i32: 0>} : vector<32x1xi32>
    %c16_i32 = arith.constant 16 : i32
    %c0_i32 = arith.constant 0 : i32
    %15 = arith.cmpi eq, %c16_i32, %c0_i32 : i32
    %c1_i32 = arith.constant 1 : i32
    %16 = arith.select %15, %c1_i32, %c16_i32 : i32
    %17 = vector.broadcast %16 : i32 to vector<32x1xi32>
    %18 = arith.remsi %14, %17 : vector<32x1xi32>
    %c0_i32_6 = arith.constant 0 : i32
    %19 = vector.broadcast %c0_i32_6 : i32 to vector<32x1xi32>
    %20 = arith.cmpi ne, %18, %19 : vector<32x1xi32>
    %c0_i32_7 = arith.constant 0 : i32
    %21 = vector.broadcast %c0_i32_7 : i32 to vector<32x1xi32>
    %22 = arith.cmpi slt, %18, %21 : vector<32x1xi32>
    %c0_i32_8 = arith.constant 0 : i32
    %23 = arith.cmpi slt, %16, %c0_i32_8 : i32
    %24 = vector.broadcast %23 : i1 to vector<32x1xi1>
    %25 = vector.broadcast %24 : vector<32x1xi1> to vector<32x1xi1>
    %26 = arith.xori %22, %25 : vector<32x1xi1>
    %27 = arith.andi %26, %20 : vector<32x1xi1>
    %28 = vector.broadcast %16 : i32 to vector<32x1xi32>
    %29 = arith.addi %18, %28 : vector<32x1xi32>
    %30 = arith.select %27, %29, %18 : vector<32x1xi1>, vector<32x1xi32>
    %c0_i32_9 = arith.constant 0 : i32
    %31 = vector.broadcast %c0_i32_9 : i32 to vector<32x1xi32>
    %32 = arith.cmpi ne, %30, %31 : vector<32x1xi32>
    %33 = arith.extui %32 : vector<32x1xi1> to vector<32x1xi32>
    %34 = arith.sitofp %33 : vector<32x1xi32> to vector<32x1xf32>
    %c16_i32_10 = arith.constant 16 : i32
    %c0_i32_11 = arith.constant 0 : i32
    %35 = arith.cmpi eq, %c16_i32_10, %c0_i32_11 : i32
    %c1_i32_12 = arith.constant 1 : i32
    %36 = arith.select %35, %c1_i32_12, %c16_i32_10 : i32
    %37 = vector.broadcast %36 : i32 to vector<32x1xi32>
    %38 = arith.remsi %14, %37 : vector<32x1xi32>
    %c0_i32_13 = arith.constant 0 : i32
    %39 = vector.broadcast %c0_i32_13 : i32 to vector<32x1xi32>
    %40 = arith.cmpi ne, %38, %39 : vector<32x1xi32>
    %c0_i32_14 = arith.constant 0 : i32
    %41 = vector.broadcast %c0_i32_14 : i32 to vector<32x1xi32>
    %42 = arith.cmpi slt, %38, %41 : vector<32x1xi32>
    %c0_i32_15 = arith.constant 0 : i32
    %43 = arith.cmpi slt, %36, %c0_i32_15 : i32
    %44 = vector.broadcast %43 : i1 to vector<32x1xi1>
    %45 = vector.broadcast %44 : vector<32x1xi1> to vector<32x1xi1>
    %46 = arith.xori %42, %45 : vector<32x1xi1>
    %47 = arith.andi %46, %40 : vector<32x1xi1>
    %48 = vector.broadcast %36 : i32 to vector<32x1xi32>
    %49 = arith.addi %38, %48 : vector<32x1xi32>
    %50 = arith.select %47, %49, %38 : vector<32x1xi1>, vector<32x1xi32>
    %c15_i32 = arith.constant 15 : i32
    %51 = vector.broadcast %c15_i32 : i32 to vector<32x1xi32>
    %52 = arith.cmpi ne, %50, %51 : vector<32x1xi32>
    %53 = arith.extui %52 : vector<32x1xi1> to vector<32x1xi32>
    %54 = arith.sitofp %53 : vector<32x1xi32> to vector<32x1xf32>
    %55 = vector.broadcast %34 : vector<32x1xf32> to vector<32x512xf32>
    %56 = arith.mulf %11, %55 : vector<32x512xf32>
    %57 = vector.broadcast %54 : vector<32x1xf32> to vector<32x512xf32>
    %58 = arith.mulf %13, %57 : vector<32x512xf32>
    %59 = arith.truncf %56 : vector<32x512xf32> to vector<32x512xbf16>
    %c0_16 = arith.constant 0 : index
    %c0_17 = arith.constant 0 : index
    %c0_18 = arith.constant 0 : index
    %60 = vector.load %arg4[%c0_16, %c0_17, %c0_18] : memref<3x512x256xbf16, #tpu.memory_space<vmem>>, vector<1x512x256xbf16>
    %61 = vector.shape_cast %60 : vector<1x512x256xbf16> to vector<512x256xbf16>
    %cst_19 = arith.constant dense<0.000000e+00> : vector<32x256xf32>
    %62 = tpu.matmul %59, %61, %cst_19 {dimension_numbers = #tpu.dot_dimension_numbers<[1], [0], [0], [1], [0, 0, 1, 1], [], []>} : vector<32x512xbf16>, vector<512x256xbf16>, vector<32x256xf32> -> vector<32x256xf32>
    %63 = arith.truncf %8 : vector<32x512xf32> to vector<32x512xbf16>
    %c1 = arith.constant 1 : index
    %c0_20 = arith.constant 0 : index
    %c0_21 = arith.constant 0 : index
    %64 = vector.load %arg4[%c1, %c0_20, %c0_21] : memref<3x512x256xbf16, #tpu.memory_space<vmem>>, vector<1x512x256xbf16>
    %65 = vector.shape_cast %64 : vector<1x512x256xbf16> to vector<512x256xbf16>
    %cst_22 = arith.constant dense<0.000000e+00> : vector<32x256xf32>
    %66 = tpu.matmul %63, %65, %cst_22 {dimension_numbers = #tpu.dot_dimension_numbers<[1], [0], [0], [1], [0, 0, 1, 1], [], []>} : vector<32x512xbf16>, vector<512x256xbf16>, vector<32x256xf32> -> vector<32x256xf32>
    %67 = arith.addf %62, %66 : vector<32x256xf32>
    %68 = arith.truncf %58 : vector<32x512xf32> to vector<32x512xbf16>
    %c2 = arith.constant 2 : index
    %c0_23 = arith.constant 0 : index
    %c0_24 = arith.constant 0 : index
    %69 = vector.load %arg4[%c2, %c0_23, %c0_24] : memref<3x512x256xbf16, #tpu.memory_space<vmem>>, vector<1x512x256xbf16>
    %70 = vector.shape_cast %69 : vector<1x512x256xbf16> to vector<512x256xbf16>
    %cst_25 = arith.constant dense<0.000000e+00> : vector<32x256xf32>
    %71 = tpu.matmul %68, %70, %cst_25 {dimension_numbers = #tpu.dot_dimension_numbers<[1], [0], [0], [1], [0, 0, 1, 1], [], []>} : vector<32x512xbf16>, vector<512x256xbf16>, vector<32x256xf32> -> vector<32x256xf32>
    %72 = arith.addf %67, %71 : vector<32x256xf32>
    %c0_26 = arith.constant 0 : index
    %c0_27 = arith.constant 0 : index
    %73 = vector.load %arg5[%c0_26, %c0_27] : memref<32x256xf32, #tpu.memory_space<vmem>>, vector<32x256xf32>
    tpu.vector_store %arg5[%c0_26, %c0_27], %72 {strides = array<i32>} : memref<32x256xf32, #tpu.memory_space<vmem>>, vector<32x256xf32>,
    %cst_28 = arith.constant dense<0.000000e+00> : vector<256xf32>
    %74 = vector.multi_reduction <add>, %72, %cst_28 [0] : vector<32x256xf32> to vector<256xf32>
    %75 = vector.shape_cast %74 : vector<256xf32> to vector<1x256xf32>
    %76 = arith.mulf %72, %72 : vector<32x256xf32>
    %cst_29 = arith.constant dense<0.000000e+00> : vector<256xf32>
    %77 = vector.multi_reduction <add>, %76, %cst_29 [0] : vector<32x256xf32> to vector<256xf32>
    %78 = vector.shape_cast %77 : vector<256xf32> to vector<1x256xf32>
    %79 = tpu.concatenate %75, %78 in 0 : vector<1x256xf32>, vector<1x256xf32> -> vector<2x256xf32>
    %c0_30 = arith.constant 0 : index
    %c0_31 = arith.constant 0 : index
    %c0_32 = arith.constant 0 : index
    %80 = vector.load %arg6[%c0_30, %c0_31, %c0_32] : memref<1x2x256xf32, #tpu.memory_space<vmem>>, vector<1x2x256xf32>
    %81 = vector.shape_cast %80 : vector<1x2x256xf32> to vector<2x256xf32>
    %82 = vector.shape_cast %79 : vector<2x256xf32> to vector<1x2x256xf32>
    tpu.vector_store %arg6[%c0_30, %c0_31, %c0_32], %82 {strides = array<i32>} : memref<1x2x256xf32, #tpu.memory_space<vmem>>, vector<1x2x256xf32>,
    return
  }
  func.func @transform_0(%arg0: i32) -> (i32, i32) {
    %c0_i32 = arith.constant 0 : i32
    %c0_i32_0 = arith.constant 0 : i32
    return %arg0, %c0_i32 : i32, i32
  }
  func.func @transform_1(%arg0: i32) -> (i32, i32) {
    %c0_i32 = arith.constant 0 : i32
    %c0_i32_0 = arith.constant 0 : i32
    %c0_i32_1 = arith.constant 0 : i32
    return %c0_i32, %c0_i32_0 : i32, i32
  }
  func.func @transform_2(%arg0: i32) -> (i32, i32) {
    %c0_i32 = arith.constant 0 : i32
    %c0_i32_0 = arith.constant 0 : i32
    %c0_i32_1 = arith.constant 0 : i32
    return %c0_i32, %c0_i32_0 : i32, i32
  }
  func.func @transform_3(%arg0: i32) -> (i32, i32, i32) {
    %c0_i32 = arith.constant 0 : i32
    %c0_i32_0 = arith.constant 0 : i32
    %c0_i32_1 = arith.constant 0 : i32
    %c0_i32_2 = arith.constant 0 : i32
    return %c0_i32, %c0_i32_0, %c0_i32_1 : i32, i32, i32
  }
  func.func @transform_4(%arg0: i32) -> (i32, i32) {
    %c0_i32 = arith.constant 0 : i32
    %c0_i32_0 = arith.constant 0 : i32
    return %arg0, %c0_i32 : i32, i32
  }
  func.func @transform_5(%arg0: i32) -> (i32, i32, i32) {
    %c0_i32 = arith.constant 0 : i32
    %c0_i32_0 = arith.constant 0 : i32
    %c0_i32_1 = arith.constant 0 : i32
    return %arg0, %c0_i32, %c0_i32_0 : i32, i32, i32
  }
}

module attributes {stable_mosaic.version = 11 : i64} {
  func.func @conv3_kernel(%arg0: i32, %arg1: memref<32x256xf32, #tpu.memory_space<vmem>>, %arg2: memref<1x256xf32, #tpu.memory_space<vmem>>, %arg3: memref<1x256xf32, #tpu.memory_space<vmem>>, %arg4: memref<3x256x128xbf16, #tpu.memory_space<vmem>>, %arg5: memref<1x128xf32, #tpu.memory_space<vmem>>, %arg6: memref<128x256xf32, #tpu.memory_space<vmem>>, %arg7: memref<32x256xf32, #tpu.memory_space<vmem>>) attributes {dimension_semantics = [#tpu.dimension_semantics<parallel>], iteration_bounds = array<i64: 1>, scalar_prefetch = 0 : i64, scratch_operands = 0 : i64, tpu.core_type = #tpu.core_type<tc>, window_params = [{transform_indices = @transform_0, window_bounds = array<i64: 32, 256>}, {pipeline_mode = #tpu.pipeline_mode<synchronous>, transform_indices = @transform_1, window_bounds = array<i64: 1, 256>}, {pipeline_mode = #tpu.pipeline_mode<synchronous>, transform_indices = @transform_2, window_bounds = array<i64: 1, 256>}, {pipeline_mode = #tpu.pipeline_mode<synchronous>, transform_indices = @transform_3, window_bounds = array<i64: 3, 256, 128>}, {pipeline_mode = #tpu.pipeline_mode<synchronous>, transform_indices = @transform_4, window_bounds = array<i64: 1, 128>}, {pipeline_mode = #tpu.pipeline_mode<synchronous>, transform_indices = @transform_5, window_bounds = array<i64: 128, 256>}, {transform_indices = @transform_6, window_bounds = array<i64: 32, 256>}]} {
    %c0 = arith.constant 0 : index
    %c0_0 = arith.constant 0 : index
    %0 = vector.load %arg1[%c0, %c0_0] : memref<32x256xf32, #tpu.memory_space<vmem>>, vector<32x256xf32>
    %c0_1 = arith.constant 0 : index
    %c0_2 = arith.constant 0 : index
    %1 = vector.load %arg2[%c0_1, %c0_2] : memref<1x256xf32, #tpu.memory_space<vmem>>, vector<1x256xf32>
    %2 = vector.broadcast %1 : vector<1x256xf32> to vector<32x256xf32>
    %3 = arith.mulf %0, %2 : vector<32x256xf32>
    %c0_3 = arith.constant 0 : index
    %c0_4 = arith.constant 0 : index
    %4 = vector.load %arg3[%c0_3, %c0_4] : memref<1x256xf32, #tpu.memory_space<vmem>>, vector<1x256xf32>
    %5 = vector.broadcast %4 : vector<1x256xf32> to vector<32x256xf32>
    %6 = arith.addf %3, %5 : vector<32x256xf32>
    %cst = arith.constant 0.000000e+00 : f32
    %7 = vector.broadcast %cst : f32 to vector<32x256xf32>
    %8 = arith.maximumf %6, %7 : vector<32x256xf32>
    %cst_5 = arith.constant 0.000000e+00 : f32
    %9 = vector.broadcast %cst_5 : f32 to vector<1x256xf32>
    %10 = vector.extract_strided_slice %8 {offsets = [0, 0], sizes = [31, 256], strides = [1, 1]} : vector<32x256xf32> to vector<31x256xf32>
    %11 = tpu.concatenate %9, %10 in 0 : vector<1x256xf32>, vector<31x256xf32> -> vector<32x256xf32>
    %12 = vector.extract_strided_slice %8 {offsets = [1, 0], sizes = [31, 256], strides = [1, 1]} : vector<32x256xf32> to vector<31x256xf32>
    %13 = tpu.concatenate %12, %9 in 0 : vector<31x256xf32>, vector<1x256xf32> -> vector<32x256xf32>
    %14 = tpu.iota {dimensions = array<i32: 0>} : vector<32x1xi32>
    %c16_i32 = arith.constant 16 : i32
    %c0_i32 = arith.constant 0 : i32
    %15 = arith.cmpi eq, %c16_i32, %c0_i32 : i32
    %c1_i32 = arith.constant 1 : i32
    %16 = arith.select %15, %c1_i32, %c16_i32 : i32
    %17 = vector.broadcast %16 : i32 to vector<32x1xi32>
    %18 = arith.remsi %14, %17 : vector<32x1xi32>
    %c0_i32_6 = arith.constant 0 : i32
    %19 = vector.broadcast %c0_i32_6 : i32 to vector<32x1xi32>
    %20 = arith.cmpi ne, %18, %19 : vector<32x1xi32>
    %c0_i32_7 = arith.constant 0 : i32
    %21 = vector.broadcast %c0_i32_7 : i32 to vector<32x1xi32>
    %22 = arith.cmpi slt, %18, %21 : vector<32x1xi32>
    %c0_i32_8 = arith.constant 0 : i32
    %23 = arith.cmpi slt, %16, %c0_i32_8 : i32
    %24 = vector.broadcast %23 : i1 to vector<32x1xi1>
    %25 = vector.broadcast %24 : vector<32x1xi1> to vector<32x1xi1>
    %26 = arith.xori %22, %25 : vector<32x1xi1>
    %27 = arith.andi %26, %20 : vector<32x1xi1>
    %28 = vector.broadcast %16 : i32 to vector<32x1xi32>
    %29 = arith.addi %18, %28 : vector<32x1xi32>
    %30 = arith.select %27, %29, %18 : vector<32x1xi1>, vector<32x1xi32>
    %c0_i32_9 = arith.constant 0 : i32
    %31 = vector.broadcast %c0_i32_9 : i32 to vector<32x1xi32>
    %32 = arith.cmpi ne, %30, %31 : vector<32x1xi32>
    %33 = arith.extui %32 : vector<32x1xi1> to vector<32x1xi32>
    %34 = arith.sitofp %33 : vector<32x1xi32> to vector<32x1xf32>
    %c16_i32_10 = arith.constant 16 : i32
    %c0_i32_11 = arith.constant 0 : i32
    %35 = arith.cmpi eq, %c16_i32_10, %c0_i32_11 : i32
    %c1_i32_12 = arith.constant 1 : i32
    %36 = arith.select %35, %c1_i32_12, %c16_i32_10 : i32
    %37 = vector.broadcast %36 : i32 to vector<32x1xi32>
    %38 = arith.remsi %14, %37 : vector<32x1xi32>
    %c0_i32_13 = arith.constant 0 : i32
    %39 = vector.broadcast %c0_i32_13 : i32 to vector<32x1xi32>
    %40 = arith.cmpi ne, %38, %39 : vector<32x1xi32>
    %c0_i32_14 = arith.constant 0 : i32
    %41 = vector.broadcast %c0_i32_14 : i32 to vector<32x1xi32>
    %42 = arith.cmpi slt, %38, %41 : vector<32x1xi32>
    %c0_i32_15 = arith.constant 0 : i32
    %43 = arith.cmpi slt, %36, %c0_i32_15 : i32
    %44 = vector.broadcast %43 : i1 to vector<32x1xi1>
    %45 = vector.broadcast %44 : vector<32x1xi1> to vector<32x1xi1>
    %46 = arith.xori %42, %45 : vector<32x1xi1>
    %47 = arith.andi %46, %40 : vector<32x1xi1>
    %48 = vector.broadcast %36 : i32 to vector<32x1xi32>
    %49 = arith.addi %38, %48 : vector<32x1xi32>
    %50 = arith.select %47, %49, %38 : vector<32x1xi1>, vector<32x1xi32>
    %c15_i32 = arith.constant 15 : i32
    %51 = vector.broadcast %c15_i32 : i32 to vector<32x1xi32>
    %52 = arith.cmpi ne, %50, %51 : vector<32x1xi32>
    %53 = arith.extui %52 : vector<32x1xi1> to vector<32x1xi32>
    %54 = arith.sitofp %53 : vector<32x1xi32> to vector<32x1xf32>
    %55 = vector.broadcast %34 : vector<32x1xf32> to vector<32x256xf32>
    %56 = arith.mulf %11, %55 : vector<32x256xf32>
    %57 = vector.broadcast %54 : vector<32x1xf32> to vector<32x256xf32>
    %58 = arith.mulf %13, %57 : vector<32x256xf32>
    %59 = arith.truncf %56 : vector<32x256xf32> to vector<32x256xbf16>
    %c0_16 = arith.constant 0 : index
    %c0_17 = arith.constant 0 : index
    %c0_18 = arith.constant 0 : index
    %60 = vector.load %arg4[%c0_16, %c0_17, %c0_18] : memref<3x256x128xbf16, #tpu.memory_space<vmem>>, vector<1x256x128xbf16>
    %61 = vector.shape_cast %60 : vector<1x256x128xbf16> to vector<256x128xbf16>
    %cst_19 = arith.constant dense<0.000000e+00> : vector<32x128xf32>
    %62 = tpu.matmul %59, %61, %cst_19 {dimension_numbers = #tpu.dot_dimension_numbers<[1], [0], [0], [1], [0, 0, 1, 1], [], []>} : vector<32x256xbf16>, vector<256x128xbf16>, vector<32x128xf32> -> vector<32x128xf32>
    %63 = arith.truncf %8 : vector<32x256xf32> to vector<32x256xbf16>
    %c1 = arith.constant 1 : index
    %c0_20 = arith.constant 0 : index
    %c0_21 = arith.constant 0 : index
    %64 = vector.load %arg4[%c1, %c0_20, %c0_21] : memref<3x256x128xbf16, #tpu.memory_space<vmem>>, vector<1x256x128xbf16>
    %65 = vector.shape_cast %64 : vector<1x256x128xbf16> to vector<256x128xbf16>
    %cst_22 = arith.constant dense<0.000000e+00> : vector<32x128xf32>
    %66 = tpu.matmul %63, %65, %cst_22 {dimension_numbers = #tpu.dot_dimension_numbers<[1], [0], [0], [1], [0, 0, 1, 1], [], []>} : vector<32x256xbf16>, vector<256x128xbf16>, vector<32x128xf32> -> vector<32x128xf32>
    %67 = arith.addf %62, %66 : vector<32x128xf32>
    %68 = arith.truncf %58 : vector<32x256xf32> to vector<32x256xbf16>
    %c2 = arith.constant 2 : index
    %c0_23 = arith.constant 0 : index
    %c0_24 = arith.constant 0 : index
    %69 = vector.load %arg4[%c2, %c0_23, %c0_24] : memref<3x256x128xbf16, #tpu.memory_space<vmem>>, vector<1x256x128xbf16>
    %70 = vector.shape_cast %69 : vector<1x256x128xbf16> to vector<256x128xbf16>
    %cst_25 = arith.constant dense<0.000000e+00> : vector<32x128xf32>
    %71 = tpu.matmul %68, %70, %cst_25 {dimension_numbers = #tpu.dot_dimension_numbers<[1], [0], [0], [1], [0, 0, 1, 1], [], []>} : vector<32x256xbf16>, vector<256x128xbf16>, vector<32x128xf32> -> vector<32x128xf32>
    %72 = arith.addf %67, %71 : vector<32x128xf32>
    %c0_26 = arith.constant 0 : index
    %c0_27 = arith.constant 0 : index
    %73 = vector.load %arg5[%c0_26, %c0_27] : memref<1x128xf32, #tpu.memory_space<vmem>>, vector<1x128xf32>
    %74 = vector.broadcast %73 : vector<1x128xf32> to vector<32x128xf32>
    %75 = arith.addf %72, %74 : vector<32x128xf32>
    %76 = math.exp %75 : vector<32x128xf32>
    %cst_28 = arith.constant 9.99999974E-6 : f32
    %77 = vector.broadcast %cst_28 : f32 to vector<32x128xf32>
    %78 = arith.subf %76, %77 : vector<32x128xf32>
    %cst_29 = arith.constant 0.000000e+00 : f32
    %79 = vector.broadcast %cst_29 : f32 to vector<32x128xf32>
    %80 = arith.maximumf %78, %79 : vector<32x128xf32>
    %c0_30 = arith.constant 0 : index
    %c0_31 = arith.constant 0 : index
    %81 = vector.load %arg6[%c0_30, %c0_31] : memref<128x256xf32, #tpu.memory_space<vmem>>, vector<128x256xf32>
    %cst_32 = arith.constant dense<0.000000e+00> : vector<32x256xf32>
    %82 = tpu.matmul %80, %81, %cst_32 {dimension_numbers = #tpu.dot_dimension_numbers<[1], [0], [0], [1], [0, 0, 1, 1], [], []>} : vector<32x128xf32>, vector<128x256xf32>, vector<32x256xf32> -> vector<32x256xf32>
    %cst_33 = arith.constant 0.000000e+00 : f32
    %83 = vector.broadcast %cst_33 : f32 to vector<32x256xf32>
    %84 = arith.maximumf %82, %83 : vector<32x256xf32>
    %c0_34 = arith.constant 0 : index
    %c0_35 = arith.constant 0 : index
    %85 = vector.load %arg7[%c0_34, %c0_35] : memref<32x256xf32, #tpu.memory_space<vmem>>, vector<32x256xf32>
    tpu.vector_store %arg7[%c0_34, %c0_35], %84 {strides = array<i32>} : memref<32x256xf32, #tpu.memory_space<vmem>>, vector<32x256xf32>,
    return
  }
  func.func @transform_0(%arg0: i32) -> (i32, i32) {
    %c0_i32 = arith.constant 0 : i32
    %c0_i32_0 = arith.constant 0 : i32
    return %arg0, %c0_i32 : i32, i32
  }
  func.func @transform_1(%arg0: i32) -> (i32, i32) {
    %c0_i32 = arith.constant 0 : i32
    %c0_i32_0 = arith.constant 0 : i32
    %c0_i32_1 = arith.constant 0 : i32
    return %c0_i32, %c0_i32_0 : i32, i32
  }
  func.func @transform_2(%arg0: i32) -> (i32, i32) {
    %c0_i32 = arith.constant 0 : i32
    %c0_i32_0 = arith.constant 0 : i32
    %c0_i32_1 = arith.constant 0 : i32
    return %c0_i32, %c0_i32_0 : i32, i32
  }
  func.func @transform_3(%arg0: i32) -> (i32, i32, i32) {
    %c0_i32 = arith.constant 0 : i32
    %c0_i32_0 = arith.constant 0 : i32
    %c0_i32_1 = arith.constant 0 : i32
    %c0_i32_2 = arith.constant 0 : i32
    return %c0_i32, %c0_i32_0, %c0_i32_1 : i32, i32, i32
  }
  func.func @transform_4(%arg0: i32) -> (i32, i32) {
    %c0_i32 = arith.constant 0 : i32
    %c0_i32_0 = arith.constant 0 : i32
    %c0_i32_1 = arith.constant 0 : i32
    return %c0_i32, %c0_i32_0 : i32, i32
  }
  func.func @transform_5(%arg0: i32) -> (i32, i32) {
    %c0_i32 = arith.constant 0 : i32
    %c0_i32_0 = arith.constant 0 : i32
    %c0_i32_1 = arith.constant 0 : i32
    return %c0_i32, %c0_i32_0 : i32, i32
  }
  func.func @transform_6(%arg0: i32) -> (i32, i32) {
    %c0_i32 = arith.constant 0 : i32
    %c0_i32_0 = arith.constant 0 : i32
    return %arg0, %c0_i32 : i32, i32
  }
}

module attributes {stable_mosaic.version = 11 : i64} {
  func.func @gl_synth_kernel(%arg0: i32, %arg1: memref<32x256xf32, #tpu.memory_space<vmem>>, %arg2: memref<32x512xf32, #tpu.memory_space<vmem>>, %arg3: memref<512x256xf32, #tpu.memory_space<vmem>>, %arg4: memref<1x256xf32, #tpu.memory_space<vmem>>, %arg5: memref<32x256xf32, #tpu.memory_space<vmem>>) attributes {dimension_semantics = [#tpu.dimension_semantics<parallel>], iteration_bounds = array<i64: 1>, scalar_prefetch = 0 : i64, scratch_operands = 0 : i64, tpu.core_type = #tpu.core_type<tc>, window_params = [{transform_indices = @transform_0, window_bounds = array<i64: 32, 256>}, {transform_indices = @transform_1, window_bounds = array<i64: 32, 512>}, {pipeline_mode = #tpu.pipeline_mode<synchronous>, transform_indices = @transform_2, window_bounds = array<i64: 512, 256>}, {pipeline_mode = #tpu.pipeline_mode<synchronous>, transform_indices = @transform_3, window_bounds = array<i64: 1, 256>}, {transform_indices = @transform_4, window_bounds = array<i64: 32, 256>}]} {
    %c0 = arith.constant 0 : index
    %c0_0 = arith.constant 0 : index
    %0 = vector.load %arg1[%c0, %c0_0] : memref<32x256xf32, #tpu.memory_space<vmem>>, vector<32x256xf32>
    %c0_1 = arith.constant 0 : index
    %c0_2 = arith.constant 0 : index
    %1 = vector.load %arg2[%c0_1, %c0_2] : memref<32x512xf32, #tpu.memory_space<vmem>>, vector<32x512xf32>
    %2 = vector.extract_strided_slice %1 {offsets = [0, 0], sizes = [32, 256], strides = [1, 1]} : vector<32x512xf32> to vector<32x256xf32>
    %3 = arith.mulf %0, %2 : vector<32x256xf32>
    %4 = vector.extract_strided_slice %1 {offsets = [0, 256], sizes = [32, 256], strides = [1, 1]} : vector<32x512xf32> to vector<32x256xf32>
    %5 = arith.mulf %0, %4 : vector<32x256xf32>
    %6 = tpu.concatenate %3, %5 in 1 : vector<32x256xf32>, vector<32x256xf32> -> vector<32x512xf32>
    %c0_3 = arith.constant 0 : index
    %c0_4 = arith.constant 0 : index
    %7 = vector.load %arg3[%c0_3, %c0_4] : memref<512x256xf32, #tpu.memory_space<vmem>>, vector<512x256xf32>
    %cst = arith.constant dense<0.000000e+00> : vector<32x256xf32>
    %8 = tpu.matmul %6, %7, %cst {dimension_numbers = #tpu.dot_dimension_numbers<[1], [0], [0], [1], [0, 0, 1, 1], [], []>} : vector<32x512xf32>, vector<512x256xf32>, vector<32x256xf32> -> vector<32x256xf32>
    %c0_5 = arith.constant 0 : index
    %c0_6 = arith.constant 0 : index
    %9 = vector.load %arg4[%c0_5, %c0_6] : memref<1x256xf32, #tpu.memory_space<vmem>>, vector<1x256xf32>
    %10 = vector.broadcast %9 : vector<1x256xf32> to vector<32x256xf32>
    %11 = arith.mulf %8, %10 : vector<32x256xf32>
    %c0_7 = arith.constant 0 : index
    %c0_8 = arith.constant 0 : index
    %12 = vector.load %arg5[%c0_7, %c0_8] : memref<32x256xf32, #tpu.memory_space<vmem>>, vector<32x256xf32>
    tpu.vector_store %arg5[%c0_7, %c0_8], %11 {strides = array<i32>} : memref<32x256xf32, #tpu.memory_space<vmem>>, vector<32x256xf32>,
    return
  }
  func.func @transform_0(%arg0: i32) -> (i32, i32) {
    %c0_i32 = arith.constant 0 : i32
    %c0_i32_0 = arith.constant 0 : i32
    return %arg0, %c0_i32 : i32, i32
  }
  func.func @transform_1(%arg0: i32) -> (i32, i32) {
    %c0_i32 = arith.constant 0 : i32
    %c0_i32_0 = arith.constant 0 : i32
    return %arg0, %c0_i32 : i32, i32
  }
  func.func @transform_2(%arg0: i32) -> (i32, i32) {
    %c0_i32 = arith.constant 0 : i32
    %c0_i32_0 = arith.constant 0 : i32
    %c0_i32_1 = arith.constant 0 : i32
    return %c0_i32, %c0_i32_0 : i32, i32
  }
  func.func @transform_3(%arg0: i32) -> (i32, i32) {
    %c0_i32 = arith.constant 0 : i32
    %c0_i32_0 = arith.constant 0 : i32
    %c0_i32_1 = arith.constant 0 : i32
    return %c0_i32, %c0_i32_0 : i32, i32
  }
  func.func @transform_4(%arg0: i32) -> (i32, i32) {
    %c0_i32 = arith.constant 0 : i32
    %c0_i32_0 = arith.constant 0 : i32
    return %arg0, %c0_i32 : i32, i32
  }
}

module attributes {stable_mosaic.version = 11 : i64} {
  func.func @gl_analysis_kernel(%arg0: i32, %arg1: memref<32x256xf32, #tpu.memory_space<vmem>>, %arg2: memref<1x256xf32, #tpu.memory_space<vmem>>, %arg3: memref<256x512xf32, #tpu.memory_space<vmem>>, %arg4: memref<32x512xf32, #tpu.memory_space<vmem>>, %arg5: memref<32x512xf32, #tpu.memory_space<vmem>>, %arg6: memref<32x512xf32, #tpu.memory_space<vmem>>) attributes {dimension_semantics = [#tpu.dimension_semantics<parallel>], iteration_bounds = array<i64: 1>, scalar_prefetch = 0 : i64, scratch_operands = 0 : i64, tpu.core_type = #tpu.core_type<tc>, window_params = [{transform_indices = @transform_0, window_bounds = array<i64: 32, 256>}, {pipeline_mode = #tpu.pipeline_mode<synchronous>, transform_indices = @transform_1, window_bounds = array<i64: 1, 256>}, {pipeline_mode = #tpu.pipeline_mode<synchronous>, transform_indices = @transform_2, window_bounds = array<i64: 256, 512>}, {transform_indices = @transform_3, window_bounds = array<i64: 32, 512>}, {transform_indices = @transform_4, window_bounds = array<i64: 32, 512>}, {transform_indices = @transform_5, window_bounds = array<i64: 32, 512>}]} {
    %c0 = arith.constant 0 : index
    %c0_0 = arith.constant 0 : index
    %0 = vector.load %arg1[%c0, %c0_0] : memref<32x256xf32, #tpu.memory_space<vmem>>, vector<32x256xf32>
    %c0_1 = arith.constant 0 : index
    %c0_2 = arith.constant 0 : index
    %1 = vector.load %arg2[%c0_1, %c0_2] : memref<1x256xf32, #tpu.memory_space<vmem>>, vector<1x256xf32>
    %2 = vector.broadcast %1 : vector<1x256xf32> to vector<32x256xf32>
    %3 = arith.mulf %0, %2 : vector<32x256xf32>
    %c0_3 = arith.constant 0 : index
    %c0_4 = arith.constant 0 : index
    %4 = vector.load %arg3[%c0_3, %c0_4] : memref<256x512xf32, #tpu.memory_space<vmem>>, vector<256x512xf32>
    %cst = arith.constant dense<0.000000e+00> : vector<32x512xf32>
    %5 = tpu.matmul %3, %4, %cst {dimension_numbers = #tpu.dot_dimension_numbers<[1], [0], [0], [1], [0, 0, 1, 1], [], []>} : vector<32x256xf32>, vector<256x512xf32>, vector<32x512xf32> -> vector<32x512xf32>
    %c0_5 = arith.constant 0 : index
    %c0_6 = arith.constant 0 : index
    %6 = vector.load %arg4[%c0_5, %c0_6] : memref<32x512xf32, #tpu.memory_space<vmem>>, vector<32x512xf32>
    %cst_7 = arith.constant 0.497487426 : f32
    %7 = vector.broadcast %cst_7 : f32 to vector<32x512xf32>
    %8 = arith.mulf %7, %6 : vector<32x512xf32>
    %9 = arith.subf %5, %8 : vector<32x512xf32>
    %10 = vector.extract_strided_slice %9 {offsets = [0, 0], sizes = [32, 256], strides = [1, 1]} : vector<32x512xf32> to vector<32x256xf32>
    %11 = vector.extract_strided_slice %9 {offsets = [0, 256], sizes = [32, 256], strides = [1, 1]} : vector<32x512xf32> to vector<32x256xf32>
    %12 = arith.mulf %10, %10 : vector<32x256xf32>
    %13 = arith.mulf %11, %11 : vector<32x256xf32>
    %14 = arith.addf %12, %13 : vector<32x256xf32>
    %15 = math.sqrt %14 : vector<32x256xf32>
    %cst_8 = arith.constant 1.000000e-16 : f32
    %16 = vector.broadcast %cst_8 : f32 to vector<32x256xf32>
    %17 = arith.addf %15, %16 : vector<32x256xf32>
    %18 = arith.divf %10, %17 : vector<32x256xf32>
    %19 = arith.divf %11, %17 : vector<32x256xf32>
    %20 = tpu.concatenate %18, %19 in 1 : vector<32x256xf32>, vector<32x256xf32> -> vector<32x512xf32>
    %c0_9 = arith.constant 0 : index
    %c0_10 = arith.constant 0 : index
    %21 = vector.load %arg5[%c0_9, %c0_10] : memref<32x512xf32, #tpu.memory_space<vmem>>, vector<32x512xf32>
    tpu.vector_store %arg5[%c0_9, %c0_10], %20 {strides = array<i32>} : memref<32x512xf32, #tpu.memory_space<vmem>>, vector<32x512xf32>,
    %c0_11 = arith.constant 0 : index
    %c0_12 = arith.constant 0 : index
    %22 = vector.load %arg6[%c0_11, %c0_12] : memref<32x512xf32, #tpu.memory_space<vmem>>, vector<32x512xf32>
    tpu.vector_store %arg6[%c0_11, %c0_12], %5 {strides = array<i32>} : memref<32x512xf32, #tpu.memory_space<vmem>>, vector<32x512xf32>,
    return
  }
  func.func @transform_0(%arg0: i32) -> (i32, i32) {
    %c0_i32 = arith.constant 0 : i32
    %c0_i32_0 = arith.constant 0 : i32
    return %arg0, %c0_i32 : i32, i32
  }
  func.func @transform_1(%arg0: i32) -> (i32, i32) {
    %c0_i32 = arith.constant 0 : i32
    %c0_i32_0 = arith.constant 0 : i32
    %c0_i32_1 = arith.constant 0 : i32
    return %c0_i32, %c0_i32_0 : i32, i32
  }
  func.func @transform_2(%arg0: i32) -> (i32, i32) {
    %c0_i32 = arith.constant 0 : i32
    %c0_i32_0 = arith.constant 0 : i32
    %c0_i32_1 = arith.constant 0 : i32
    return %c0_i32, %c0_i32_0 : i32, i32
  }
  func.func @transform_3(%arg0: i32) -> (i32, i32) {
    %c0_i32 = arith.constant 0 : i32
    %c0_i32_0 = arith.constant 0 : i32
    return %arg0, %c0_i32 : i32, i32
  }
  func.func @transform_4(%arg0: i32) -> (i32, i32) {
    %c0_i32 = arith.constant 0 : i32
    %c0_i32_0 = arith.constant 0 : i32
    return %arg0, %c0_i32 : i32, i32
  }
  func.func @transform_5(%arg0: i32) -> (i32, i32) {
    %c0_i32 = arith.constant 0 : i32
    %c0_i32_0 = arith.constant 0 : i32
    return %arg0, %c0_i32 : i32, i32
  }
}

</mosaic_0001>

<bundles_post_ra>
// kernel: audio_reconstructor.6
= control target key start
LH: loop header
LB: loop body
LE: loop exit
PB: predicated region body
PF: predicated region fallthrough
CT: control target
= control target key end

     0   :  { %v34_v21 = vlaneseq  ;;  %vm88_vm1 = vcmask 1040384   ;;  %vm113_vm3 = vcmask 1046528   ;;  %s1665_s3 = inlined_call_operand.vmem [shape: bf16[3,256,128], index: 3, kind: input, shape index: {}]   ;;  %s1666_s0 = inlined_call_operand.vmem [shape: f32[32,256], index: 0, kind: input, shape index: {}]   ;;  %s1667_s1 = inlined_call_operand.vmem [shape: f32[1,256], index: 1, kind: input, shape index: {}]   ;;  %s1668_s2 = inlined_call_operand.vmem [shape: f32[1,256], index: 2, kind: input, shape index: {}]   ;;  %s1669_s5 = inlined_call_operand.vmem [shape: f32[128,256], index: 5, kind: input, shape index: {}]   ;;  %s1670_s4 = inlined_call_operand.vmem [shape: f32[1,128], index: 4, kind: input, shape index: {}]   ;;  %s1671_s6 = inlined_call_operand.vmem [shape: f32[32,256], index: 6, kind: output, shape index: {}]  }
   0x1   :  { %v1186_v0 = vld [vmem:[%s1665_s3 + $0xc0] sm:$0xff]   ;;  %v1190_v4 = vld [vmem:[%s1665_s3 + $0xc8] sm:$0xff]   ;;  %v1194_v8 = vld [vmem:[%s1665_s3 + $0xd0] sm:$0xff]  }
   0x2   :  { %v1187_v1 = vld [vmem:[%s1665_s3 + $0x40] sm:$0xff]   ;;  %1069 = vmatprep.subr.bf16.mxu0 %v1186_v0  ;;  %v1191_v5 = vld [vmem:[%s1665_s3 + $0x48] sm:$0xff]   ;;  %v1195_v9 = vld [vmem:[%s1665_s3 + $0x50] sm:$0xff]   ;;  %v1353_v26 = vshrl.u32 %v34_v21, 7 }
   0x3   :  { %v1188_v2 = vld [vmem:[%s1665_s3 + $0x80] sm:$0xff]   ;;  %1097 = vmatprep.subr.bf16.mxu1 %v1187_v1  ;;  %v1192_v6 = vld [vmem:[%s1665_s3 + $0x88] sm:$0xff]   ;;  %v1196_v10 = vld [vmem:[%s1665_s3 + $0x90] sm:$0xff]   ;;  %v1242_v1 = vmov 0.0  }
   0x4   :  { %v1189_v3 = vld [vmem:[%s1665_s3] sm:$0xff]   ;;  %1070 = vmatpush3.bf16.msra.mxu0 %v1188_v2  ;;  %v1193_v7 = vld [vmem:[%s1665_s3 + $0x8] sm:$0xff]   ;;  %v1197_v11 = vld [vmem:[%s1665_s3 + $0x10] sm:$0xff]   ;;  %v36_v31 = vsub.s32 0, %v1353_v26  ;;  %v40_v33 = vsub.s32 1, %v1353_v26  ;;  %v141_v39 = vadd.s32 16, %v1353_v26 }
   0x5   :  { %1098 = vmatpush3.bf16.msra.mxu1 %v1189_v3  ;;  %1071 = vmatprep.subr.bf16.mxu0 %v1190_v4  ;;  %v1198_v12 = vld [vmem:[%s1665_s3 + $0xd8] sm:$0xff]   ;;  %v1202_v16 = vld [vmem:[%s1665_s3 + $0xe0] sm:$0xff]   ;;  %v1206_v20 = vld [vmem:[%s1665_s3 + $0xe8] sm:$0xff]   ;;  %v147_v47 = vand.u32 15, %v1353_v26  ;;  %v140_v58 = vadd.s32 8, %v1353_v26 }
   0x6   :  { %1099 = vmatprep.subr.bf16.mxu1 %v1191_v5  ;;  %v1199_v13 = vld [vmem:[%s1665_s3 + $0x58] sm:$0xff]   ;;  %v1203_v17 = vld [vmem:[%s1665_s3 + $0x60] sm:$0xff]   ;;  %v1207_v22 = vld [vmem:[%s1665_s3 + $0x68] sm:$0xff]   ;;  %v161_v53 = vand.u32 15, %v141_v39 }
   0x7   :  { %v1200_v14 = vld [vmem:[%s1665_s3 + $0x98] sm:$0xff]   ;;  %v1204_v18 = vld [vmem:[%s1665_s3 + $0xa0] sm:$0xff]   ;;  %v1208_v23 = vld [vmem:[%s1665_s3 + $0xa8] sm:$0xff]   ;;  %vm191_vm0 = vcmp.ne.s32.totalorder %v147_v47, 0 }
   0x8   :  { %1072 = vmatpush3.bf16.msra.mxu0 %v1192_v6  ;;  %v1201_v15 = vld [vmem:[%s1665_s3 + $0x18] sm:$0xff]   ;;  %v1205_v19 = vld [vmem:[%s1665_s3 + $0x20] sm:$0xff]   ;;  %v1209_v24 = vld [vmem:[%s1665_s3 + $0x28] sm:$0xff]   ;;  %v948_v2 = vsel %vm191_vm0, 1.0, %v1242_v1  ;;  %vm1421_vm2 = vcmp.ne.s32.totalorder %v161_v53, 0 }
   0x9   :  { %1100 = vmatpush3.bf16.msra.mxu1 %v1193_v7  ;;  %1073 = vmatprep.subr.bf16.mxu0 %v1194_v8  ;;  %v1210_v25 = vld [vmem:[%s1665_s3 + $0xf0] sm:$0xff]   ;;  %v1214_v30 = vld [vmem:[%s1665_s3 + $0xf8] sm:$0xff]   ;;  %v25_v36 = vld [vmem:[%s1666_s0 + $0x8] sm:$0xff] }
   0xa   :  { %1101 = vmatprep.subr.bf16.mxu1 %v1195_v9  ;;  %v1211_v27 = vld [vmem:[%s1665_s3 + $0x70] sm:$0xff]   ;;  %v1215_v32 = vld [vmem:[%s1665_s3 + $0x78] sm:$0xff]   ;;  %v32_v38 = vld [vmem:[%s1667_s1] sm:$0x3]  ;;  %v154_v9 = vand.u32 15, %v140_v58 }
   0xb   :  { %v1212_v28 = vld [vmem:[%s1665_s3 + $0xb0] sm:$0xff]   ;;  %v1216_v34 = vld [vmem:[%s1665_s3 + $0xb8] sm:$0xff]   ;;  %v37_v40 = vrot.slane %v32_v38, %v36_v31  ;;  %v41_v41 = vrot.slane %v32_v38, %v40_v33  ;;  %v52_v42 = vld [vmem:[%s1668_s2] sm:$0x3] }
   0xc   :  { %1074 = vmatpush3.bf16.msra.mxu0 %v1196_v10  ;;  %v1213_v29 = vld [vmem:[%s1665_s3 + $0x30] sm:$0xff]   ;;  %v1217_v35 = vld [vmem:[%s1665_s3 + $0x38] sm:$0xff]   ;;  %v24_v43 = vld [vmem:[%s1666_s0] sm:$0xff]  ;;  %v1397_v45 = vrot.slane %v52_v42, %v36_v31  ;;  %v61_v46 = vrot.slane %v52_v42, %v40_v33  ;;  %vm1458_vm4 = vcmp.ne.s32.totalorder %v154_v9, 15 }
   0xd   :  { %1102 = vmatpush3.bf16.msra.mxu1 %v1197_v11  ;;  %1075 = vmatprep.subr.bf16.mxu0 %v1198_v12  ;;  %v27_v37 = vld [vmem:[%s1666_s0 + $0x18] sm:$0xff]  ;;  %v26_v44 = vld [vmem:[%s1666_s0 + $0x10] sm:$0xff]  ;;  %v1218_v48 = vld [vmem:[%s1665_s3 + $0x140] sm:$0xff]   ;;  %v45_v49 = vmul.f32 %v41_v41, %v25_v36  ;;  %v44_v51 = vmul.f32 %v37_v40, %v24_v43 }
   0xe   :  { %1103 = vmatprep.subr.bf16.mxu1 %v1199_v13  ;;  %v47_v50 = vmul.f32 %v41_v41, %v27_v37  ;;  %v46_v52 = vmul.f32 %v37_v40, %v26_v44  ;;  %v1219_v3 = vld [vmem:[%s1665_s3 + $0x100] sm:$0xff]   ;;  %v1220_v8 = vld [vmem:[%s1665_s3 + $0x148] sm:$0xff]   ;;  %v31_v21 = vld [vmem:[%s1666_s0 + $0x38] sm:$0xff] }
   0xf   :  { %v65_v54 = vadd.f32 %v61_v46, %v45_v49  ;;  %v64_v56 = vadd.f32 %v1397_v45, %v44_v51  ;;  %v1224_v36 = vld [vmem:[%s1665_s3 + $0x158] sm:$0xff]   ;;  %v1228_v4 = vld [vmem:[%s1665_s3 + $0x168] sm:$0xff]  }
  0x10   :  { %1076 = vmatpush3.bf16.msra.mxu0 %v1200_v14  ;;  %v67_v55 = vadd.f32 %v61_v46, %v47_v50  ;;  %v66_v57 = vadd.f32 %v1397_v45, %v46_v52  ;;  %v1225_v47 = vld [vmem:[%s1665_s3 + $0x118] sm:$0xff]   ;;  %v950_v50 = vsel %vm1458_vm4, 1.0, %v1242_v1 }
  0x11   :  { %1104 = vmatpush3.bf16.msra.mxu1 %v1201_v15  ;;  %1077 = vmatprep.subr.bf16.mxu0 %v1202_v16  ;;  %v1406_v59 = vmax.f32 %v65_v54, 0.0  ;;  %v1410_v61 = vmax.f32 %v64_v56, 0.0  ;;  %v1221_v15 = vld [vmem:[%s1665_s3 + $0x108] sm:$0xff]  }
  0x12   :  { %1105 = vmatprep.subr.bf16.mxu1 %v1203_v17  ;;  %v1408_v60 = vmax.f32 %v67_v55, 0.0  ;;  %v1412_v62 = vmax.f32 %v66_v57, 0.0 }
  0x13   :  { %v89_v0 = vrot.slane %v1410_v61, 7  ;;  %v90_v5 = vrot.slane %v1406_v59, 7  ;;  %v117_v33 = vrot.slane %v1406_v59, 1 }
  0x14   :  { %1078 = vmatpush3.bf16.msra.mxu0 %v1204_v18  ;;  %v268_v63 = vpack.c.bf16 %v1408_v60, %v1406_v59  ;;  %v93_v6 = vrot.slane %v1408_v60, 7  ;;  %v267_v7 = vpack.c.bf16 %v1412_v62, %v1410_v61  ;;  %v91_v11 = vrot.slane %v1412_v62, 7  ;;  %v1222_v18 = vld [vmem:[%s1665_s3 + $0x150] sm:$0xff]  }
  0x15   :  { %1106 = vmatpush3.bf16.msra.mxu1 %v1205_v19  ;;  %1079 = vmatprep.subr.bf16.mxu0 %v1206_v20  ;;  %v111_v10 = vsel %vm88_vm1, 0.0, %v89_v0  ;;  %v112_v13 = vsel %vm88_vm1, 0.0, %v90_v5  ;;  %v29_v19 = vld [vmem:[%s1666_s0 + $0x28] sm:$0xff] }
  0x16   :  { %1107 = vmatprep.subr.bf16.mxu1 %v1207_v22  ;;  %432 = vmatprep.mubr.bf16.mxu0 %v268_v63  ;;  %v94_v12 = vsel %vm88_vm1, %v90_v5, %v93_v6  ;;  %v215_v14 = vmul.f32 %v948_v2, %v111_v10  ;;  %v216_v16 = vmul.f32 %v948_v2, %v112_v13  ;;  %v1227_v63 = vld [vmem:[%s1665_s3 + $0x120] sm:$0xff]   ;;  %v1229_v10 = vld [vmem:[%s1665_s3 + $0x128] sm:$0xff]   ;;  %v114_v13 = vrot.slane %v1410_v61, 1 }
  0x17   :  { %v92_v17 = vsel %vm88_vm1, %v89_v0, %v91_v11  ;;  %v49_v22 = vmul.f32 %v41_v41, %v29_v19  ;;  %v1233_v19 = vld [vmem:[%s1665_s3 + $0x138] sm:$0xff]  }
  0x18   :  { %1080 = vmatpush3.bf16.msra.mxu0 %v1208_v23  ;;  %v231_v20 = vpack.c.bf16 %v92_v17, %v215_v14  ;;  %v232_v23 = vpack.c.bf16 %v94_v12, %v216_v16 }
  0x19   :  { %1108 = vmatpush3.bf16.msra.mxu1 %v1209_v24  ;;  %1081 = vmatprep.subr.bf16.mxu0 %v1210_v25  ;;  %v51_v24 = vmul.f32 %v41_v41, %v31_v21  ;;  %v949_v25 = vsel %vm1421_vm2, 1.0, %v1242_v1 }
  0x1a   :  { %1109 = vmatprep.subr.bf16.mxu1 %v1211_v27  ;;  %v28_v27 = vld [vmem:[%s1666_s0 + $0x20] sm:$0xff]  ;;  %577 = vmatprep.mubr.bf16.mxu1 %v232_v23 }
  0x1c   :  { %1082 = vmatpush3.bf16.msra.mxu0 %v1212_v28  ;;  %v30_v28 = vld [vmem:[%s1666_s0 + $0x30] sm:$0xff] }
  0x1d   :  { %1110 = vmatpush3.bf16.msra.mxu1 %v1213_v29  ;;  %1083 = vmatprep.subr.bf16.mxu0 %v1214_v30  ;;  %v69_v29 = vadd.f32 %v61_v46, %v49_v22  ;;  %v48_v30 = vmul.f32 %v37_v40, %v28_v27  ;;  %v50_v31 = vmul.f32 %v37_v40, %v30_v28  ;;  %v118_v40 = vrot.slane %v1408_v60, 1 }
  0x1e   :  { %1111 = vmatprep.subr.bf16.mxu1 %v1215_v32  ;;  %v807_v32 = vld [vmem:[%s1669_s5] sm:$0xff] }
  0x1f   :  { %v1469_v37 = vmax.f32 %v69_v29, 0.0  ;;  %v68_v38 = vadd.f32 %v1397_v45, %v48_v30  ;;  %v70_v39 = vadd.f32 %v1397_v45, %v50_v31  ;;  %v119_v54 = vsel %vm113_vm3, %v117_v33, %v118_v40  ;;  %v808_v30 = vld [vmem:[%s1669_s5 + $0x8] sm:$0xff]  ;;  %v810_v31 = vld [vmem:[%s1669_s5 + $0x18] sm:$0xff] }
  0x20   :  { %1084 = vmatpush3.bf16.msra.mxu0 %v1216_v34  ;;  %v1223_v34 = vld [vmem:[%s1665_s3 + $0x110] sm:$0xff]   ;;  %v1153_v33 = vpack.c.bf16 %v810_v31, %v808_v30 }
  0x21   :  { %1112 = vmatpush3.bf16.msra.mxu1 %v1217_v35  ;;  %1125 = vmatprep.subr.bf16.mxu0 %v1218_v48  ;;  %v71_v35 = vadd.f32 %v61_v46, %v51_v24  ;;  %v97_v42 = vrot.slane %v1469_v37, 7  ;;  %v1477_v43 = vmax.f32 %v68_v38, 0.0  ;;  %v1479_v44 = vmax.f32 %v70_v39, 0.0  ;;  %v811_v39 = vld [vmem:[%s1669_s5 + $0x20] sm:$0xff] }
  0x22   :  { %v142_v46 = vadd.s32 24, %v1353_v26  ;;  %v122_v49 = vrot.slane %v1469_v37, 1  ;;  %v1226_v26 = vld [vmem:[%s1665_s3 + $0x160] sm:$0xff]   ;;  %1154 = vmatprep.subr.bf16.mxu1 %v1153_v33 }
  0x23   :  { %433 = vmatmul.mubr.bf16.vlgmr.msra.gmra.mrb[0].mxu0 %v267_v7  ;;  %v1474_v41 = vmax.f32 %v71_v35, 0.0  ;;  %v98_v51 = vsel %vm88_vm1, %v93_v6, %v97_v42  ;;  %v269_v52 = vpack.c.bf16 %v1479_v44, %v1477_v43  ;;  %v95_v53 = vrot.slane %v1477_v43, 7  ;;  %v812_v35 = vld [vmem:[%s1669_s5 + $0x28] sm:$0xff] }
  0x24   :  { %1126 = vmatpush3.bf16.msra.mxu0 %v1219_v3  ;;  %578 = vmatmul.mubr.bf16.vlgmr.msra.gmra.mrb[0].mxu1 %v231_v20  ;;  %v220_v56 = vmul.f32 %v949_v25, %v98_v51  ;;  %v99_v57 = vrot.slane %v1479_v44, 7  ;;  %v123_v58 = vsel %vm113_vm3, %v118_v40, %v122_v49  ;;  %v168_v7 = vand.u32 15, %v142_v46  ;;  %v813_v40 = vld [vmem:[%s1669_s5 + $0x30] sm:$0xff]  ;;  %v815_v46 = vld [vmem:[%s1669_s5 + $0x40] sm:$0xff] }
  0x25   :  { %1127 = vmatprep.subr.bf16.mxu0 %v1220_v8  ;;  %v270_v45 = vpack.c.bf16 %v1474_v41, %v1469_v37  ;;  %v101_v48 = vrot.slane %v1474_v41, 7  ;;  %v96_v59 = vsel %vm88_vm1, %v91_v11, %v95_v53  ;;  %v226_v60 = vmul.f32 %v950_v50, %v123_v58  ;;  %v1230_v11 = vld [vmem:[%s1665_s3 + $0x170] sm:$0xff]  }
  0x26   :  { %v100_v2 = vsel %vm88_vm1, %v95_v53, %v99_v57  ;;  %v219_v3 = vmul.f32 %v949_v25, %v96_v59  ;;  %v115_v8 = vrot.slane %v1412_v62, 1  ;;  %v120_v9 = vrot.slane %v1477_v43, 1  ;;  %v1231_v62 = vld [vmem:[%s1665_s3 + $0x130] sm:$0xff]   ;;  %v818_v43 = vld [vmem:[%s1669_s5 + $0x58] sm:$0xff]  ;;  %v824_v53 = vld [vmem:[%s1669_s5 + $0x88] sm:$0xff] }
  0x27   :  { %440 = vmatprep.mubr.bf16.mxu0 %v270_v45  ;;  %v102_v55 = vsel %vm88_vm1, %v97_v42, %v101_v48  ;;  %v595_v5 = vpack.c.bf16 %v226_v60, %v119_v54  ;;  %v126_v12 = vrot.slane %v1474_v41, 1  ;;  %vm206_vm5 = vcmp.ne.s32.totalorder %v168_v7, 15  ;;  %v816_v42 = vld [vmem:[%s1669_s5 + $0x48] sm:$0xff]  ;;  %v821_v51 = vld [vmem:[%s1669_s5 + $0x70] sm:$0xff]  ;;  %v826_v54 = vld [vmem:[%s1669_s5 + $0x98] sm:$0xff] }
  0x28   :  { %1128 = vmatpush3.bf16.msra.mxu0 %v1221_v15  ;;  %v234_v0 = vpack.c.bf16 %v102_v55, %v220_v56  ;;  %v233_v6 = vpack.c.bf16 %v100_v2, %v219_v3  ;;  %v121_v14 = vsel %vm113_vm3, %v115_v8, %v120_v9  ;;  %v1232_v15 = vld [vmem:[%s1665_s3 + $0x178] sm:$0xff]   ;;  %v951_v17 = vsel %vm206_vm5, 1.0, %v1242_v1  ;;  %v820_v48 = vld [vmem:[%s1669_s5 + $0x68] sm:$0xff]  ;;  %v823_v56 = vld [vmem:[%s1669_s5 + $0x80] sm:$0xff] }
  0x29   :  { %1129 = vmatprep.subr.bf16.mxu0 %v1222_v18  ;;  %v137_v16 = vsel %vm113_vm3, %v126_v12, 0.0  ;;  %v225_v18 = vmul.f32 %v950_v50, %v121_v14  ;;  %v116_v20 = vsel %vm113_vm3, %v114_v13, %v115_v8  ;;  %v124_v21 = vrot.slane %v1479_v44, 1  ;;  %v825_v57 = vld [vmem:[%s1669_s5 + $0x90] sm:$0xff]  ;;  %v828_v59 = vld [vmem:[%s1669_s5 + $0xa8] sm:$0xff]  ;;  %v830_v60 = vld [vmem:[%s1669_s5 + $0xb8] sm:$0xff] }
  0x2a   :  { %585 = vmatprep.mubr.bf16.mxu1 %v234_v0  ;;  %v230_v61 = vmul.f32 %v951_v17, %v137_v16  ;;  %v127_v22 = vsel %vm113_vm3, %v122_v49, %v126_v12  ;;  %v1159_v41 = vpack.c.bf16 %v813_v40, %v811_v39  ;;  %v1161_v44 = vpack.c.bf16 %v818_v43, %v816_v42  ;;  %v822_v49 = vld [vmem:[%s1669_s5 + $0x78] sm:$0xff]  ;;  %v827_v0 = vld [vmem:[%s1669_s5 + $0xa0] sm:$0xff]  ;;  %v829_v2 = vld [vmem:[%s1669_s5 + $0xb0] sm:$0xff] }
  0x2b   :  { %441 = vmatmul.mubr.bf16.gmra.mrb[4].mxu0 %v269_v52  ;;  %v594_v23 = vpack.c.bf16 %v225_v18, %v116_v20  ;;  %v136_v25 = vsel %vm113_vm3, %v124_v21, 0.0  ;;  %v125_v28 = vsel %vm113_vm3, %v120_v9, %v124_v21  ;;  %v1165_v50 = vpack.c.bf16 %v822_v49, %v820_v48  ;;  %v831_v7 = vld [vmem:[%s1669_s5 + $0xc0] sm:$0xff]  ;;  %v833_v8 = vld [vmem:[%s1669_s5 + $0xd0] sm:$0xff] }
  0x2c   :  { %1130 = vmatpush3.bf16.msra.mxu0 %v1223_v34  ;;  %759 = vmatprep.mubr.bf16.mxu0 %v595_v5  ;;  %v597_v24 = vpack.c.bf16 %v230_v61, %v127_v22  ;;  %v229_v27 = vmul.f32 %v951_v17, %v136_v25  ;;  %v809_v34 = vld [vmem:[%s1669_s5 + $0x10] sm:$0xff]  ;;  %v1169_v55 = vpack.c.bf16 %v826_v54, %v824_v53  ;;  %v834_v5 = vld [vmem:[%s1669_s5 + $0xd8] sm:$0xff]  ;;  %v835_v12 = vld [vmem:[%s1669_s5 + $0xe0] sm:$0xff] }
  0x2d   :  { %1131 = vmatprep.subr.bf16.mxu0 %v1224_v36  ;;  %586 = vmatmul.mubr.bf16.gmra.mrb[4].mxu1 %v233_v6  ;;  %v814_v36 = vld [vmem:[%s1669_s5 + $0x38] sm:$0xff]  ;;  %v1155_v37 = vpack.c.bf16 %v809_v34, %v807_v32  ;;  %v1171_v58 = vpack.c.bf16 %v825_v57, %v823_v56  ;;  %v1175_v3 = vpack.c.bf16 %v829_v2, %v827_v0  ;;  %v837_v13 = vld [vmem:[%s1669_s5 + $0xf0] sm:$0xff] }
  0x2e   :  { %903 = vmatprep.mubr.f32.mxu1 %v1242_v1  ;;  %v596_v29 = vpack.c.bf16 %v229_v27, %v125_v28  ;;  %v1157_v38 = vpack.c.bf16 %v814_v36, %v812_v35  ;;  %v1179_v9 = vpack.c.bf16 %v833_v8, %v831_v7  ;;  %v1183_v14 = vpack.c.bf16 %v837_v13, %v835_v12 }
  0x2f   :  { %1156 = vmatpush1.bf16.msra.mxu1 %v1155_v37 }
  0x30   :  { %1132 = vmatpush3.bf16.msra.mxu0 %v1225_v47  ;;  %1158 = vmatprep.subr.bf16.mxu1 %v1157_v38  ;;  %v817_v47 = vld [vmem:[%s1669_s5 + $0x50] sm:$0xff] }
  0x31   :  { %1133 = vmatprep.subr.bf16.mxu0 %v1226_v26  ;;  %v1163_v45 = vpack.c.bf16 %v817_v47, %v815_v46  ;;  %v819_v26 = vld [vmem:[%s1669_s5 + $0x60] sm:$0xff] }
  0x32   :  { %v1167_v52 = vpack.c.bf16 %v821_v51, %v819_v26 }
  0x33   :  { %1160 = vmatpush1.bf16.msra.mxu1 %v1159_v41 }
  0x34   :  { %1134 = vmatpush3.bf16.msra.mxu0 %v1227_v63  ;;  %1162 = vmatprep.subr.bf16.mxu1 %v1161_v44  ;;  %v1173_v63 = vpack.c.bf16 %v830_v60, %v828_v59 }
  0x35   :  { %1135 = vmatprep.subr.bf16.mxu0 %v1228_v4  ;;  %v832_v4 = vld [vmem:[%s1669_s5 + $0xc8] sm:$0xff] }
  0x36   :  { %v1177_v6 = vpack.c.bf16 %v834_v5, %v832_v4 }
  0x37   :  { %1164 = vmatpush1.bf16.msra.mxu1 %v1163_v45  ;;  %v1064_v45 = vld [vmem:[%s1670_s4] ss:$0 sm:$0xff] }
  0x38   :  { %1136 = vmatpush3.bf16.msra.mxu0 %v1229_v10  ;;  %1166 = vmatprep.subr.bf16.mxu1 %v1165_v50  ;;  %v836_v10 = vld [vmem:[%s1669_s5 + $0xe8] sm:$0xff] }
  0x39   :  { %1137 = vmatprep.subr.bf16.mxu0 %v1230_v11  ;;  %v838_v11 = vld [vmem:[%s1669_s5 + $0xf8] sm:$0xff] }
  0x3b   :  { %1168 = vmatpush1.bf16.msra.mxu1 %v1167_v52 }
  0x3c   :  { %1138 = vmatpush3.bf16.msra.mxu0 %v1231_v62  ;;  %1170 = vmatprep.subr.bf16.mxu1 %v1169_v55  ;;  %v1181_v62 = vpack.c.bf16 %v838_v11, %v836_v10 }
  0x3d   :  { %1139 = vmatprep.subr.bf16.mxu0 %v1232_v15 }
  0x3f   :  { %1172 = vmatpush1.bf16.msra.mxu1 %v1171_v58 }
  0x40   :  { %1140 = vmatpush3.bf16.msra.mxu0 %v1233_v19  ;;  %1174 = vmatprep.subr.bf16.mxu1 %v1173_v63 }
  0x43   :  { %760 = vmatmul.mubr.bf16.vlgmr.msra.gmra.mrb[8].mxu0 %v594_v23  ;;  %1176 = vmatpush1.bf16.msra.mxu1 %v1175_v3 }
  0x44   :  { %767 = vmatprep.mubr.bf16.mxu0 %v597_v24  ;;  %1178 = vmatprep.subr.bf16.mxu1 %v1177_v6 }
  0x47   :  { %1180 = vmatpush1.bf16.msra.mxu1 %v1179_v9 }
  0x48   :  { %1182 = vmatprep.subr.bf16.mxu1 %v1181_v62 }
  0x4b   :  { %768 = vmatmul.mubr.bf16.gmra.mrb[12].mxu0 %v596_v29  ;;  %1184 = vmatpush1.bf16.msra.mxu1 %v1183_v14 }
  0xf6   :  { %v1085_v15 = vpop.f32.mrb[0].mxu0 }
  0xf7   :  { %v1086_v16 = vpop.f32.mrb[1].mxu0  ;;  %v1113_v61 = vpop.f32.mrb[0].mxu1 }
  0xf8   :  { %v1087_v17 = vadd.f32 %v1086_v16, %v1085_v15  ;;  %v1088_v18 = vpop.f32.mrb[2].mxu0  ;;  %v1114_v21 = vpop.f32.mrb[1].mxu1 }
  0xf9   :  { %v1089_v19 = vpop.f32.mrb[3].mxu0  ;;  %v1115_v22 = vadd.f32 %v1114_v21, %v1113_v61  ;;  %v1116_v23 = vpop.f32.mrb[2].mxu1 }
  0xfa   :  { %v1090_v20 = vadd.f32 %v1089_v19, %v1088_v18  ;;  %v1117_v24 = vpop.f32.mrb[3].mxu1 }
  0xfb   :  { %v580_v25 = vadd.f32 %v1115_v22, %v1087_v17  ;;  %v1118_v27 = vadd.f32 %v1117_v24, %v1116_v23 }
  0xfd   :  { %v583_v28 = vadd.f32 %v1118_v27, %v1090_v20 }
  0xfe   :  { %v1091_v29 = vpop.f32.mrb[4].mxu0 }
  0xff   :  { %v1092_v30 = vpop.f32.mrb[5].mxu0 }
 0x100   :  { %v1093_v31 = vadd.f32 %v1092_v30, %v1091_v29  ;;  %v1094_v32 = vpop.f32.mrb[6].mxu0  ;;  %v1119_v35 = vpop.f32.mrb[4].mxu1 }
 0x101   :  { %v1095_v33 = vpop.f32.mrb[7].mxu0  ;;  %v1120_v36 = vpop.f32.mrb[5].mxu1 }
 0x102   :  { %v1096_v34 = vadd.f32 %v1095_v33, %v1094_v32  ;;  %v1121_v37 = vadd.f32 %v1120_v36, %v1119_v35  ;;  %v1122_v38 = vpop.f32.mrb[6].mxu1 }
 0x103   :  { %v1123_v39 = vpop.f32.mrb[7].mxu1 }
 0x104   :  { %v588_v40 = vadd.f32 %v1121_v37, %v1093_v31  ;;  %v1124_v41 = vadd.f32 %v1123_v39, %v1122_v38 }
 0x106   :  { %v591_v42 = vadd.f32 %v1124_v41, %v1096_v34 }
 0x116   :  { %v1141_v43 = vpop.f32.mrb[8].mxu0 }
 0x117   :  { %v1142_v44 = vpop.f32.mrb[9].mxu0 }
 0x118   :  { %v1143_v46 = vadd.f32 %v1142_v44, %v1141_v43  ;;  %v1144_v47 = vpop.f32.mrb[10].mxu0 }
 0x119   :  { %v1145_v48 = vpop.f32.mrb[11].mxu0 }
 0x11a   :  { %v776_v49 = vadd.f32 %v1143_v46, %v580_v25  ;;  %v1146_v50 = vadd.f32 %v1145_v48, %v1144_v47 }
 0x11c   :  { %v787_v26 = vadd.f32 %v1064_v45, %v776_v49  ;;  %v777_v51 = vadd.f32 %v1146_v50, %v583_v28 }
 0x11e   :  { %v791_v52 = vmul.f32 1.442695, %v787_v26  ;;  %v788_v53 = vadd.f32 %v1064_v45, %v777_v51  ;;  %v1147_v54 = vpop.f32.mrb[12].mxu0 }
 0x11f   :  { %v1148_v55 = vpop.f32.mrb[13].mxu0 }
 0x120   :  { %1234 = vpow2.f32 %v791_v52  ;;  %v793_v56 = vmul.f32 1.442695, %v788_v53  ;;  %v1149_v57 = vadd.f32 %v1148_v55, %v1147_v54  ;;  %v1150_v58 = vpop.f32.mrb[14].mxu0 }
 0x121   :  { %v1151_v59 = vpop.f32.mrb[15].mxu0 }
 0x122   :  { %1236 = vpow2.f32 %v793_v56  ;;  %v778_v60 = vadd.f32 %v1149_v57, %v588_v40  ;;  %v1152_v63 = vadd.f32 %v1151_v59, %v1150_v58 }
 0x124   :  { %v789_v0 = vadd.f32 %v1064_v45, %v778_v60  ;;  %v779_v2 = vadd.f32 %v1152_v63, %v591_v42 }
 0x126   :  { %v795_v3 = vmul.f32 1.442695, %v789_v0  ;;  %v790_v4 = vadd.f32 %v1064_v45, %v779_v2 }
 0x128   :  { %1238 = vpow2.f32 %v795_v3  ;;  %v797_v5 = vmul.f32 1.442695, %v790_v4 }
 0x12a   :  { %v1235_v6 = vpop.eup %1234  ;;  %1240 = vpow2.f32 %v797_v5 }
 0x12b   :  { %v1065_v7 = vadd.f32 -1e-05, %v1235_v6 }
 0x12c   :  { %v1237_v8 = vpop.eup %1236 }
 0x12d   :  { %v803_v9 = vmax.f32 %v1065_v7, 0.0  ;;  %v1066_v10 = vadd.f32 -1e-05, %v1237_v8 }
 0x12f   :  { %904 = vmatmul.mubr.f32.vlgmr.msra.gmra.mrb[8].mxu1 %v803_v9  ;;  %v804_v11 = vmax.f32 %v1066_v10, 0.0 }
 0x130   :  { %909 = vmatprep.mubr.f32.mxu1 %v1242_v1 }
 0x132   :  { %v1239_v12 = vpop.eup %1238 }
 0x133   :  { %910 = vmatmul.mubr.f32.gmra.mrb[10].mxu1 %v804_v11  ;;  %v1067_v62 = vadd.f32 -1e-05, %v1239_v12 }
 0x134   :  { %v1241_v13 = vpop.eup %1240  ;;  %915 = vmatprep.mubr.f32.mxu1 %v1242_v1 }
 0x135   :  { %v805_v14 = vmax.f32 %v1067_v62, 0.0  ;;  %v1068_v15 = vadd.f32 -1e-05, %v1241_v13 }
 0x137   :  { %916 = vmatmul.mubr.f32.gmra.mrb[12].mxu1 %v805_v14  ;;  %v806_v16 = vmax.f32 %v1068_v15, 0.0 }
 0x138   :  { %921 = vmatprep.mubr.f32.mxu1 %v1242_v1 }
 0x13b   :  { %922 = vmatmul.mubr.f32.gmra.mrb[14].mxu1 %v806_v16 }
 0x202   :  { %v905_v17 = vpop.f32.mrb[8].mxu1 }
 0x203   :  { %v928_v18 = vmax.f32 %v905_v17, 0.0  ;;  %v907_v19 = vpop.f32.mrb[9].mxu1 }
 0x204   :  { %v929_v20 = vmax.f32 %v907_v19, 0.0 }
 0x205   :  { %936 = vst [vmem:[%s1671_s6] sm:$0xff] %v928_v18 }
 0x206   :  { %937 = vst [vmem:[%s1671_s6 + $0x8] sm:$0xff] %v929_v20  ;;  %v911_v61 = vpop.f32.mrb[10].mxu1 }
 0x207   :  { %v930_v21 = vmax.f32 %v911_v61, 0.0  ;;  %v913_v22 = vpop.f32.mrb[11].mxu1 }
 0x208   :  { %v931_v23 = vmax.f32 %v913_v22, 0.0 }
 0x209   :  { %938 = vst [vmem:[%s1671_s6 + $0x10] sm:$0xff] %v930_v21 }
 0x20a   :  { %939 = vst [vmem:[%s1671_s6 + $0x18] sm:$0xff] %v931_v23  ;;  %v917_v1 = vpop.f32.mrb[12].mxu1 }
 0x20b   :  { %v932_v24 = vmax.f32 %v917_v1, 0.0  ;;  %v919_v25 = vpop.f32.mrb[13].mxu1 }
 0x20c   :  { %v933_v27 = vmax.f32 %v919_v25, 0.0 }
 0x20d   :  { %940 = vst [vmem:[%s1671_s6 + $0x20] sm:$0xff] %v932_v24 }
 0x20e   :  { %941 = vst [vmem:[%s1671_s6 + $0x28] sm:$0xff] %v933_v27  ;;  %v923_v28 = vpop.f32.mrb[14].mxu1 }
 0x20f   :  { %v934_v29 = vmax.f32 %v923_v28, 0.0  ;;  %v925_v30 = vpop.f32.mrb[15].mxu1 }
 0x210   :  { %v935_v31 = vmax.f32 %v925_v30, 0.0 }
 0x211   :  { %942 = vst [vmem:[%s1671_s6 + $0x30] sm:$0xff] %v934_v29 }
 0x212   :  { %943 = vst [vmem:[%s1671_s6 + $0x38] sm:$0xff] %v935_v31 }

// kernel: audio_reconstructor.5
= control target key start
LH: loop header
LB: loop body
LE: loop exit
PB: predicated region body
PF: predicated region fallthrough
CT: control target
= control target key end

     0   :  { %11 = vsyncpa [#allocation3], 0  ;;  %s2496_s18 = smov [#allocation2]   ;;  %s2942_s0 = inlined_call_operand.vmem [shape: f32[32,512], index: 0, kind: input, shape index: {}]   ;;  %s2943_s1 = inlined_call_operand.vmem [shape: f32[1,512], index: 1, kind: input, shape index: {}]   ;;  %s2944_s2 = inlined_call_operand.vmem [shape: f32[1,512], index: 2, kind: input, shape index: {}]   ;;  %s2945_s3 = inlined_call_operand.hbm [shape: bf16[3,512,256], index: 3, kind: input, shape index: {}]   ;;  %s2946_s4 = inlined_call_operand.vmem [shape: f32[32,256], index: 4, kind: output, shape index: {0}]   ;;  %s2947_s5 = inlined_call_operand.vmem [shape: f32[1,2,256], index: 5, kind: output, shape index: {1}]  }
   0x1   :  { %s23_s19 = sshll.u32 %s2496_s18, 4  ;;  %s2472_s22 = scalar_lea.hbm %s2945_s3, 24576  ;;  %s24_s19 = int_to_ptr.vmem [resolvable:$true] %s23_s19 }
   0x2   :  { %p2473_p0 = scmp.ne.s32.totalorder %s2945_s3, %s2472_s22  ;;  %p2476_p1 = scmp.lt.u32.totalorder %s2472_s22, %s2945_s3 }
   0x4   :  { %p2478_p2 = pnand %p2476_p1, %p2473_p0 }
   0x6   :  { %2481 = shalt.err (!%p2478_p2)
}
   0x7   :  { %s2482_s27 = scalar_lea.vmem %s24_s19, 24576  ;;  %p2487_p4 = scmp.lt.s32.totalorder %s24_s19, %s24_s19 }
   0x8   :  { %p2483_p3 = scmp.ne.s32.totalorder %s24_s19, %s2482_s27  ;;  %p2488_p5 = scmp.lt.s32.totalorder %s2482_s27, %s2482_s27 }
   0xa   :  { %p2489_p6 = por %p2488_p5, %p2487_p4 }
   0xc   :  { %p2490_p7 = pnand %p2489_p6, %p2483_p3 }
   0xe   :  { %2493 = shalt.err (!%p2490_p7)
}
   0xf   :  { %s2497_s28 = smov 128   ;;  %s2498_s29 = smov 8  }
  0x10   :  { %29 = dma.hbm_to_vmem [thread:$0]  %s2945_s3, 24576, %s24_s19, [#allocation3], %s2497_s28, %s2497_s28, %s2498_s29  }
  0x11   :  { %2494 = dma.done.wait [#allocation3], 24576  }
  0x12   :  { %2495 = vsyncadd [#allocation3], 4294942720  ;;  %v2184_v0 = vld [vmem:[#allocation2 + $0x204] ss:$8 sps:$4 sm:$0xff]   ;;  %v2188_v2 = vld [vmem:[#allocation2 + $0x200] ss:$8 sps:$4 sm:$0xff]   ;;  %v51_v38 = vlaneseq }
  0x13   :  { %v2186_v1 = vld [vmem:[#allocation2 + $0x104] ss:$8 sps:$4 sm:$0xff]   ;;  %829 = vmatprep.subr.bf16.mxu1 %v2184_v0  ;;  %v2189_v3 = vld [vmem:[#allocation2 + $0x100] ss:$8 sps:$4 sm:$0xff]   ;;  %v2190_v4 = vld [vmem:[#allocation2 + $0x214] ss:$8 sps:$4 sm:$0xff]  }
  0x14   :  { %1308 = vmatprep.subr.bf16.mxu0 %v2186_v1  ;;  %830 = vmatpush1.bf16.msra.mxu1 %v2188_v2  ;;  %v2192_v5 = vld [vmem:[#allocation2 + $0x114] ss:$8 sps:$4 sm:$0xff]   ;;  %v2194_v6 = vld [vmem:[#allocation2 + $0x210] ss:$8 sps:$4 sm:$0xff]   ;;  %v2196_v8 = vld [vmem:[#allocation2 + $0x224] ss:$8 sps:$4 sm:$0xff]  }
  0x15   :  { %1309 = vmatpush1.bf16.msra.mxu0 %v2189_v3  ;;  %831 = vmatprep.subr.bf16.mxu1 %v2190_v4  ;;  %v2195_v7 = vld [vmem:[#allocation2 + $0x110] ss:$8 sps:$4 sm:$0xff]   ;;  %v2198_v9 = vld [vmem:[#allocation2 + $0x124] ss:$8 sps:$4 sm:$0xff]   ;;  %v2200_v10 = vld [vmem:[#allocation2 + $0x220] ss:$8 sps:$4 sm:$0xff]  }
  0x16   :  { %1310 = vmatprep.subr.bf16.mxu0 %v2192_v5  ;;  %v2201_v11 = vld [vmem:[#allocation2 + $0x120] ss:$8 sps:$4 sm:$0xff]   ;;  %v2202_v12 = vld [vmem:[#allocation2 + $0x234] ss:$8 sps:$4 sm:$0xff]   ;;  %v2206_v14 = vld [vmem:[#allocation2 + $0x230] ss:$8 sps:$4 sm:$0xff]  }
  0x17   :  { %v2204_v13 = vld [vmem:[#allocation2 + $0x134] ss:$8 sps:$4 sm:$0xff]   ;;  %v2207_v15 = vld [vmem:[#allocation2 + $0x130] ss:$8 sps:$4 sm:$0xff]   ;;  %v2208_v16 = vld [vmem:[#allocation2 + $0x244] ss:$8 sps:$4 sm:$0xff]  }
  0x18   :  { %832 = vmatpush1.bf16.msra.mxu1 %v2194_v6  ;;  %v2210_v17 = vld [vmem:[#allocation2 + $0x144] ss:$8 sps:$4 sm:$0xff]   ;;  %v2212_v18 = vld [vmem:[#allocation2 + $0x240] ss:$8 sps:$4 sm:$0xff]   ;;  %v2214_v20 = vld [vmem:[#allocation2 + $0x254] ss:$8 sps:$4 sm:$0xff]  }
  0x19   :  { %1311 = vmatpush1.bf16.msra.mxu0 %v2195_v7  ;;  %833 = vmatprep.subr.bf16.mxu1 %v2196_v8  ;;  %v2213_v19 = vld [vmem:[#allocation2 + $0x140] ss:$8 sps:$4 sm:$0xff]   ;;  %v2216_v21 = vld [vmem:[#allocation2 + $0x154] ss:$8 sps:$4 sm:$0xff]   ;;  %v2218_v22 = vld [vmem:[#allocation2 + $0x250] ss:$8 sps:$4 sm:$0xff]  }
  0x1a   :  { %1312 = vmatprep.subr.bf16.mxu0 %v2198_v9  ;;  %v2219_v23 = vld [vmem:[#allocation2 + $0x150] ss:$8 sps:$4 sm:$0xff]   ;;  %v2220_v24 = vld [vmem:[#allocation2 + $0x264] ss:$8 sps:$4 sm:$0xff]   ;;  %v2224_v26 = vld [vmem:[#allocation2 + $0x260] ss:$8 sps:$4 sm:$0xff]  }
  0x1b   :  { %v2222_v25 = vld [vmem:[#allocation2 + $0x164] ss:$8 sps:$4 sm:$0xff]   ;;  %v2225_v27 = vld [vmem:[#allocation2 + $0x160] ss:$8 sps:$4 sm:$0xff]   ;;  %v2226_v28 = vld [vmem:[#allocation2 + $0x274] ss:$8 sps:$4 sm:$0xff]  }
  0x1c   :  { %834 = vmatpush1.bf16.msra.mxu1 %v2200_v10  ;;  %v2228_v29 = vld [vmem:[#allocation2 + $0x174] ss:$8 sps:$4 sm:$0xff]   ;;  %v2230_v30 = vld [vmem:[#allocation2 + $0x270] ss:$8 sps:$4 sm:$0xff]   ;;  %v2232_v32 = vld [vmem:[#allocation2 + $0x284] ss:$8 sps:$4 sm:$0xff]  }
  0x1d   :  { %1313 = vmatpush1.bf16.msra.mxu0 %v2201_v11  ;;  %835 = vmatprep.subr.bf16.mxu1 %v2202_v12  ;;  %v2231_v31 = vld [vmem:[#allocation2 + $0x170] ss:$8 sps:$4 sm:$0xff]   ;;  %v2234_v33 = vld [vmem:[#allocation2 + $0x184] ss:$8 sps:$4 sm:$0xff]   ;;  %v2236_v34 = vld [vmem:[#allocation2 + $0x280] ss:$8 sps:$4 sm:$0xff]  }
  0x1e   :  { %1314 = vmatprep.subr.bf16.mxu0 %v2204_v13  ;;  %v2237_v35 = vld [vmem:[#allocation2 + $0x180] ss:$8 sps:$4 sm:$0xff]   ;;  %v2238_v36 = vld [vmem:[#allocation2 + $0x294] ss:$8 sps:$4 sm:$0xff]   ;;  %v2242_v39 = vld [vmem:[#allocation2 + $0x290] ss:$8 sps:$4 sm:$0xff]  }
  0x1f   :  { %v2240_v37 = vld [vmem:[#allocation2 + $0x194] ss:$8 sps:$4 sm:$0xff]   ;;  %v2243_v40 = vld [vmem:[#allocation2 + $0x190] ss:$8 sps:$4 sm:$0xff]   ;;  %v2244_v41 = vld [vmem:[#allocation2 + $0x2a4] ss:$8 sps:$4 sm:$0xff]  }
  0x20   :  { %836 = vmatpush1.bf16.msra.mxu1 %v2206_v14  ;;  %v2246_v42 = vld [vmem:[#allocation2 + $0x1a4] ss:$8 sps:$4 sm:$0xff]   ;;  %v2542_v43 = vshrl.u32 %v51_v38, 7  ;;  %v2248_v44 = vld [vmem:[#allocation2 + $0x2a0] ss:$8 sps:$4 sm:$0xff]   ;;  %v36_v62 = vld [vmem:[%s2942_s0 + $0x18] sm:$0xff] }
  0x21   :  { %1315 = vmatpush1.bf16.msra.mxu0 %v2207_v15  ;;  %837 = vmatprep.subr.bf16.mxu1 %v2208_v16  ;;  %v2249_v45 = vld [vmem:[#allocation2 + $0x1a0] ss:$8 sps:$4 sm:$0xff]   ;;  %v2250_v46 = vld [vmem:[#allocation2 + $0x2b4] ss:$8 sps:$4 sm:$0xff]   ;;  %v2254_v51 = vld [vmem:[#allocation2 + $0x2b0] ss:$8 sps:$4 sm:$0xff]  }
  0x22   :  { %1316 = vmatprep.subr.bf16.mxu0 %v2210_v17  ;;  %v57_v47 = vsub.s32 1, %v2542_v43  ;;  %v2252_v48 = vld [vmem:[#allocation2 + $0x1b4] ss:$8 sps:$4 sm:$0xff]   ;;  %v61_v49 = vsub.s32 2, %v2542_v43  ;;  %v65_v50 = vsub.s32 3, %v2542_v43  ;;  %v34_v53 = vld [vmem:[%s2942_s0 + $0x8] sm:$0xff] }
  0x23   :  { %v2255_v52 = vld [vmem:[#allocation2 + $0x1b0] ss:$8 sps:$4 sm:$0xff]   ;;  %v53_v54 = vsub.s32 0, %v2542_v43  ;;  %v38_v55 = vld [vmem:[%s2942_s0 + $0x28] sm:$0xff]  ;;  %v49_v56 = vld [vmem:[%s2943_s1] sm:$0xf] }
  0x24   :  { %838 = vmatpush1.bf16.msra.mxu1 %v2212_v18  ;;  %v87_v57 = vld [vmem:[%s2944_s2] sm:$0xf]  ;;  %v2256_v58 = vld [vmem:[#allocation2 + $0x2c4] ss:$8 sps:$4 sm:$0xff]   ;;  %v2560_v59 = vrot.slane %v49_v56, %v57_v47  ;;  %v40_v63 = vld [vmem:[%s2942_s0 + $0x38] sm:$0xff]  ;;  %v2570_v0 = vrot.slane %v49_v56, %v65_v50  ;;  %v264_v2 = vand.u32 15, %v2542_v43  ;;  %v2575_v4 = vrot.slane %v49_v56, %v61_v49 }
  0x25   :  { %1317 = vmatpush1.bf16.msra.mxu0 %v2213_v19  ;;  %839 = vmatprep.subr.bf16.mxu1 %v2214_v20  ;;  %v2562_v60 = vrot.slane %v87_v57, %v57_v47  ;;  %v2258_v61 = vld [vmem:[#allocation2 + $0x1c4] ss:$8 sps:$4 sm:$0xff]   ;;  %v2572_v1 = vrot.slane %v87_v57, %v65_v50  ;;  %v2260_v3 = vld [vmem:[#allocation2 + $0x2c0] ss:$8 sps:$4 sm:$0xff]   ;;  %v2579_v7 = vrot.slane %v49_v56, %v53_v54  ;;  %vm157_vm0 = vcmask 1040384   ;;  %v35_v16 = vld [vmem:[%s2942_s0 + $0x10] sm:$0xff] }
  0x26   :  { %1318 = vmatprep.subr.bf16.mxu0 %v2216_v21  ;;  %v72_v5 = vmul.f32 %v2560_v59, %v34_v53  ;;  %v76_v6 = vmul.f32 %v2560_v59, %v38_v55  ;;  %v2261_v8 = vld [vmem:[#allocation2 + $0x1c0] ss:$8 sps:$4 sm:$0xff]   ;;  %v74_v9 = vmul.f32 %v2570_v0, %v36_v62  ;;  %v78_v10 = vmul.f32 %v2570_v0, %v40_v63  ;;  %v39_v17 = vld [vmem:[%s2942_s0 + $0x30] sm:$0xff]  ;;  %v2270_v38 = vld [vmem:[#allocation2 + $0x1e4] ss:$8 sps:$4 sm:$0xff]  }
  0x27   :  { %v33_v11 = vld [vmem:[%s2942_s0] sm:$0xff]  ;;  %v2589_v13 = vrot.slane %v87_v57, %v61_v49  ;;  %v2262_v18 = vld [vmem:[#allocation2 + $0x2d4] ss:$8 sps:$4 sm:$0xff]   ;;  %vm2601_vm1 = vcmp.ne.s32.totalorder %v264_v2, 0  ;;  %v2278_v56 = vld [vmem:[#allocation2 + $0x2f0] ss:$8 sps:$4 sm:$0xff]  }
  0x28   :  { %840 = vmatpush1.bf16.msra.mxu1 %v2218_v22  ;;  %v37_v12 = vld [vmem:[%s2942_s0 + $0x20] sm:$0xff]  ;;  %v110_v14 = vadd.f32 %v2562_v60, %v72_v5  ;;  %v114_v15 = vadd.f32 %v2562_v60, %v76_v6  ;;  %v2264_v19 = vld [vmem:[#allocation2 + $0x1d4] ss:$8 sps:$4 sm:$0xff]   ;;  %v112_v20 = vadd.f32 %v2572_v1, %v74_v9  ;;  %v116_v21 = vadd.f32 %v2572_v1, %v78_v10 }
  0x29   :  { %1319 = vmatpush1.bf16.msra.mxu0 %v2219_v23  ;;  %841 = vmatprep.subr.bf16.mxu1 %v2220_v24  ;;  %v2605_v23 = vrot.slane %v87_v57, %v53_v54  ;;  %v2272_v49 = vld [vmem:[#allocation2 + $0x2e0] ss:$8 sps:$4 sm:$0xff]   ;;  %v2276_v53 = vld [vmem:[#allocation2 + $0x1f4] ss:$8 sps:$4 sm:$0xff]   ;;  %v2279_v57 = vld [vmem:[#allocation2 + $0x1f0] ss:$8 sps:$4 sm:$0xff]  }
  0x2a   :  { %1320 = vmatprep.subr.bf16.mxu0 %v2222_v25  ;;  %v2607_v24 = vmax.f32 %v110_v14, 0.0  ;;  %v2609_v25 = vmax.f32 %v114_v15, 0.0  ;;  %v2273_v50 = vld [vmem:[#allocation2 + $0x1e0] ss:$8 sps:$4 sm:$0xff]   ;;  %v2285_v10 = vld [vmem:[#allocation2 + $0x404] ss:$8 sps:$4 sm:$0xff]  }
  0x2b   :  { %vm206_vm3 = vcmask 1046528   ;;  %v2283_v22 = vld [vmem:[#allocation2 + $0x400] ss:$8 sps:$4 sm:$0xff]  }
  0x2c   :  { %842 = vmatpush1.bf16.msra.mxu1 %v2224_v26  ;;  %v75_v26 = vmul.f32 %v2579_v7, %v37_v12  ;;  %v164_v6 = vrot.slane %v2609_v25, 7 }
  0x2d   :  { %1321 = vmatpush1.bf16.msra.mxu0 %v2225_v27  ;;  %843 = vmatprep.subr.bf16.mxu1 %v2226_v28  ;;  %v73_v27 = vmul.f32 %v2575_v4, %v35_v16  ;;  %v2613_v28 = vmax.f32 %v112_v20, 0.0 }
  0x2e   :  { %1322 = vmatprep.subr.bf16.mxu0 %v2228_v29  ;;  %v2615_v29 = vmax.f32 %v116_v21, 0.0  ;;  %v2280_v21 = vld [vmem:[#allocation2 + $0x300] ss:$8 sps:$4 sm:$0xff]  }
  0x30   :  { %844 = vmatpush1.bf16.msra.mxu1 %v2230_v30  ;;  %v71_v30 = vmul.f32 %v2579_v7, %v33_v11  ;;  %v217_v20 = vrot.slane %v2615_v29, 1 }
  0x31   :  { %1323 = vmatpush1.bf16.msra.mxu0 %v2231_v31  ;;  %845 = vmatprep.subr.bf16.mxu1 %v2232_v32  ;;  %v77_v31 = vmul.f32 %v2575_v4, %v39_v17  ;;  %v2266_v32 = vld [vmem:[#allocation2 + $0x2d0] ss:$8 sps:$4 sm:$0xff]   ;;  %v159_v17 = vrot.slane %v2607_v24, 7 }
  0x32   :  { %1324 = vmatprep.subr.bf16.mxu0 %v2234_v33  ;;  %v2267_v33 = vld [vmem:[#allocation2 + $0x1d0] ss:$8 sps:$4 sm:$0xff]  }
  0x34   :  { %846 = vmatpush1.bf16.msra.mxu1 %v2236_v34  ;;  %v437_v34 = vpack.c.bf16 %v2609_v25, %v2607_v24 }
  0x35   :  { %1325 = vmatpush1.bf16.msra.mxu0 %v2237_v35  ;;  %847 = vmatprep.subr.bf16.mxu1 %v2238_v36  ;;  %v2499_v35 = vmov 0.0  }
  0x36   :  { %1326 = vmatprep.subr.bf16.mxu0 %v2240_v37  ;;  %v2624_v36 = vsel %vm2601_vm1, 1.0, %v2499_v35  ;;  %v2268_v37 = vld [vmem:[#allocation2 + $0x2e4] ss:$8 sps:$4 sm:$0xff]   ;;  %861 = vmatprep.mubr.bf16.mxu1 %v437_v34 }
  0x38   :  { %848 = vmatpush1.bf16.msra.mxu1 %v2242_v39  ;;  %v161_v39 = vrot.slane %v2613_v28, 7 }
  0x39   :  { %1327 = vmatpush1.bf16.msra.mxu0 %v2243_v40  ;;  %849 = vmatprep.subr.bf16.mxu1 %v2244_v41  ;;  %v168_v40 = vrot.slane %v2615_v29, 7  ;;  %v113_v41 = vadd.f32 %v2605_v23, %v75_v26 }
  0x3a   :  { %1328 = vmatprep.subr.bf16.mxu0 %v2246_v42  ;;  %v111_v42 = vadd.f32 %v2589_v13, %v73_v27  ;;  %v205_v47 = vsel %vm157_vm0, 0.0, %v161_v39  ;;  %v2669_v27 = vsel %vm157_vm0, %v159_v17, %v164_v6 }
  0x3c   :  { %850 = vmatpush1.bf16.msra.mxu1 %v2248_v44  ;;  %v115_v44 = vadd.f32 %v2589_v13, %v77_v31  ;;  %v2638_v54 = vmax.f32 %v111_v42, 0.0 }
  0x3d   :  { %1329 = vmatpush1.bf16.msra.mxu0 %v2249_v45  ;;  %851 = vmatprep.subr.bf16.mxu1 %v2250_v46  ;;  %v259_v45 = vadd.s32 24, %v2542_v43  ;;  %v169_v46 = vsel %vm157_vm0, %v161_v39, %v168_v40 }
  0x3e   :  { %1330 = vmatprep.subr.bf16.mxu0 %v2252_v48  ;;  %v109_v48 = vadd.f32 %v2605_v23, %v71_v30  ;;  %v2640_v55 = vmax.f32 %v115_v44, 0.0  ;;  %v160_v2 = vrot.slane %v2638_v54, 7  ;;  %v203_v30 = vsel %vm157_vm0, 0.0, %v159_v17 }
  0x3f   :  { %v285_v62 = vand.u32 15, %v259_v45  ;;  %v2678_v34 = vmul.f32 %v2624_v36, %v203_v30  ;;  %v2286_v45 = vld [vmem:[#allocation2 + $0x310] ss:$8 sps:$4 sm:$0xff]  }
  0x40   :  { %852 = vmatpush1.bf16.msra.mxu1 %v2254_v51  ;;  %v2274_v51 = vld [vmem:[#allocation2 + $0x2f4] ss:$8 sps:$4 sm:$0xff]   ;;  %v2644_v63 = vmax.f32 %v109_v48, 0.0  ;;  %v438_v5 = vpack.c.bf16 %v2640_v55, %v2638_v54  ;;  %v204_v14 = vsel %vm157_vm0, 0.0, %v160_v2  ;;  %v214_v42 = vrot.slane %v2640_v55, 1 }
  0x41   :  { %1331 = vmatpush1.bf16.msra.mxu0 %v2255_v52  ;;  %853 = vmatprep.subr.bf16.mxu1 %v2256_v58  ;;  %v335_v52 = vmul.f32 %v2624_v36, %v205_v47  ;;  %vm323_vm2 = vcmp.ne.s32.totalorder %v285_v62, 15  ;;  %v334_v15 = vmul.f32 %v2624_v36, %v204_v14  ;;  %v365_v44 = vpack.c.bf16 %v2669_v27, %v2678_v34  ;;  %v2294_v48 = vld [vmem:[#allocation2 + $0x324] ss:$8 sps:$4 sm:$0xff]   ;;  %v2312_v14 = vld [vmem:[#allocation2 + $0x354] ss:$8 sps:$4 sm:$0xff]  }
  0x42   :  { %1332 = vmatprep.subr.bf16.mxu0 %v2258_v61  ;;  %v2642_v61 = vmax.f32 %v113_v41, 0.0  ;;  %v158_v11 = vrot.slane %v2644_v63, 7  ;;  %v2659_v16 = vsel %vm323_vm2, 1.0, %v2499_v35  ;;  %v213_v41 = vrot.slane %v2638_v54, 1  ;;  %v2306_v62 = vld [vmem:[#allocation2 + $0x344] ss:$8 sps:$4 sm:$0xff]  }
  0x43   :  { %v367_v58 = vpack.c.bf16 %v169_v46, %v335_v52  ;;  %v2289_v46 = vld [vmem:[#allocation2 + $0x410] ss:$8 sps:$4 sm:$0xff]   ;;  %v2300_v52 = vld [vmem:[#allocation2 + $0x334] ss:$8 sps:$4 sm:$0xff]   ;;  %v2414_v27 = vld [vmem:[#allocation2 + $0x64] ss:$8 sps:$4 sm:$0xff]  }
  0x44   :  { %854 = vmatpush1.bf16.msra.mxu1 %v2260_v3  ;;  %v166_v3 = vrot.slane %v2640_v55, 7  ;;  %v162_v9 = vrot.slane %v2642_v61, 7  ;;  %v2388_v55 = vld [vmem:[#allocation2 + $0x20] ss:$8 sps:$4 sm:$0xff]   ;;  %v2417_v34 = vld [vmem:[#allocation2 + $0x564] ss:$8 sps:$4 sm:$0xff]  }
  0x45   :  { %1333 = vmatpush1.bf16.msra.mxu0 %v2261_v8  ;;  %855 = vmatprep.subr.bf16.mxu1 %v2262_v18  ;;  %v2282_v8 = vld [vmem:[#allocation2 + $0x304] ss:$8 sps:$4 sm:$0xff]   ;;  %v436_v18 = vpack.c.bf16 %v2642_v61, %v2644_v63 }
  0x46   :  { %1334 = vmatprep.subr.bf16.mxu0 %v2264_v19  ;;  %v167_v12 = vsel %vm157_vm0, %v160_v2, %v166_v3  ;;  %1340 = vmatprep.mubr.bf16.mxu0 %v367_v58  ;;  %v216_v19 = vrot.slane %v2613_v28, 1  ;;  %v2675_v31 = vsel %vm157_vm0, %v158_v11, %v162_v9  ;;  %v258_v58 = vadd.s32 16, %v2542_v43  ;;  %v2309_v2 = vld [vmem:[#allocation2 + $0x444] ss:$8 sps:$4 sm:$0xff]  }
  0x47   :  { %v366_v26 = vpack.c.bf16 %v167_v12, %v334_v15  ;;  %v2315_v15 = vld [vmem:[#allocation2 + $0x454] ss:$8 sps:$4 sm:$0xff]  }
  0x48   :  { %856 = vmatpush1.bf16.msra.mxu1 %v2266_v32  ;;  %v2288_v32 = vld [vmem:[#allocation2 + $0x314] ss:$8 sps:$4 sm:$0xff]   ;;  %v278_v12 = vand.u32 15, %v258_v58  ;;  %v211_v58 = vrot.slane %v2609_v25, 1 }
  0x49   :  { %1335 = vmatpush1.bf16.msra.mxu0 %v2267_v33  ;;  %857 = vmatprep.subr.bf16.mxu1 %v2268_v37  ;;  %v2291_v33 = vld [vmem:[#allocation2 + $0x414] ss:$8 sps:$4 sm:$0xff]   ;;  %v2683_v37 = vsel %vm206_vm3, %v216_v19, %v217_v20  ;;  %v2313_v19 = vld [vmem:[#allocation2 + $0x450] ss:$8 sps:$4 sm:$0xff]  }
  0x4a   :  { %1336 = vmatprep.subr.bf16.mxu0 %v2270_v38  ;;  %v202_v38 = vsel %vm157_vm0, 0.0, %v158_v11  ;;  %v2307_v11 = vld [vmem:[#allocation2 + $0x440] ss:$8 sps:$4 sm:$0xff]   ;;  %vm310_vm4 = vcmp.ne.s32.totalorder %v278_v12, 0 }
  0x4b   :  { %v2687_v39 = vmul.f32 %v2624_v36, %v202_v38  ;;  %v2698_v36 = vsel %vm206_vm3, %v213_v41, %v214_v42  ;;  %v2319_v38 = vld [vmem:[#allocation2 + $0x460] ss:$8 sps:$4 sm:$0xff]  }
  0x4c   :  { %858 = vmatpush1.bf16.msra.mxu1 %v2272_v49  ;;  %v2297_v49 = vld [vmem:[#allocation2 + $0x424] ss:$8 sps:$4 sm:$0xff]  }
  0x4d   :  { %1337 = vmatpush1.bf16.msra.mxu0 %v2273_v50  ;;  %859 = vmatprep.subr.bf16.mxu1 %v2274_v51  ;;  %v364_v47 = vpack.c.bf16 %v2675_v31, %v2687_v39  ;;  %v2292_v50 = vld [vmem:[#allocation2 + $0x320] ss:$8 sps:$4 sm:$0xff]  }
  0x4e   :  { %1338 = vmatprep.subr.bf16.mxu0 %v2276_v53  ;;  %v2295_v51 = vld [vmem:[#allocation2 + $0x420] ss:$8 sps:$4 sm:$0xff]   ;;  %v2303_v53 = vld [vmem:[#allocation2 + $0x434] ss:$8 sps:$4 sm:$0xff]  }
  0x50   :  { %860 = vmatpush1.bf16.msra.mxu1 %v2278_v56  ;;  %v2298_v56 = vld [vmem:[#allocation2 + $0x330] ss:$8 sps:$4 sm:$0xff]  }
  0x51   :  { %1339 = vmatpush1.bf16.msra.mxu0 %v2279_v57  ;;  %882 = vmatprep.subr.bf16.mxu1 %v2282_v8  ;;  %v2301_v57 = vld [vmem:[#allocation2 + $0x430] ss:$8 sps:$4 sm:$0xff]   ;;  %v257_v8 = vadd.s32 8, %v2542_v43  ;;  %v42_v43 = vld [vmem:[%s2942_s0 + $0x48] sm:$0xff] }
  0x52   :  { %1754 = vmatprep.subr.bf16.mxu0 %v2285_v10  ;;  %v2304_v10 = vld [vmem:[#allocation2 + $0x340] ss:$8 sps:$4 sm:$0xff]   ;;  %v80_v30 = vmul.f32 %v2560_v59, %v42_v43  ;;  %v2330_v43 = vld [vmem:[#allocation2 + $0x384] ss:$8 sps:$4 sm:$0xff]  }
  0x53   :  { %862 = vmatmul.mubr.bf16.vlgmr.msra.gmra.mrb[0].mxu1 %v436_v18  ;;  %v271_v17 = vand.u32 15, %v257_v8  ;;  %v2310_v18 = vld [vmem:[#allocation2 + $0x350] ss:$8 sps:$4 sm:$0xff]  }
  0x54   :  { %1341 = vmatmul.mubr.bf16.vlgmr.msra.gmra.mrb[0].mxu0 %v366_v26  ;;  %883 = vmatpush1.bf16.msra.mxu1 %v2280_v21  ;;  %v2318_v21 = vld [vmem:[#allocation2 + $0x364] ss:$8 sps:$4 sm:$0xff]   ;;  %v43_v8 = vld [vmem:[%s2942_s0 + $0x50] sm:$0xff] }
  0x55   :  { %1755 = vmatpush1.bf16.msra.mxu0 %v2283_v22  ;;  %884 = vmatprep.subr.bf16.mxu1 %v2288_v32  ;;  %v2321_v22 = vld [vmem:[#allocation2 + $0x464] ss:$8 sps:$4 sm:$0xff]   ;;  %vm2709_vm5 = vcmp.ne.s32.totalorder %v271_v17, 15 }
  0x56   :  { %1756 = vmatprep.subr.bf16.mxu0 %v2291_v33  ;;  %v46_v26 = vld [vmem:[%s2942_s0 + $0x68] sm:$0xff] }
  0x57   :  { %v2316_v33 = vld [vmem:[#allocation2 + $0x360] ss:$8 sps:$4 sm:$0xff]   ;;  %v84_v41 = vmul.f32 %v2560_v59, %v46_v26  ;;  %v2333_v32 = vld [vmem:[#allocation2 + $0x484] ss:$8 sps:$4 sm:$0xff]  }
  0x58   :  { %885 = vmatpush1.bf16.msra.mxu1 %v2286_v45  ;;  %v44_v45 = vld [vmem:[%s2942_s0 + $0x58] sm:$0xff] }
  0x59   :  { %1757 = vmatpush1.bf16.msra.mxu0 %v2289_v46  ;;  %886 = vmatprep.subr.bf16.mxu1 %v2294_v48  ;;  %v118_v46 = vadd.f32 %v2562_v60, %v80_v30  ;;  %v48_v48 = vld [vmem:[%s2942_s0 + $0x78] sm:$0xff]  ;;  %v122_v59 = vadd.f32 %v2562_v60, %v84_v41  ;;  %v45_v60 = vld [vmem:[%s2942_s0 + $0x60] sm:$0xff] }
  0x5a   :  { %1758 = vmatprep.subr.bf16.mxu0 %v2297_v49  ;;  %v82_v49 = vmul.f32 %v2570_v0, %v44_v45  ;;  %v83_v12 = vmul.f32 %v2579_v7, %v45_v60 }
  0x5c   :  { %887 = vmatpush1.bf16.msra.mxu1 %v2292_v50  ;;  %v2723_v50 = vsel %vm310_vm4, 1.0, %v2499_v35 }
  0x5d   :  { %1759 = vmatpush1.bf16.msra.mxu0 %v2295_v51  ;;  %888 = vmatprep.subr.bf16.mxu1 %v2300_v52  ;;  %v2324_v51 = vld [vmem:[#allocation2 + $0x374] ss:$8 sps:$4 sm:$0xff]  }
  0x5e   :  { %1760 = vmatprep.subr.bf16.mxu0 %v2303_v53  ;;  %v2327_v52 = vld [vmem:[#allocation2 + $0x474] ss:$8 sps:$4 sm:$0xff]   ;;  %v86_v53 = vmul.f32 %v2570_v0, %v48_v48 }
  0x60   :  { %889 = vmatpush1.bf16.msra.mxu1 %v2298_v56  ;;  %v41_v56 = vld [vmem:[%s2942_s0 + $0x40] sm:$0xff] }
  0x61   :  { %1761 = vmatpush1.bf16.msra.mxu0 %v2301_v57  ;;  %890 = vmatprep.subr.bf16.mxu1 %v2306_v62  ;;  %v2733_v57 = vsel %vm2709_vm5, 1.0, %v2499_v35  ;;  %v2736_v62 = vmax.f32 %v118_v46, 0.0  ;;  %v79_v0 = vmul.f32 %v2579_v7, %v41_v56  ;;  %v47_v35 = vld [vmem:[%s2942_s0 + $0x70] sm:$0xff]  ;;  %v121_v7 = vadd.f32 %v2605_v23, %v83_v12 }
  0x62   :  { %1762 = vmatprep.subr.bf16.mxu0 %v2309_v2  ;;  %v120_v2 = vadd.f32 %v2572_v1, %v82_v49  ;;  %v2331_v49 = vld [vmem:[#allocation2 + $0x480] ss:$8 sps:$4 sm:$0xff]   ;;  %v2334_v12 = vld [vmem:[#allocation2 + $0x390] ss:$8 sps:$4 sm:$0xff]  }
  0x63   :  { %v2771_v46 = vmax.f32 %v121_v7, 0.0 }
  0x64   :  { %891 = vmatpush1.bf16.msra.mxu1 %v2304_v10  ;;  %v2749_v10 = vmax.f32 %v122_v59, 0.0  ;;  %v2754_v17 = vmax.f32 %v120_v2, 0.0  ;;  %v2336_v59 = vld [vmem:[#allocation2 + $0x394] ss:$8 sps:$4 sm:$0xff]  }
  0x65   :  { %1763 = vmatpush1.bf16.msra.mxu0 %v2307_v11  ;;  %892 = vmatprep.subr.bf16.mxu1 %v2312_v14  ;;  %v124_v11 = vadd.f32 %v2572_v1, %v86_v53  ;;  %v81_v14 = vmul.f32 %v2575_v4, %v43_v8  ;;  %v178_v25 = vrot.slane %v2771_v46, 7 }
  0x66   :  { %1764 = vmatprep.subr.bf16.mxu0 %v2315_v15  ;;  %v2322_v15 = vld [vmem:[#allocation2 + $0x370] ss:$8 sps:$4 sm:$0xff]   ;;  %v441_v1 = vpack.c.bf16 %v2749_v10, %v2736_v62 }
  0x67   :  { %v2761_v26 = vmax.f32 %v124_v11, 0.0  ;;  %v119_v30 = vadd.f32 %v2589_v13, %v81_v14  ;;  %v2337_v14 = vld [vmem:[#allocation2 + $0x490] ss:$8 sps:$4 sm:$0xff]  }
  0x68   :  { %893 = vmatpush1.bf16.msra.mxu1 %v2310_v18  ;;  %v117_v18 = vadd.f32 %v2605_v23, %v79_v0  ;;  %871 = vmatprep.mubr.bf16.mxu1 %v441_v1  ;;  %v2328_v23 = vld [vmem:[#allocation2 + $0x380] ss:$8 sps:$4 sm:$0xff]  }
  0x69   :  { %1765 = vmatpush1.bf16.msra.mxu0 %v2313_v19  ;;  %894 = vmatprep.subr.bf16.mxu1 %v2318_v21  ;;  %v85_v19 = vmul.f32 %v2575_v4, %v47_v35  ;;  %v221_v21 = vrot.slane %v2736_v62, 1  ;;  %v176_v4 = vrot.slane %v2754_v17, 7  ;;  %v184_v45 = vrot.slane %v2761_v26, 7 }
  0x6a   :  { %1766 = vmatprep.subr.bf16.mxu0 %v2321_v22  ;;  %v2325_v22 = vld [vmem:[#allocation2 + $0x470] ss:$8 sps:$4 sm:$0xff]   ;;  %v2766_v41 = vmax.f32 %v117_v18, 0.0  ;;  %v2773_v48 = vmax.f32 %v119_v30, 0.0 }
  0x6b   :  { %v185_v53 = vsel %vm157_vm0, %v176_v4, %v184_v45 }
  0x6c   :  { %895 = vmatpush1.bf16.msra.mxu1 %v2316_v33  ;;  %v123_v33 = vadd.f32 %v2589_v13, %v85_v19  ;;  %v439_v13 = vpack.c.bf16 %v2615_v29, %v2613_v28  ;;  %v174_v2 = vrot.slane %v2773_v48, 7  ;;  %v2339_v28 = vld [vmem:[#allocation2 + $0x494] ss:$8 sps:$4 sm:$0xff]   ;;  %v223_v35 = vrot.slane %v2773_v48, 1 }
  0x6d   :  { %1767 = vmatpush1.bf16.msra.mxu0 %v2319_v38  ;;  %896 = vmatprep.subr.bf16.mxu1 %v2324_v51  ;;  %v210_v38 = vrot.slane %v2607_v24, 1  ;;  %v177_v51 = vsel %vm157_vm0, %v168_v40, %v176_v4  ;;  %v222_v24 = vsel %vm206_vm3, %v211_v58, %v221_v21  ;;  %v440_v40 = vpack.c.bf16 %v2771_v46, %v2766_v41  ;;  %v2340_v4 = vld [vmem:[#allocation2 + $0x3a0] ss:$8 sps:$4 sm:$0xff]   ;;  %v2348_v29 = vld [vmem:[#allocation2 + $0x3b4] ss:$8 sps:$4 sm:$0xff]  }
  0x6e   :  { %1768 = vmatprep.subr.bf16.mxu0 %v2327_v52  ;;  %v2778_v52 = vmax.f32 %v123_v33, 0.0  ;;  %v343_v56 = vmul.f32 %v2723_v50, %v177_v51  ;;  %v175_v8 = vsel %vm157_vm0, %v166_v3, %v174_v2  ;;  %v353_v11 = vmul.f32 %v2733_v57, %v222_v24  ;;  %v2343_v33 = vld [vmem:[#allocation2 + $0x4a0] ss:$8 sps:$4 sm:$0xff]   ;;  %v2351_v51 = vld [vmem:[#allocation2 + $0x4b4] ss:$8 sps:$4 sm:$0xff]  }
  0x6f   :  { %872 = vmatmul.mubr.bf16.gmra.mrb[4].mxu1 %v440_v40  ;;  %v342_v18 = vmul.f32 %v2723_v50, %v175_v8  ;;  %v212_v19 = vsel %vm206_vm3, %v210_v38, %v211_v58  ;;  %v225_v3 = vrot.slane %v2754_v17, 1  ;;  %v172_v58 = vrot.slane %v2736_v62, 7  ;;  %v2382_v62 = vld [vmem:[#allocation2 + $0x10] ss:$8 sps:$4 sm:$0xff]  }
  0x70   :  { %897 = vmatpush1.bf16.msra.mxu1 %v2322_v15  ;;  %v182_v60 = vrot.slane %v2778_v52, 7  ;;  %v371_v0 = vpack.c.bf16 %v185_v53, %v343_v56  ;;  %914 = vmatprep.mubr.bf16.mxu1 %v439_v13  ;;  %v1362_v7 = vpack.c.bf16 %v353_v11, %v212_v19  ;;  %v231_v11 = vrot.slane %v2778_v52, 1 }
  0x71   :  { %1769 = vmatpush1.bf16.msra.mxu0 %v2325_v22  ;;  %898 = vmatprep.subr.bf16.mxu1 %v2330_v43  ;;  %v2342_v22 = vld [vmem:[#allocation2 + $0x3a4] ss:$8 sps:$4 sm:$0xff]   ;;  %v226_v30 = vsel %vm206_vm3, %v217_v20, %v225_v3  ;;  %v173_v20 = vsel %vm157_vm0, %v164_v6, %v172_v58 }
  0x72   :  { %1770 = vmatprep.subr.bf16.mxu0 %v2333_v32  ;;  %v183_v15 = vsel %vm157_vm0, %v174_v2, %v182_v60  ;;  %v2345_v43 = vld [vmem:[#allocation2 + $0x4a4] ss:$8 sps:$4 sm:$0xff]   ;;  %1350 = vmatprep.mubr.bf16.mxu0 %v371_v0  ;;  %v224_v32 = vsel %vm206_vm3, %v214_v42, %v223_v35  ;;  %v2812_v38 = vmul.f32 %v2733_v57, %v226_v30  ;;  %v233_v42 = vrot.slane %v2761_v26, 1  ;;  %v2346_v2 = vld [vmem:[#allocation2 + $0x3b0] ss:$8 sps:$4 sm:$0xff]  }
  0x73   :  { %v370_v1 = vpack.c.bf16 %v183_v15, %v342_v18  ;;  %v2815_v45 = vmul.f32 %v2733_v57, %v224_v32  ;;  %v2832_v6 = vmul.f32 %v2723_v50, %v173_v20  ;;  %v253_v19 = vsel %vm206_vm3, %v231_v11, 0.0  ;;  %v2363_v30 = vld [vmem:[#allocation2 + $0x4d4] ss:$8 sps:$4 sm:$0xff]   ;;  %v2358_v32 = vld [vmem:[#allocation2 + $0x3d0] ss:$8 sps:$4 sm:$0xff]  }
  0x74   :  { %899 = vmatpush1.bf16.msra.mxu1 %v2328_v23  ;;  %v180_v23 = vrot.slane %v2749_v10, 7  ;;  %v1364_v13 = vpack.c.bf16 %v2812_v38, %v2683_v37  ;;  %v2835_v53 = vsel %vm206_vm3, %v225_v3, %v233_v42  ;;  %v254_v56 = vsel %vm206_vm3, %v233_v42, 0.0  ;;  %v2352_v3 = vld [vmem:[#allocation2 + $0x3c0] ss:$8 sps:$4 sm:$0xff]   ;;  %v2420_v38 = vld [vmem:[#allocation2 + $0x74] ss:$8 sps:$4 sm:$0xff]  }
  0x75   :  { %1771 = vmatpush1.bf16.msra.mxu0 %v2331_v49  ;;  %900 = vmatprep.subr.bf16.mxu1 %v2336_v59  ;;  %v170_v49 = vrot.slane %v2766_v41, 7  ;;  %v1363_v24 = vpack.c.bf16 %v2815_v45, %v2698_v36  ;;  %v2842_v60 = vmul.f32 %v2659_v16, %v254_v56  ;;  %v2367_v20 = vld [vmem:[#allocation2 + $0x4e0] ss:$8 sps:$4 sm:$0xff]   ;;  %v229_v42 = vrot.slane %v2749_v10, 1  ;;  %v2370_v56 = vld [vmem:[#allocation2 + $0x3f0] ss:$8 sps:$4 sm:$0xff]  }
  0x76   :  { %1772 = vmatprep.subr.bf16.mxu0 %v2339_v28  ;;  %1351 = vmatmul.mubr.bf16.gmra.mrb[4].mxu0 %v370_v1  ;;  %v2828_v59 = vsel %vm157_vm0, %v172_v58, %v180_v23  ;;  %v2349_v28 = vld [vmem:[#allocation2 + $0x4b0] ss:$8 sps:$4 sm:$0xff]   ;;  %v2360_v1 = vld [vmem:[#allocation2 + $0x3d4] ss:$8 sps:$4 sm:$0xff]   ;;  %v2369_v23 = vld [vmem:[#allocation2 + $0x4e4] ss:$8 sps:$4 sm:$0xff]  }
  0x77   :  { %1786 = vmatprep.mubr.bf16.mxu0 %v1362_v7  ;;  %v171_v40 = vsel %vm157_vm0, %v162_v9, %v170_v49  ;;  %v2845_v0 = vsel %vm157_vm0, %v170_v49, %v178_v25  ;;  %v2357_v9 = vld [vmem:[#allocation2 + $0x4c4] ss:$8 sps:$4 sm:$0xff]   ;;  %v1368_v15 = vpack.c.bf16 %v2842_v60, %v2835_v53  ;;  %v2361_v58 = vld [vmem:[#allocation2 + $0x4d0] ss:$8 sps:$4 sm:$0xff]   ;;  %v207_v49 = vrot.slane %v2644_v63, 1 }
  0x78   :  { %901 = vmatpush1.bf16.msra.mxu1 %v2334_v12  ;;  %v2848_v8 = vmul.f32 %v2723_v50, %v171_v40  ;;  %v2354_v12 = vld [vmem:[#allocation2 + $0x3c4] ss:$8 sps:$4 sm:$0xff]   ;;  %v2858_v50 = vsel %vm206_vm3, %v223_v35, %v231_v11  ;;  %v208_v35 = vrot.slane %v2642_v61, 1  ;;  %v2375_v61 = vld [vmem:[#allocation2 + $0x4f4] ss:$8 sps:$4 sm:$0xff]   ;;  %v227_v63 = vrot.slane %v2771_v46, 1 }
  0x79   :  { %1773 = vmatpush1.bf16.msra.mxu0 %v2337_v14  ;;  %902 = vmatprep.subr.bf16.mxu1 %v2342_v22  ;;  %v369_v14 = vpack.c.bf16 %v2828_v59, %v2832_v6  ;;  %v2862_v22 = vmul.f32 %v2659_v16, %v253_v19  ;;  %v2373_v40 = vld [vmem:[#allocation2 + $0x4f0] ss:$8 sps:$4 sm:$0xff]   ;;  %v2381_v11 = vld [vmem:[#allocation2 + $0x504] ss:$8 sps:$4 sm:$0xff]   ;;  %v2379_v19 = vld [vmem:[#allocation2 + $0x500] ss:$8 sps:$4 sm:$0xff]  }
  0x7a   :  { %1774 = vmatprep.subr.bf16.mxu0 %v2345_v43  ;;  %v368_v18 = vpack.c.bf16 %v2845_v0, %v2848_v8  ;;  %v2355_v43 = vld [vmem:[#allocation2 + $0x4c0] ss:$8 sps:$4 sm:$0xff]   ;;  %v209_v10 = vsel %vm206_vm3, %v207_v49, %v208_v35  ;;  %v2387_v46 = vld [vmem:[#allocation2 + $0x514] ss:$8 sps:$4 sm:$0xff]  }
  0x7b   :  { %v1367_v7 = vpack.c.bf16 %v2862_v22, %v2858_v50  ;;  %v2408_v49 = vld [vmem:[#allocation2 + $0x54] ss:$8 sps:$4 sm:$0xff]   ;;  %v2412_v37 = vld [vmem:[#allocation2 + $0x60] ss:$8 sps:$4 sm:$0xff]  }
  0x7c   :  { %903 = vmatpush1.bf16.msra.mxu1 %v2340_v4  ;;  %v2366_v4 = vld [vmem:[#allocation2 + $0x3e4] ss:$8 sps:$4 sm:$0xff]  }
  0x7d   :  { %1775 = vmatpush1.bf16.msra.mxu0 %v2343_v33  ;;  %904 = vmatprep.subr.bf16.mxu1 %v2348_v29  ;;  %v219_v33 = vrot.slane %v2766_v41, 1  ;;  %v2364_v29 = vld [vmem:[#allocation2 + $0x3e0] ss:$8 sps:$4 sm:$0xff]  }
  0x7e   :  { %1776 = vmatprep.subr.bf16.mxu0 %v2351_v51  ;;  %v2372_v51 = vld [vmem:[#allocation2 + $0x3f4] ss:$8 sps:$4 sm:$0xff]  }
  0x7f   :  { %v220_v25 = vsel %vm206_vm3, %v208_v35, %v219_v33  ;;  %v2390_v35 = vld [vmem:[#allocation2 + $0x24] ss:$8 sps:$4 sm:$0xff]  }
  0x80   :  { %905 = vmatpush1.bf16.msra.mxu1 %v2346_v2  ;;  %v352_v41 = vmul.f32 %v2733_v57, %v220_v25  ;;  %v252_v2 = vsel %vm206_vm3, %v229_v42, 0.0  ;;  %v230_v57 = vsel %vm206_vm3, %v221_v21, %v229_v42  ;;  %v2405_v42 = vld [vmem:[#allocation2 + $0x544] ss:$8 sps:$4 sm:$0xff]   ;;  %v2406_v25 = vld [vmem:[#allocation2 + $0x50] ss:$8 sps:$4 sm:$0xff]  }
  0x81   :  { %1777 = vmatpush1.bf16.msra.mxu0 %v2349_v28  ;;  %906 = vmatprep.subr.bf16.mxu1 %v2354_v12  ;;  %v2378_v28 = vld [vmem:[#allocation2 + $0x4] ss:$8 sps:$4 sm:$0xff]   ;;  %v361_v12 = vmul.f32 %v2659_v16, %v252_v2 }
  0x82   :  { %1778 = vmatprep.subr.bf16.mxu0 %v2357_v9  ;;  %v2376_v9 = vld [vmem:[#allocation2] ss:$8 sps:$4 sm:$0xff]   ;;  %v2429_v2 = vld [vmem:[#allocation2 + $0x584] ss:$8 sps:$4 sm:$0xff]  }
  0x84   :  { %907 = vmatpush1.bf16.msra.mxu1 %v2352_v3  ;;  %v1361_v3 = vpack.c.bf16 %v352_v41, %v209_v10  ;;  %v2426_v41 = vld [vmem:[#allocation2 + $0x84] ss:$8 sps:$4 sm:$0xff]   ;;  %v2427_v10 = vld [vmem:[#allocation2 + $0x580] ss:$8 sps:$4 sm:$0xff]  }
  0x85   :  { %1779 = vmatpush1.bf16.msra.mxu0 %v2355_v43  ;;  %908 = vmatprep.subr.bf16.mxu1 %v2360_v1  ;;  %v2384_v43 = vld [vmem:[#allocation2 + $0x14] ss:$8 sps:$4 sm:$0xff]   ;;  %v251_v1 = vsel %vm206_vm3, %v227_v63, 0.0 }
  0x86   :  { %1780 = vmatprep.subr.bf16.mxu0 %v2363_v30  ;;  %v443_v30 = vpack.c.bf16 %v2761_v26, %v2754_v17  ;;  %v360_v21 = vmul.f32 %v2659_v16, %v251_v1  ;;  %v442_v17 = vpack.c.bf16 %v2778_v52, %v2773_v48  ;;  %v2396_v16 = vld [vmem:[#allocation2 + $0x34] ss:$8 sps:$4 sm:$0xff]   ;;  %v2400_v48 = vld [vmem:[#allocation2 + $0x40] ss:$8 sps:$4 sm:$0xff]  }
  0x87   :  { %v2399_v26 = vld [vmem:[#allocation2 + $0x534] ss:$8 sps:$4 sm:$0xff]   ;;  %v2403_v52 = vld [vmem:[#allocation2 + $0x540] ss:$8 sps:$4 sm:$0xff]  }
  0x88   :  { %909 = vmatpush1.bf16.msra.mxu1 %v2358_v32  ;;  %v1366_v32 = vpack.c.bf16 %v361_v12, %v230_v57  ;;  %v2430_v12 = vld [vmem:[#allocation2 + $0x90] ss:$8 sps:$4 sm:$0xff]   ;;  %v2436_v57 = vld [vmem:[#allocation2 + $0xa0] ss:$8 sps:$4 sm:$0xff]   ;;  %v2444_v1 = vld [vmem:[#allocation2 + $0xb4] ss:$8 sps:$4 sm:$0xff]  }
  0x89   :  { %1781 = vmatpush1.bf16.msra.mxu0 %v2361_v58  ;;  %910 = vmatprep.subr.bf16.mxu1 %v2366_v4  ;;  %v2385_v58 = vld [vmem:[#allocation2 + $0x510] ss:$8 sps:$4 sm:$0xff]   ;;  %v228_v4 = vsel %vm206_vm3, %v219_v33, %v227_v63  ;;  %v2432_v63 = vld [vmem:[#allocation2 + $0x94] ss:$8 sps:$4 sm:$0xff]  }
  0x8a   :  { %1782 = vmatprep.subr.bf16.mxu0 %v2369_v23  ;;  %v2393_v23 = vld [vmem:[#allocation2 + $0x524] ss:$8 sps:$4 sm:$0xff]   ;;  %v1365_v54 = vpack.c.bf16 %v360_v21, %v228_v4  ;;  %v2394_v33 = vld [vmem:[#allocation2 + $0x30] ss:$8 sps:$4 sm:$0xff]   ;;  %v2448_v21 = vld [vmem:[#allocation2 + $0xc0] ss:$8 sps:$4 sm:$0xff]  }
  0x8b   :  { %v2456_v4 = vld [vmem:[#allocation2 + $0xd4] ss:$8 sps:$4 sm:$0xff]  }
  0x8c   :  { %911 = vmatpush1.bf16.msra.mxu1 %v2364_v29  ;;  %v2397_v29 = vld [vmem:[#allocation2 + $0x530] ss:$8 sps:$4 sm:$0xff]  }
  0x8d   :  { %1783 = vmatpush1.bf16.msra.mxu0 %v2367_v20  ;;  %912 = vmatprep.subr.bf16.mxu1 %v2372_v51  ;;  %v2402_v20 = vld [vmem:[#allocation2 + $0x44] ss:$8 sps:$4 sm:$0xff]   ;;  %v2411_v51 = vld [vmem:[#allocation2 + $0x554] ss:$8 sps:$4 sm:$0xff]  }
  0x8e   :  { %1784 = vmatprep.subr.bf16.mxu0 %v2375_v61  ;;  %v2409_v61 = vld [vmem:[#allocation2 + $0x550] ss:$8 sps:$4 sm:$0xff]  }
  0x90   :  { %913 = vmatpush1.bf16.msra.mxu1 %v2370_v56  ;;  %v2418_v56 = vld [vmem:[#allocation2 + $0x70] ss:$8 sps:$4 sm:$0xff]  }
  0x91   :  { %1785 = vmatpush1.bf16.msra.mxu0 %v2373_v40  ;;  %1255 = vmatprep.subr.bf16.mxu1 %v2378_v28  ;;  %v2421_v40 = vld [vmem:[#allocation2 + $0x570] ss:$8 sps:$4 sm:$0xff]   ;;  %v2424_v28 = vld [vmem:[#allocation2 + $0x80] ss:$8 sps:$4 sm:$0xff]  }
  0x92   :  { %1807 = vmatprep.subr.bf16.mxu0 %v2381_v11  ;;  %v2435_v11 = vld [vmem:[#allocation2 + $0x594] ss:$8 sps:$4 sm:$0xff]  }
  0x93   :  { %915 = vmatmul.mubr.bf16.vlgmr.msra.gmra.mrb[0].mxu1 %v438_v5  ;;  %v2391_v5 = vld [vmem:[#allocation2 + $0x520] ss:$8 sps:$4 sm:$0xff]  }
  0x94   :  { %1787 = vmatmul.mubr.bf16.vlgmr.msra.gmra.mrb[0].mxu0 %v1361_v3  ;;  %1256 = vmatpush1.bf16.msra.mxu1 %v2376_v9  ;;  %v2433_v9 = vld [vmem:[#allocation2 + $0x590] ss:$8 sps:$4 sm:$0xff]   ;;  %v2441_v3 = vld [vmem:[#allocation2 + $0x5a4] ss:$8 sps:$4 sm:$0xff]  }
  0x95   :  { %1808 = vmatpush1.bf16.msra.mxu0 %v2379_v19  ;;  %1257 = vmatprep.subr.bf16.mxu1 %v2384_v43  ;;  %v2438_v19 = vld [vmem:[#allocation2 + $0xa4] ss:$8 sps:$4 sm:$0xff]   ;;  %v2439_v43 = vld [vmem:[#allocation2 + $0x5a0] ss:$8 sps:$4 sm:$0xff]  }
  0x96   :  { %1809 = vmatprep.subr.bf16.mxu0 %v2387_v46  ;;  %924 = vmatprep.mubr.bf16.mxu1 %v443_v30  ;;  %v2447_v46 = vld [vmem:[#allocation2 + $0x5b4] ss:$8 sps:$4 sm:$0xff]   ;;  %v2442_v30 = vld [vmem:[#allocation2 + $0xb0] ss:$8 sps:$4 sm:$0xff]  }
  0x97   :  { %1796 = vmatprep.mubr.bf16.mxu0 %v1366_v32  ;;  %v2445_v32 = vld [vmem:[#allocation2 + $0x5b0] ss:$8 sps:$4 sm:$0xff]  }
  0x98   :  { %1258 = vmatpush1.bf16.msra.mxu1 %v2382_v62  ;;  %v2450_v62 = vld [vmem:[#allocation2 + $0xc4] ss:$8 sps:$4 sm:$0xff]  }
  0x99   :  { %1810 = vmatpush1.bf16.msra.mxu0 %v2385_v58  ;;  %1259 = vmatprep.subr.bf16.mxu1 %v2390_v35  ;;  %v2453_v58 = vld [vmem:[#allocation2 + $0x5c4] ss:$8 sps:$4 sm:$0xff]   ;;  %v2451_v35 = vld [vmem:[#allocation2 + $0x5c0] ss:$8 sps:$4 sm:$0xff]  }
  0x9a   :  { %1811 = vmatprep.subr.bf16.mxu0 %v2393_v23  ;;  %v2459_v23 = vld [vmem:[#allocation2 + $0x5d4] ss:$8 sps:$4 sm:$0xff]  }
  0x9b   :  { %925 = vmatmul.mubr.bf16.gmra.mrb[4].mxu1 %v442_v17  ;;  %v2454_v17 = vld [vmem:[#allocation2 + $0xd0] ss:$8 sps:$4 sm:$0xff]  }
  0x9c   :  { %1797 = vmatmul.mubr.bf16.gmra.mrb[4].mxu0 %v1365_v54  ;;  %1260 = vmatpush1.bf16.msra.mxu1 %v2388_v55  ;;  %v2457_v54 = vld [vmem:[#allocation2 + $0x5d0] ss:$8 sps:$4 sm:$0xff]   ;;  %v2462_v55 = vld [vmem:[#allocation2 + $0xe4] ss:$8 sps:$4 sm:$0xff]  }
  0x9d   :  { %1812 = vmatpush1.bf16.msra.mxu0 %v2391_v5  ;;  %1261 = vmatprep.subr.bf16.mxu1 %v2396_v16  ;;  %v2465_v5 = vld [vmem:[#allocation2 + $0x5e4] ss:$8 sps:$4 sm:$0xff]   ;;  %v2460_v16 = vld [vmem:[#allocation2 + $0xe0] ss:$8 sps:$4 sm:$0xff]  }
  0x9e   :  { %1813 = vmatprep.subr.bf16.mxu0 %v2399_v26  ;;  %1287 = vmatprep.mubr.bf16.mxu1 %v365_v44  ;;  %v2415_v44 = vld [vmem:[#allocation2 + $0x560] ss:$8 sps:$4 sm:$0xff]  }
  0x9f   :  { %1839 = vmatprep.mubr.bf16.mxu0 %v1364_v13  ;;  %v2423_v13 = vld [vmem:[#allocation2 + $0x574] ss:$8 sps:$4 sm:$0xff]   ;;  %v2463_v26 = vld [vmem:[#allocation2 + $0x5e0] ss:$8 sps:$4 sm:$0xff]  }
  0xa0   :  { %1262 = vmatpush1.bf16.msra.mxu1 %v2394_v33  ;;  %v2468_v33 = vld [vmem:[#allocation2 + $0xf4] ss:$8 sps:$4 sm:$0xff]  }
  0xa1   :  { %1814 = vmatpush1.bf16.msra.mxu0 %v2397_v29  ;;  %1263 = vmatprep.subr.bf16.mxu1 %v2402_v20  ;;  %v2471_v29 = vld [vmem:[#allocation2 + $0x5f4] ss:$8 sps:$4 sm:$0xff]   ;;  %v2466_v20 = vld [vmem:[#allocation2 + $0xf0] ss:$8 sps:$4 sm:$0xff]  }
  0xa2   :  { %1815 = vmatprep.subr.bf16.mxu0 %v2405_v42  ;;  %v2469_v42 = vld [vmem:[#allocation2 + $0x5f0] ss:$8 sps:$4 sm:$0xff]  }
  0xa4   :  { %1264 = vmatpush1.bf16.msra.mxu1 %v2400_v48 }
  0xa5   :  { %1816 = vmatpush1.bf16.msra.mxu0 %v2403_v52  ;;  %1265 = vmatprep.subr.bf16.mxu1 %v2408_v49 }
  0xa6   :  { %1817 = vmatprep.subr.bf16.mxu0 %v2411_v51 }
  0xa8   :  { %1266 = vmatpush1.bf16.msra.mxu1 %v2406_v25 }
  0xa9   :  { %1818 = vmatpush1.bf16.msra.mxu0 %v2409_v61  ;;  %1267 = vmatprep.subr.bf16.mxu1 %v2414_v27 }
  0xaa   :  { %1819 = vmatprep.subr.bf16.mxu0 %v2417_v34 }
  0xac   :  { %1268 = vmatpush1.bf16.msra.mxu1 %v2412_v37 }
  0xad   :  { %1820 = vmatpush1.bf16.msra.mxu0 %v2415_v44  ;;  %1269 = vmatprep.subr.bf16.mxu1 %v2420_v38 }
  0xae   :  { %1821 = vmatprep.subr.bf16.mxu0 %v2423_v13 }
  0xb0   :  { %1270 = vmatpush1.bf16.msra.mxu1 %v2418_v56 }
  0xb1   :  { %1822 = vmatpush1.bf16.msra.mxu0 %v2421_v40  ;;  %1271 = vmatprep.subr.bf16.mxu1 %v2426_v41 }
  0xb2   :  { %1823 = vmatprep.subr.bf16.mxu0 %v2429_v2 }
  0xb4   :  { %1272 = vmatpush1.bf16.msra.mxu1 %v2424_v28 }
  0xb5   :  { %1824 = vmatpush1.bf16.msra.mxu0 %v2427_v10  ;;  %1273 = vmatprep.subr.bf16.mxu1 %v2432_v63 }
  0xb6   :  { %1825 = vmatprep.subr.bf16.mxu0 %v2435_v11 }
  0xb8   :  { %1274 = vmatpush1.bf16.msra.mxu1 %v2430_v12 }
  0xb9   :  { %1826 = vmatpush1.bf16.msra.mxu0 %v2433_v9  ;;  %1275 = vmatprep.subr.bf16.mxu1 %v2438_v19 }
  0xba   :  { %1827 = vmatprep.subr.bf16.mxu0 %v2441_v3 }
  0xbc   :  { %1276 = vmatpush1.bf16.msra.mxu1 %v2436_v57 }
  0xbd   :  { %1828 = vmatpush1.bf16.msra.mxu0 %v2439_v43  ;;  %1277 = vmatprep.subr.bf16.mxu1 %v2444_v1 }
  0xbe   :  { %1829 = vmatprep.subr.bf16.mxu0 %v2447_v46 }
  0xc0   :  { %1278 = vmatpush1.bf16.msra.mxu1 %v2442_v30 }
  0xc1   :  { %1830 = vmatpush1.bf16.msra.mxu0 %v2445_v32  ;;  %1279 = vmatprep.subr.bf16.mxu1 %v2450_v62 }
  0xc2   :  { %1831 = vmatprep.subr.bf16.mxu0 %v2453_v58 }
  0xc4   :  { %1280 = vmatpush1.bf16.msra.mxu1 %v2448_v21 }
  0xc5   :  { %1832 = vmatpush1.bf16.msra.mxu0 %v2451_v35  ;;  %1281 = vmatprep.subr.bf16.mxu1 %v2456_v4 }
  0xc6   :  { %1833 = vmatprep.subr.bf16.mxu0 %v2459_v23 }
  0xc8   :  { %1282 = vmatpush1.bf16.msra.mxu1 %v2454_v17 }
  0xc9   :  { %1834 = vmatpush1.bf16.msra.mxu0 %v2457_v54  ;;  %1283 = vmatprep.subr.bf16.mxu1 %v2462_v55 }
  0xca   :  { %1835 = vmatprep.subr.bf16.mxu0 %v2465_v5 }
  0xcc   :  { %1284 = vmatpush1.bf16.msra.mxu1 %v2460_v16 }
  0xcd   :  { %1836 = vmatpush1.bf16.msra.mxu0 %v2463_v26  ;;  %1285 = vmatprep.subr.bf16.mxu1 %v2468_v33 }
  0xce   :  { %1837 = vmatprep.subr.bf16.mxu0 %v2471_v29 }
  0xd0   :  { %1286 = vmatpush1.bf16.msra.mxu1 %v2466_v20 }
  0xd1   :  { %1838 = vmatpush1.bf16.msra.mxu0 %v2469_v42 }
  0xd3   :  { %1288 = vmatmul.mubr.bf16.vlgmr.msra.gmra.mrb[0].mxu1 %v364_v47 }
  0xd4   :  { %1840 = vmatmul.mubr.bf16.vlgmr.msra.gmra.mrb[0].mxu0 %v1363_v24  ;;  %1297 = vmatprep.mubr.bf16.mxu1 %v369_v14 }
  0xd5   :  { %1849 = vmatprep.mubr.bf16.mxu0 %v1368_v15 }
  0xdb   :  { %1298 = vmatmul.mubr.bf16.gmra.mrb[4].mxu1 %v368_v18 }
  0xdc   :  { %1850 = vmatmul.mubr.bf16.gmra.mrb[4].mxu0 %v1367_v7 }
 0x1a6   :  { %v1289_v31 = vpop.f32.mrb[0].mxu1 }
 0x1a7   :  { %v1841_v39 = vpop.f32.mrb[0].mxu0  ;;  %v1291_v36 = vpop.f32.mrb[1].mxu1 }
 0x1a8   :  { %v2140_v47 = vadd.f32 %v1841_v39, %v1289_v31  ;;  %v1843_v45 = vpop.f32.mrb[1].mxu0  ;;  %v1293_v59 = vpop.f32.mrb[2].mxu1 }
 0x1a9   :  { %v2141_v24 = vadd.f32 %v1843_v45, %v1291_v36  ;;  %v1845_v6 = vpop.f32.mrb[2].mxu0  ;;  %v1295_v60 = vpop.f32.mrb[3].mxu1 }
 0x1aa   :  { %1868 = vst [vmem:[%s2946_s4] sm:$0xff] %v2140_v47  ;;  %v2142_v53 = vadd.f32 %v1845_v6, %v1293_v59  ;;  %v1847_v0 = vpop.f32.mrb[3].mxu0  ;;  %v1894_v14 = vmul.f32 %v2140_v47, %v2140_v47 }
 0x1ab   :  { %1869 = vst [vmem:[%s2946_s4 + $0x8] sm:$0xff] %v2141_v24  ;;  %v2143_v8 = vadd.f32 %v1847_v0, %v1295_v60  ;;  %v1895_v50 = vmul.f32 %v2141_v24, %v2141_v24 }
 0x1ac   :  { %1870 = vst [vmem:[%s2946_s4 + $0x10] sm:$0xff] %v2142_v53  ;;  %v1876_v15 = vadd.f32 %v2142_v53, %v2140_v47  ;;  %v1896_v18 = vmul.f32 %v2142_v53, %v2142_v53 }
 0x1ad   :  { %1871 = vst [vmem:[%s2946_s4 + $0x18] sm:$0xff] %v2143_v8  ;;  %v1885_v22 = vadd.f32 %v2143_v8, %v2141_v24  ;;  %v1897_v7 = vmul.f32 %v2143_v8, %v2143_v8 }
 0x1ae   :  { %v1902_v48 = vadd.f32 %v1896_v18, %v1894_v14  ;;  %v1299_v49 = vpop.f32.mrb[4].mxu1 }
 0x1af   :  { %v1911_v52 = vadd.f32 %v1897_v7, %v1895_v50  ;;  %v1851_v51 = vpop.f32.mrb[4].mxu0  ;;  %v1301_v61 = vpop.f32.mrb[5].mxu1 }
 0x1b0   :  { %v2144_v25 = vadd.f32 %v1851_v51, %v1299_v49  ;;  %v1853_v27 = vpop.f32.mrb[5].mxu0  ;;  %v1303_v37 = vpop.f32.mrb[6].mxu1 }
 0x1b1   :  { %v2145_v34 = vadd.f32 %v1853_v27, %v1301_v61  ;;  %v1855_v44 = vpop.f32.mrb[6].mxu0  ;;  %v1305_v40 = vpop.f32.mrb[7].mxu1 }
 0x1b2   :  { %1872 = vst [vmem:[%s2946_s4 + $0x20] sm:$0xff] %v2144_v25  ;;  %v1877_v38 = vadd.f32 %v2144_v25, %v1876_v15  ;;  %v1898_v13 = vmul.f32 %v2144_v25, %v2144_v25  ;;  %v2146_v56 = vadd.f32 %v1855_v44, %v1303_v37  ;;  %v1857_v41 = vpop.f32.mrb[7].mxu0 }
 0x1b3   :  { %1873 = vst [vmem:[%s2946_s4 + $0x28] sm:$0xff] %v2145_v34  ;;  %v1886_v2 = vadd.f32 %v2145_v34, %v1885_v22  ;;  %v1899_v28 = vmul.f32 %v2145_v34, %v2145_v34  ;;  %v2147_v10 = vadd.f32 %v1857_v41, %v1305_v40 }
 0x1b4   :  { %v1903_v63 = vadd.f32 %v1902_v48, %v1898_v13  ;;  %1874 = vst [vmem:[%s2946_s4 + $0x30] sm:$0xff] %v2146_v56  ;;  %v1878_v11 = vadd.f32 %v2146_v56, %v1877_v38  ;;  %v1900_v12 = vmul.f32 %v2146_v56, %v2146_v56 }
 0x1b5   :  { %v1912_v9 = vadd.f32 %v1911_v52, %v1899_v28  ;;  %1875 = vst [vmem:[%s2946_s4 + $0x38] sm:$0xff] %v2147_v10  ;;  %v1887_v19 = vadd.f32 %v2147_v10, %v1886_v2  ;;  %v1901_v3 = vmul.f32 %v2147_v10, %v2147_v10 }
 0x1b6   :  { %v1879_v57 = vrot.slane %v1878_v11, 4  ;;  %v1904_v43 = vadd.f32 %v1903_v63, %v1900_v12 }
 0x1b7   :  { %v1888_v1 = vrot.slane %v1887_v19, 4  ;;  %v1913_v46 = vadd.f32 %v1912_v9, %v1901_v3 }
 0x1b8   :  { %v1880_v30 = vadd.f32 %v1879_v57, %v1878_v11  ;;  %v1905_v32 = vrot.slane %v1904_v43, 4 }
 0x1b9   :  { %v1889_v62 = vadd.f32 %v1888_v1, %v1887_v19  ;;  %v1914_v58 = vrot.slane %v1913_v46, 4 }
 0x1ba   :  { %v1881_v21 = vrot.slane %v1880_v30, 2  ;;  %v1906_v35 = vadd.f32 %v1905_v32, %v1904_v43 }
 0x1bb   :  { %v1890_v4 = vrot.slane %v1889_v62, 2  ;;  %v1915_v23 = vadd.f32 %v1914_v58, %v1913_v46 }
 0x1bc   :  { %v1882_v17 = vadd.f32 %v1881_v21, %v1880_v30  ;;  %v1907_v54 = vrot.slane %v1906_v35, 2 }
 0x1bd   :  { %v1891_v55 = vadd.f32 %v1890_v4, %v1889_v62  ;;  %v1916_v5 = vrot.slane %v1915_v23, 2 }
 0x1be   :  { %v1883_v16 = vrot.slane %v1882_v17, 1  ;;  %v1908_v26 = vadd.f32 %v1907_v54, %v1906_v35 }
 0x1bf   :  { %v1892_v33 = vrot.slane %v1891_v55, 1  ;;  %v1917_v29 = vadd.f32 %v1916_v5, %v1915_v23 }
 0x1c0   :  { %v1909_v20 = vrot.slane %v1908_v26, 1  ;;  %v1884_v31 = vadd.f32 %v1883_v16, %v1882_v17 }
 0x1c1   :  { %v1918_v42 = vrot.slane %v1917_v29, 1  ;;  %v1893_v47 = vadd.f32 %v1892_v33, %v1891_v55 }
 0x1c2   :  { %v1910_v39 = vadd.f32 %v1909_v20, %v1908_v26 }
 0x1c3   :  { %v1919_v36 = vadd.f32 %v1918_v42, %v1917_v29 }
 0x1c4   :  { %v1920_v45 = vsel %vm157_vm0, %v1884_v31, %v1910_v39 }
 0x1c5   :  { %v1921_v24 = vsel %vm157_vm0, %v1893_v47, %v1919_v36 }
 0x1c6   :  { %v1924_v59 = vcombine.low %v1920_v45, %v1921_v24 }
 0x1c8   :  { %2139 = vst.sshfl [vmem:[%s2947_s5] sm:$0x33 pattern:$0x76325410] %v1924_v59 }
 0x1c9   :  { %1942 = vsyncpa [#allocation3], 1 }

// kernel: closed_call.19
= control target key start
LH: loop header
LB: loop body
LE: loop exit
PB: predicated region body
PF: predicated region fallthrough
CT: control target
= control target key end

     0   :  { %s1039_s2 = inlined_call_operand.vmem [shape: f32[512,256], index: 2, kind: input, shape index: {}]   ;;  %s1040_s0 = inlined_call_operand.vmem [shape: f32[32,256], index: 0, kind: input, shape index: {}]   ;;  %s1041_s1 = inlined_call_operand.vmem [shape: f32[32,512], index: 1, kind: input, shape index: {}]   ;;  %s1042_s3 = inlined_call_operand.vmem [shape: f32[1,256], index: 3, kind: input, shape index: {}]   ;;  %s1043_s4 = inlined_call_operand.vmem [shape: f32[32,256], index: 4, kind: output, shape index: {}]  }
   0x1   :  { %v58_v0 = vld [vmem:[%s1039_s2 + $0x8] sm:$0xff]  ;;  %v60_v1 = vld [vmem:[%s1039_s2 + $0x18] sm:$0xff]  ;;  %v57_v5 = vld [vmem:[%s1039_s2] sm:$0xff] }
   0x2   :  { %v122_v2 = vld [vmem:[%s1039_s2 + $0x208] sm:$0xff]  ;;  %v395_v3 = vpack.c.bf16 %v60_v1, %v58_v0  ;;  %v124_v4 = vld [vmem:[%s1039_s2 + $0x218] sm:$0xff]  ;;  %v59_v6 = vld [vmem:[%s1039_s2 + $0x10] sm:$0xff] }
   0x3   :  { %v459_v7 = vpack.c.bf16 %v124_v4, %v122_v2  ;;  %v397_v8 = vpack.c.bf16 %v59_v6, %v57_v5  ;;  %v121_v9 = vld [vmem:[%s1039_s2 + $0x200] sm:$0xff]  ;;  %v123_v10 = vld [vmem:[%s1039_s2 + $0x210] sm:$0xff]  ;;  %v62_v11 = vld [vmem:[%s1039_s2 + $0x28] sm:$0xff] }
   0x4   :  { %396 = vmatprep.subr.bf16.mxu1 %v395_v3  ;;  %v461_v12 = vpack.c.bf16 %v123_v10, %v121_v9  ;;  %v64_v13 = vld [vmem:[%s1039_s2 + $0x38] sm:$0xff]  ;;  %v126_v14 = vld [vmem:[%s1039_s2 + $0x228] sm:$0xff]  ;;  %v61_v18 = vld [vmem:[%s1039_s2 + $0x20] sm:$0xff] }
   0x5   :  { %v128_v15 = vld [vmem:[%s1039_s2 + $0x238] sm:$0xff]  ;;  %460 = vmatprep.subr.bf16.mxu0 %v459_v7  ;;  %398 = vmatpush1.bf16.msra.mxu1 %v397_v8  ;;  %v399_v16 = vpack.c.bf16 %v64_v13, %v62_v11  ;;  %v63_v19 = vld [vmem:[%s1039_s2 + $0x30] sm:$0xff]  ;;  %v125_v20 = vld [vmem:[%s1039_s2 + $0x220] sm:$0xff] }
   0x6   :  { %v463_v17 = vpack.c.bf16 %v128_v15, %v126_v14  ;;  %462 = vmatpush1.bf16.msra.mxu0 %v461_v12  ;;  %v401_v21 = vpack.c.bf16 %v63_v19, %v61_v18  ;;  %v127_v22 = vld [vmem:[%s1039_s2 + $0x230] sm:$0xff]  ;;  %v66_v23 = vld [vmem:[%s1039_s2 + $0x48] sm:$0xff]  ;;  %v68_v24 = vld [vmem:[%s1039_s2 + $0x58] sm:$0xff] }
   0x7   :  { %400 = vmatprep.subr.bf16.mxu1 %v399_v16  ;;  %v465_v25 = vpack.c.bf16 %v127_v22, %v125_v20  ;;  %v403_v26 = vpack.c.bf16 %v68_v24, %v66_v23  ;;  %v130_v27 = vld [vmem:[%s1039_s2 + $0x248] sm:$0xff]  ;;  %v132_v28 = vld [vmem:[%s1039_s2 + $0x258] sm:$0xff]  ;;  %v65_v29 = vld [vmem:[%s1039_s2 + $0x40] sm:$0xff] }
   0x8   :  { %464 = vmatprep.subr.bf16.mxu0 %v463_v17  ;;  %v467_v30 = vpack.c.bf16 %v132_v28, %v130_v27  ;;  %v67_v31 = vld [vmem:[%s1039_s2 + $0x50] sm:$0xff]  ;;  %v129_v32 = vld [vmem:[%s1039_s2 + $0x240] sm:$0xff]  ;;  %v70_v35 = vld [vmem:[%s1039_s2 + $0x68] sm:$0xff] }
   0x9   :  { %v131_v33 = vld [vmem:[%s1039_s2 + $0x250] sm:$0xff]  ;;  %402 = vmatpush1.bf16.msra.mxu1 %v401_v21  ;;  %v405_v34 = vpack.c.bf16 %v67_v31, %v65_v29  ;;  %v72_v36 = vld [vmem:[%s1039_s2 + $0x78] sm:$0xff]  ;;  %v134_v37 = vld [vmem:[%s1039_s2 + $0x268] sm:$0xff] }
   0xa   :  { %466 = vmatpush1.bf16.msra.mxu0 %v465_v25  ;;  %404 = vmatprep.subr.bf16.mxu1 %v403_v26  ;;  %v469_v38 = vpack.c.bf16 %v131_v33, %v129_v32  ;;  %v407_v39 = vpack.c.bf16 %v72_v36, %v70_v35  ;;  %v136_v40 = vld [vmem:[%s1039_s2 + $0x278] sm:$0xff]  ;;  %v69_v41 = vld [vmem:[%s1039_s2 + $0x60] sm:$0xff]  ;;  %v71_v42 = vld [vmem:[%s1039_s2 + $0x70] sm:$0xff] }
   0xb   :  { %468 = vmatprep.subr.bf16.mxu0 %v467_v30  ;;  %v471_v43 = vpack.c.bf16 %v136_v40, %v134_v37  ;;  %v133_v44 = vld [vmem:[%s1039_s2 + $0x260] sm:$0xff]  ;;  %v135_v45 = vld [vmem:[%s1039_s2 + $0x270] sm:$0xff]  ;;  %v74_v46 = vld [vmem:[%s1039_s2 + $0x88] sm:$0xff]  ;;  %v409_v50 = vpack.c.bf16 %v71_v42, %v69_v41 }
   0xc   :  { %v76_v47 = vld [vmem:[%s1039_s2 + $0x98] sm:$0xff]  ;;  %v138_v48 = vld [vmem:[%s1039_s2 + $0x288] sm:$0xff]  ;;  %v473_v51 = vpack.c.bf16 %v135_v45, %v133_v44  ;;  %v73_v53 = vld [vmem:[%s1039_s2 + $0x80] sm:$0xff] }
   0xd   :  { %v140_v49 = vld [vmem:[%s1039_s2 + $0x298] sm:$0xff]  ;;  %406 = vmatpush1.bf16.msra.mxu1 %v405_v34  ;;  %v411_v52 = vpack.c.bf16 %v76_v47, %v74_v46  ;;  %v75_v54 = vld [vmem:[%s1039_s2 + $0x90] sm:$0xff]  ;;  %v137_v55 = vld [vmem:[%s1039_s2 + $0x280] sm:$0xff] }
   0xe   :  { %470 = vmatpush1.bf16.msra.mxu0 %v469_v38  ;;  %408 = vmatprep.subr.bf16.mxu1 %v407_v39  ;;  %v475_v56 = vpack.c.bf16 %v140_v49, %v138_v48  ;;  %v139_v57 = vld [vmem:[%s1039_s2 + $0x290] sm:$0xff]  ;;  %v78_v58 = vld [vmem:[%s1039_s2 + $0xa8] sm:$0xff]  ;;  %v80_v59 = vld [vmem:[%s1039_s2 + $0xb8] sm:$0xff]  ;;  %v413_v62 = vpack.c.bf16 %v75_v54, %v73_v53 }
   0xf   :  { %472 = vmatprep.subr.bf16.mxu0 %v471_v43  ;;  %v142_v60 = vld [vmem:[%s1039_s2 + $0x2a8] sm:$0xff]  ;;  %v144_v61 = vld [vmem:[%s1039_s2 + $0x2b8] sm:$0xff]  ;;  %v477_v63 = vpack.c.bf16 %v139_v57, %v137_v55  ;;  %v415_v0 = vpack.c.bf16 %v80_v59, %v78_v58  ;;  %v77_v1 = vld [vmem:[%s1039_s2 + $0xa0] sm:$0xff] }
  0x10   :  { %v79_v2 = vld [vmem:[%s1039_s2 + $0xb0] sm:$0xff]  ;;  %v141_v3 = vld [vmem:[%s1039_s2 + $0x2a0] sm:$0xff]  ;;  %v479_v4 = vpack.c.bf16 %v144_v61, %v142_v60  ;;  %v82_v6 = vld [vmem:[%s1039_s2 + $0xc8] sm:$0xff] }
  0x11   :  { %410 = vmatpush1.bf16.msra.mxu1 %v409_v50  ;;  %v143_v5 = vld [vmem:[%s1039_s2 + $0x2b0] sm:$0xff]  ;;  %v84_v7 = vld [vmem:[%s1039_s2 + $0xd8] sm:$0xff]  ;;  %v146_v8 = vld [vmem:[%s1039_s2 + $0x2c8] sm:$0xff]  ;;  %v417_v10 = vpack.c.bf16 %v79_v2, %v77_v1 }
  0x12   :  { %474 = vmatpush1.bf16.msra.mxu0 %v473_v51  ;;  %412 = vmatprep.subr.bf16.mxu1 %v411_v52  ;;  %v148_v9 = vld [vmem:[%s1039_s2 + $0x2d8] sm:$0xff]  ;;  %v481_v11 = vpack.c.bf16 %v143_v5, %v141_v3  ;;  %v419_v12 = vpack.c.bf16 %v84_v7, %v82_v6  ;;  %v81_v13 = vld [vmem:[%s1039_s2 + $0xc0] sm:$0xff]  ;;  %v83_v14 = vld [vmem:[%s1039_s2 + $0xd0] sm:$0xff] }
  0x13   :  { %476 = vmatprep.subr.bf16.mxu0 %v475_v56  ;;  %v145_v15 = vld [vmem:[%s1039_s2 + $0x2c0] sm:$0xff]  ;;  %v483_v16 = vpack.c.bf16 %v148_v9, %v146_v8  ;;  %v147_v17 = vld [vmem:[%s1039_s2 + $0x2d0] sm:$0xff]  ;;  %v86_v18 = vld [vmem:[%s1039_s2 + $0xe8] sm:$0xff]  ;;  %v421_v22 = vpack.c.bf16 %v83_v14, %v81_v13 }
  0x14   :  { %v88_v19 = vld [vmem:[%s1039_s2 + $0xf8] sm:$0xff]  ;;  %v150_v20 = vld [vmem:[%s1039_s2 + $0x2e8] sm:$0xff]  ;;  %v485_v23 = vpack.c.bf16 %v147_v17, %v145_v15  ;;  %v85_v25 = vld [vmem:[%s1039_s2 + $0xe0] sm:$0xff] }
  0x15   :  { %414 = vmatpush1.bf16.msra.mxu1 %v413_v62  ;;  %v152_v21 = vld [vmem:[%s1039_s2 + $0x2f8] sm:$0xff]  ;;  %v423_v24 = vpack.c.bf16 %v88_v19, %v86_v18  ;;  %v87_v26 = vld [vmem:[%s1039_s2 + $0xf0] sm:$0xff]  ;;  %v149_v27 = vld [vmem:[%s1039_s2 + $0x2e0] sm:$0xff] }
  0x16   :  { %478 = vmatpush1.bf16.msra.mxu0 %v477_v63  ;;  %416 = vmatprep.subr.bf16.mxu1 %v415_v0  ;;  %v487_v28 = vpack.c.bf16 %v152_v21, %v150_v20  ;;  %v151_v29 = vld [vmem:[%s1039_s2 + $0x2f0] sm:$0xff]  ;;  %v90_v30 = vld [vmem:[%s1039_s2 + $0x108] sm:$0xff]  ;;  %v92_v31 = vld [vmem:[%s1039_s2 + $0x118] sm:$0xff]  ;;  %v425_v34 = vpack.c.bf16 %v87_v26, %v85_v25 }
  0x17   :  { %480 = vmatprep.subr.bf16.mxu0 %v479_v4  ;;  %v154_v32 = vld [vmem:[%s1039_s2 + $0x308] sm:$0xff]  ;;  %v156_v33 = vld [vmem:[%s1039_s2 + $0x318] sm:$0xff]  ;;  %v489_v35 = vpack.c.bf16 %v151_v29, %v149_v27  ;;  %v427_v36 = vpack.c.bf16 %v92_v31, %v90_v30  ;;  %v89_v37 = vld [vmem:[%s1039_s2 + $0x100] sm:$0xff] }
  0x18   :  { %v91_v38 = vld [vmem:[%s1039_s2 + $0x110] sm:$0xff]  ;;  %v153_v39 = vld [vmem:[%s1039_s2 + $0x300] sm:$0xff]  ;;  %v491_v40 = vpack.c.bf16 %v156_v33, %v154_v32  ;;  %v94_v42 = vld [vmem:[%s1039_s2 + $0x128] sm:$0xff] }
  0x19   :  { %418 = vmatpush1.bf16.msra.mxu1 %v417_v10  ;;  %v155_v41 = vld [vmem:[%s1039_s2 + $0x310] sm:$0xff]  ;;  %v96_v43 = vld [vmem:[%s1039_s2 + $0x138] sm:$0xff]  ;;  %v158_v44 = vld [vmem:[%s1039_s2 + $0x328] sm:$0xff]  ;;  %v429_v46 = vpack.c.bf16 %v91_v38, %v89_v37 }
  0x1a   :  { %482 = vmatpush1.bf16.msra.mxu0 %v481_v11  ;;  %420 = vmatprep.subr.bf16.mxu1 %v419_v12  ;;  %v160_v45 = vld [vmem:[%s1039_s2 + $0x338] sm:$0xff]  ;;  %v493_v47 = vpack.c.bf16 %v155_v41, %v153_v39  ;;  %v431_v48 = vpack.c.bf16 %v96_v43, %v94_v42  ;;  %v93_v49 = vld [vmem:[%s1039_s2 + $0x120] sm:$0xff]  ;;  %v95_v50 = vld [vmem:[%s1039_s2 + $0x130] sm:$0xff] }
  0x1b   :  { %484 = vmatprep.subr.bf16.mxu0 %v483_v16  ;;  %v157_v51 = vld [vmem:[%s1039_s2 + $0x320] sm:$0xff]  ;;  %v495_v52 = vpack.c.bf16 %v160_v45, %v158_v44  ;;  %v159_v53 = vld [vmem:[%s1039_s2 + $0x330] sm:$0xff]  ;;  %v98_v54 = vld [vmem:[%s1039_s2 + $0x148] sm:$0xff]  ;;  %v433_v58 = vpack.c.bf16 %v95_v50, %v93_v49 }
  0x1c   :  { %v100_v55 = vld [vmem:[%s1039_s2 + $0x158] sm:$0xff]  ;;  %v162_v56 = vld [vmem:[%s1039_s2 + $0x348] sm:$0xff]  ;;  %v497_v59 = vpack.c.bf16 %v159_v53, %v157_v51  ;;  %v97_v61 = vld [vmem:[%s1039_s2 + $0x140] sm:$0xff] }
  0x1d   :  { %422 = vmatpush1.bf16.msra.mxu1 %v421_v22  ;;  %v164_v57 = vld [vmem:[%s1039_s2 + $0x358] sm:$0xff]  ;;  %v435_v60 = vpack.c.bf16 %v100_v55, %v98_v54  ;;  %v99_v62 = vld [vmem:[%s1039_s2 + $0x150] sm:$0xff]  ;;  %v161_v63 = vld [vmem:[%s1039_s2 + $0x340] sm:$0xff] }
  0x1e   :  { %486 = vmatpush1.bf16.msra.mxu0 %v485_v23  ;;  %424 = vmatprep.subr.bf16.mxu1 %v423_v24  ;;  %v499_v0 = vpack.c.bf16 %v164_v57, %v162_v56  ;;  %v163_v1 = vld [vmem:[%s1039_s2 + $0x350] sm:$0xff]  ;;  %v102_v2 = vld [vmem:[%s1039_s2 + $0x168] sm:$0xff]  ;;  %v104_v3 = vld [vmem:[%s1039_s2 + $0x178] sm:$0xff]  ;;  %v437_v6 = vpack.c.bf16 %v99_v62, %v97_v61 }
  0x1f   :  { %488 = vmatprep.subr.bf16.mxu0 %v487_v28  ;;  %v166_v4 = vld [vmem:[%s1039_s2 + $0x368] sm:$0xff]  ;;  %v168_v5 = vld [vmem:[%s1039_s2 + $0x378] sm:$0xff]  ;;  %v101_v7 = vld [vmem:[%s1039_s2 + $0x160] sm:$0xff]  ;;  %v501_v9 = vpack.c.bf16 %v163_v1, %v161_v63  ;;  %v439_v10 = vpack.c.bf16 %v104_v3, %v102_v2 }
  0x20   :  { %v103_v8 = vld [vmem:[%s1039_s2 + $0x170] sm:$0xff]  ;;  %v165_v11 = vld [vmem:[%s1039_s2 + $0x360] sm:$0xff]  ;;  %v106_v13 = vld [vmem:[%s1039_s2 + $0x188] sm:$0xff]  ;;  %v503_v14 = vpack.c.bf16 %v168_v5, %v166_v4 }
  0x21   :  { %426 = vmatpush1.bf16.msra.mxu1 %v425_v34  ;;  %v167_v12 = vld [vmem:[%s1039_s2 + $0x370] sm:$0xff]  ;;  %v108_v15 = vld [vmem:[%s1039_s2 + $0x198] sm:$0xff]  ;;  %v170_v16 = vld [vmem:[%s1039_s2 + $0x388] sm:$0xff]  ;;  %v441_v21 = vpack.c.bf16 %v103_v8, %v101_v7 }
  0x22   :  { %490 = vmatpush1.bf16.msra.mxu0 %v489_v35  ;;  %428 = vmatprep.subr.bf16.mxu1 %v427_v36  ;;  %v18_v17 = vld [vmem:[%s1040_s0 + $0x8] sm:$0xff]  ;;  %v172_v18 = vld [vmem:[%s1039_s2 + $0x398] sm:$0xff]  ;;  %v505_v24 = vpack.c.bf16 %v167_v12, %v165_v11  ;;  %v443_v25 = vpack.c.bf16 %v108_v15, %v106_v13  ;;  %v105_v26 = vld [vmem:[%s1039_s2 + $0x180] sm:$0xff] }
  0x23   :  { %492 = vmatprep.subr.bf16.mxu0 %v491_v40  ;;  %v26_v19 = vld [vmem:[%s1041_s1 + $0x8] sm:$0xff]  ;;  %v28_v20 = vld [vmem:[%s1041_s1 + $0x18] sm:$0xff]  ;;  %v107_v27 = vld [vmem:[%s1039_s2 + $0x190] sm:$0xff]  ;;  %v507_v29 = vpack.c.bf16 %v172_v18, %v170_v16 }
  0x24   :  { %v42_v22 = vmul.f32 %v26_v19, %v18_v17  ;;  %v50_v23 = vmul.f32 %v28_v20, %v18_v17  ;;  %v169_v28 = vld [vmem:[%s1039_s2 + $0x380] sm:$0xff]  ;;  %v171_v30 = vld [vmem:[%s1039_s2 + $0x390] sm:$0xff]  ;;  %v110_v31 = vld [vmem:[%s1039_s2 + $0x1a8] sm:$0xff]  ;;  %v445_v35 = vpack.c.bf16 %v107_v27, %v105_v26 }
  0x25   :  { %430 = vmatpush1.bf16.msra.mxu1 %v429_v46  ;;  %v112_v32 = vld [vmem:[%s1039_s2 + $0x1b8] sm:$0xff]  ;;  %v174_v33 = vld [vmem:[%s1039_s2 + $0x3a8] sm:$0xff]  ;;  %v509_v36 = vpack.c.bf16 %v171_v30, %v169_v28  ;;  %v109_v38 = vld [vmem:[%s1039_s2 + $0x1a0] sm:$0xff] }
  0x26   :  { %494 = vmatpush1.bf16.msra.mxu0 %v493_v47  ;;  %432 = vmatprep.subr.bf16.mxu1 %v431_v48  ;;  %v176_v34 = vld [vmem:[%s1039_s2 + $0x3b8] sm:$0xff]  ;;  %v447_v37 = vpack.c.bf16 %v112_v32, %v110_v31  ;;  %v111_v39 = vld [vmem:[%s1039_s2 + $0x1b0] sm:$0xff]  ;;  %v173_v40 = vld [vmem:[%s1039_s2 + $0x3a0] sm:$0xff] }
  0x27   :  { %496 = vmatprep.subr.bf16.mxu0 %v495_v52  ;;  %249 = vmatprep.mubr.f32.mxu1 %v42_v22  ;;  %v511_v41 = vpack.c.bf16 %v176_v34, %v174_v33  ;;  %v175_v42 = vld [vmem:[%s1039_s2 + $0x3b0] sm:$0xff]  ;;  %v114_v43 = vld [vmem:[%s1039_s2 + $0x1c8] sm:$0xff]  ;;  %v116_v44 = vld [vmem:[%s1039_s2 + $0x1d8] sm:$0xff]  ;;  %v449_v47 = vpack.c.bf16 %v111_v39, %v109_v38 }
  0x28   :  { %338 = vmatprep.mubr.f32.mxu0 %v50_v23  ;;  %v178_v45 = vld [vmem:[%s1039_s2 + $0x3c8] sm:$0xff]  ;;  %v180_v46 = vld [vmem:[%s1039_s2 + $0x3d8] sm:$0xff]  ;;  %v513_v48 = vpack.c.bf16 %v175_v42, %v173_v40  ;;  %v451_v49 = vpack.c.bf16 %v116_v44, %v114_v43  ;;  %v113_v50 = vld [vmem:[%s1039_s2 + $0x1c0] sm:$0xff]  ;;  %v365_v40 = vlaneseq }
  0x29   :  { %434 = vmatpush1.bf16.msra.mxu1 %v433_v58  ;;  %v115_v51 = vld [vmem:[%s1039_s2 + $0x1d0] sm:$0xff]  ;;  %v177_v52 = vld [vmem:[%s1039_s2 + $0x3c0] sm:$0xff]  ;;  %v515_v53 = vpack.c.bf16 %v180_v46, %v178_v45  ;;  %v118_v55 = vld [vmem:[%s1039_s2 + $0x1e8] sm:$0xff] }
  0x2a   :  { %498 = vmatpush1.bf16.msra.mxu0 %v497_v59  ;;  %436 = vmatprep.subr.bf16.mxu1 %v435_v60  ;;  %v179_v54 = vld [vmem:[%s1039_s2 + $0x3d0] sm:$0xff]  ;;  %v120_v56 = vld [vmem:[%s1039_s2 + $0x1f8] sm:$0xff]  ;;  %v182_v57 = vld [vmem:[%s1039_s2 + $0x3e8] sm:$0xff]  ;;  %v453_v59 = vpack.c.bf16 %v115_v51, %v113_v50 }
  0x2b   :  { %500 = vmatprep.subr.bf16.mxu0 %v499_v0  ;;  %v184_v58 = vld [vmem:[%s1039_s2 + $0x3f8] sm:$0xff]  ;;  %v517_v60 = vpack.c.bf16 %v179_v54, %v177_v52  ;;  %v455_v61 = vpack.c.bf16 %v120_v56, %v118_v55  ;;  %v117_v62 = vld [vmem:[%s1039_s2 + $0x1e0] sm:$0xff]  ;;  %v119_v63 = vld [vmem:[%s1039_s2 + $0x1f0] sm:$0xff] }
  0x2c   :  { %v519_v0 = vpack.c.bf16 %v184_v58, %v182_v57  ;;  %v181_v1 = vld [vmem:[%s1039_s2 + $0x3e0] sm:$0xff]  ;;  %v183_v2 = vld [vmem:[%s1039_s2 + $0x3f0] sm:$0xff]  ;;  %v457_v3 = vpack.c.bf16 %v119_v63, %v117_v62  ;;  %v20_v8 = vld [vmem:[%s1040_s0 + $0x18] sm:$0xff] }
  0x2d   :  { %438 = vmatpush1.bf16.msra.mxu1 %v437_v6  ;;  %v17_v4 = vld [vmem:[%s1040_s0] sm:$0xff]  ;;  %v521_v6 = vpack.c.bf16 %v183_v2, %v181_v1  ;;  %v27_v7 = vld [vmem:[%s1041_s1 + $0x10] sm:$0xff]  ;;  %v22_v18 = vld [vmem:[%s1040_s0 + $0x28] sm:$0xff] }
  0x2e   :  { %502 = vmatpush1.bf16.msra.mxu0 %v501_v9  ;;  %440 = vmatprep.subr.bf16.mxu1 %v439_v10  ;;  %v25_v5 = vld [vmem:[%s1041_s1] sm:$0xff]  ;;  %v30_v9 = vld [vmem:[%s1041_s1 + $0x28] sm:$0xff]  ;;  %v32_v10 = vld [vmem:[%s1041_s1 + $0x38] sm:$0xff]  ;;  %v49_v12 = vmul.f32 %v27_v7, %v17_v4 }
  0x2f   :  { %504 = vmatprep.subr.bf16.mxu0 %v503_v14  ;;  %v41_v11 = vmul.f32 %v25_v5, %v17_v4  ;;  %v44_v13 = vmul.f32 %v30_v9, %v20_v8  ;;  %v19_v14 = vld [vmem:[%s1040_s0 + $0x10] sm:$0xff]  ;;  %v29_v15 = vld [vmem:[%s1041_s1 + $0x20] sm:$0xff]  ;;  %v52_v16 = vmul.f32 %v32_v10, %v20_v8  ;;  %v34_v19 = vld [vmem:[%s1041_s1 + $0x48] sm:$0xff] }
  0x30   :  { %v31_v17 = vld [vmem:[%s1041_s1 + $0x30] sm:$0xff]  ;;  %v36_v20 = vld [vmem:[%s1041_s1 + $0x58] sm:$0xff]  ;;  %v46_v23 = vmul.f32 %v34_v19, %v22_v18  ;;  %v363_v43 = vld [vmem:[%s1042_s3] sm:$0x3] }
  0x31   :  { %442 = vmatpush1.bf16.msra.mxu1 %v441_v21  ;;  %v43_v21 = vmul.f32 %v29_v15, %v19_v14  ;;  %v51_v22 = vmul.f32 %v31_v17, %v19_v14  ;;  %v54_v26 = vmul.f32 %v36_v20, %v22_v18  ;;  %v35_v27 = vld [vmem:[%s1041_s1 + $0x50] sm:$0xff]  ;;  %v24_v28 = vld [vmem:[%s1040_s0 + $0x38] sm:$0xff] }
  0x32   :  { %506 = vmatpush1.bf16.msra.mxu0 %v505_v24  ;;  %444 = vmatprep.subr.bf16.mxu1 %v443_v25  ;;  %v21_v24 = vld [vmem:[%s1040_s0 + $0x20] sm:$0xff]  ;;  %v40_v30 = vld [vmem:[%s1041_s1 + $0x78] sm:$0xff]  ;;  %v23_v34 = vld [vmem:[%s1040_s0 + $0x30] sm:$0xff] }
  0x33   :  { %508 = vmatprep.subr.bf16.mxu0 %v507_v29  ;;  %v33_v25 = vld [vmem:[%s1041_s1 + $0x40] sm:$0xff]  ;;  %v38_v29 = vld [vmem:[%s1041_s1 + $0x68] sm:$0xff]  ;;  %v53_v32 = vmul.f32 %v35_v27, %v21_v24 }
  0x34   :  { %v45_v31 = vmul.f32 %v33_v25, %v21_v24  ;;  %v48_v33 = vmul.f32 %v38_v29, %v24_v28 }
  0x35   :  { %446 = vmatpush1.bf16.msra.mxu1 %v445_v35  ;;  %v37_v35 = vld [vmem:[%s1041_s1 + $0x60] sm:$0xff] }
  0x36   :  { %510 = vmatpush1.bf16.msra.mxu0 %v509_v36  ;;  %448 = vmatprep.subr.bf16.mxu1 %v447_v37  ;;  %v56_v36 = vmul.f32 %v40_v30, %v24_v28  ;;  %v39_v37 = vld [vmem:[%s1041_s1 + $0x70] sm:$0xff]  ;;  %v47_v38 = vmul.f32 %v37_v35, %v23_v34 }
  0x37   :  { %512 = vmatprep.subr.bf16.mxu0 %v511_v41  ;;  %v55_v39 = vmul.f32 %v39_v37, %v23_v34  ;;  %v366_v41 = vshrl.u32 %v365_v40, 7 }
  0x39   :  { %450 = vmatpush1.bf16.msra.mxu1 %v449_v47  ;;  %v367_v42 = vsub.s32 0, %v366_v41  ;;  %v371_v44 = vsub.s32 1, %v366_v41 }
  0x3a   :  { %514 = vmatpush1.bf16.msra.mxu0 %v513_v48  ;;  %452 = vmatprep.subr.bf16.mxu1 %v451_v49 }
  0x3b   :  { %516 = vmatprep.subr.bf16.mxu0 %v515_v53  ;;  %v368_v46 = vrot.slane %v363_v43, %v367_v42  ;;  %v372_v49 = vrot.slane %v363_v43, %v371_v44 }
  0x3d   :  { %454 = vmatpush1.bf16.msra.mxu1 %v453_v59 }
  0x3e   :  { %518 = vmatpush1.bf16.msra.mxu0 %v517_v60  ;;  %456 = vmatprep.subr.bf16.mxu1 %v455_v61 }
  0x3f   :  { %520 = vmatprep.subr.bf16.mxu0 %v519_v0 }
  0x41   :  { %458 = vmatpush1.bf16.msra.mxu1 %v457_v3 }
  0x42   :  { %522 = vmatpush1.bf16.msra.mxu0 %v521_v6 }
  0x44   :  { %250 = vmatmul.mubr.f32.vlgmr.msra.gmra.mrb[0].mxu1 %v41_v11 }
  0x45   :  { %339 = vmatmul.mubr.f32.vlgmr.msra.gmra.mrb[0].mxu0 %v49_v12  ;;  %255 = vmatprep.mubr.f32.mxu1 %v44_v13 }
  0x46   :  { %344 = vmatprep.mubr.f32.mxu0 %v52_v16 }
  0x48   :  { %256 = vmatmul.mubr.f32.gmra.mrb[2].mxu1 %v43_v21 }
  0x49   :  { %345 = vmatmul.mubr.f32.gmra.mrb[2].mxu0 %v51_v22  ;;  %261 = vmatprep.mubr.f32.mxu1 %v46_v23 }
  0x4a   :  { %350 = vmatprep.mubr.f32.mxu0 %v54_v26 }
  0x4c   :  { %262 = vmatmul.mubr.f32.gmra.mrb[4].mxu1 %v45_v31 }
  0x4d   :  { %351 = vmatmul.mubr.f32.gmra.mrb[4].mxu0 %v53_v32  ;;  %267 = vmatprep.mubr.f32.mxu1 %v48_v33 }
  0x4e   :  { %356 = vmatprep.mubr.f32.mxu0 %v56_v36 }
  0x50   :  { %268 = vmatmul.mubr.f32.gmra.mrb[6].mxu1 %v47_v38 }
  0x51   :  { %357 = vmatmul.mubr.f32.gmra.mrb[6].mxu0 %v55_v39 }
 0x117   :  { %v251_v45 = vpop.f32.mrb[0].mxu1 }
 0x118   :  { %v340_v47 = vpop.f32.mrb[0].mxu0  ;;  %v253_v48 = vpop.f32.mrb[1].mxu1 }
 0x119   :  { %v341_v50 = vadd.f32 %v340_v47, %v251_v45  ;;  %v342_v51 = vpop.f32.mrb[1].mxu0 }
 0x11a   :  { %v343_v52 = vadd.f32 %v342_v51, %v253_v48 }
 0x11b   :  { %v375_v53 = vmul.f32 %v368_v46, %v341_v50  ;;  %v257_v54 = vpop.f32.mrb[2].mxu1 }
 0x11c   :  { %v376_v55 = vmul.f32 %v372_v49, %v343_v52  ;;  %v346_v56 = vpop.f32.mrb[2].mxu0  ;;  %v259_v57 = vpop.f32.mrb[3].mxu1 }
 0x11d   :  { %383 = vst [vmem:[%s1043_s4] sm:$0xff] %v375_v53  ;;  %v347_v58 = vadd.f32 %v346_v56, %v257_v54  ;;  %v348_v59 = vpop.f32.mrb[3].mxu0 }
 0x11e   :  { %384 = vst [vmem:[%s1043_s4 + $0x8] sm:$0xff] %v376_v55  ;;  %v349_v60 = vadd.f32 %v348_v59, %v259_v57 }
 0x11f   :  { %v377_v61 = vmul.f32 %v368_v46, %v347_v58  ;;  %v263_v62 = vpop.f32.mrb[4].mxu1 }
 0x120   :  { %v378_v63 = vmul.f32 %v372_v49, %v349_v60  ;;  %v352_v0 = vpop.f32.mrb[4].mxu0  ;;  %v265_v1 = vpop.f32.mrb[5].mxu1 }
 0x121   :  { %385 = vst [vmem:[%s1043_s4 + $0x10] sm:$0xff] %v377_v61  ;;  %v353_v2 = vadd.f32 %v352_v0, %v263_v62  ;;  %v354_v3 = vpop.f32.mrb[5].mxu0 }
 0x122   :  { %386 = vst [vmem:[%s1043_s4 + $0x18] sm:$0xff] %v378_v63  ;;  %v355_v4 = vadd.f32 %v354_v3, %v265_v1 }
 0x123   :  { %v379_v5 = vmul.f32 %v368_v46, %v353_v2  ;;  %v269_v6 = vpop.f32.mrb[6].mxu1 }
 0x124   :  { %v380_v7 = vmul.f32 %v372_v49, %v355_v4  ;;  %v358_v8 = vpop.f32.mrb[6].mxu0  ;;  %v271_v9 = vpop.f32.mrb[7].mxu1 }
 0x125   :  { %387 = vst [vmem:[%s1043_s4 + $0x20] sm:$0xff] %v379_v5  ;;  %v359_v10 = vadd.f32 %v358_v8, %v269_v6  ;;  %v360_v11 = vpop.f32.mrb[7].mxu0 }
 0x126   :  { %388 = vst [vmem:[%s1043_s4 + $0x28] sm:$0xff] %v380_v7  ;;  %v361_v12 = vadd.f32 %v360_v11, %v271_v9 }
 0x127   :  { %v381_v13 = vmul.f32 %v368_v46, %v359_v10 }
 0x128   :  { %v382_v14 = vmul.f32 %v372_v49, %v361_v12 }
 0x129   :  { %389 = vst [vmem:[%s1043_s4 + $0x30] sm:$0xff] %v381_v13 }
 0x12a   :  { %390 = vst [vmem:[%s1043_s4 + $0x38] sm:$0xff] %v382_v14 }

// kernel: audio_reconstructor.4
= control target key start
LH: loop header
LB: loop body
LE: loop exit
PB: predicated region body
PF: predicated region fallthrough
CT: control target
= control target key end

     0   :  { %9 = vsyncpa [#allocation3], 0  ;;  %s4858_s0 = inlined_call_operand.hbm [shape: f32[32,512], index: 0, kind: input, shape index: {}]   ;;  %s4859_s1 = inlined_call_operand.hbm [shape: bf16[3,512,512], index: 1, kind: input, shape index: {}]   ;;  %s4860_s2 = inlined_call_operand.vmem [shape: f32[32,512], index: 2, kind: output, shape index: {0}]   ;;  %s4861_s3 = inlined_call_operand.vmem [shape: f32[1,2,512], index: 3, kind: output, shape index: {1}]  }
   0x1   :  { %10 = vsyncpa [#allocation5], 0  ;;  %s4511_s12 = smov [#allocation2]   ;;  %s4463_s16 = scalar_lea.hbm %s4858_s0, 2048 }
   0x2   :  { %s16_s13 = sshll.u32 %s4511_s12, 4  ;;  %p4464_p0 = scmp.ne.s32.totalorder %s4858_s0, %s4463_s16  ;;  %s17_s13 = int_to_ptr.vmem [resolvable:$true] %s16_s13 }
   0x3   :  { %p4467_p1 = scmp.lt.u32.totalorder %s4463_s16, %s4858_s0 }
   0x5   :  { %p4469_p2 = pnand %p4467_p1, %p4464_p0 }
   0x7   :  { %4472 = shalt.err (!%p4469_p2)
}
   0x8   :  { %s4473_s21 = scalar_lea.vmem %s17_s13, 2048  ;;  %p4478_p4 = scmp.lt.s32.totalorder %s17_s13, %s17_s13 }
   0x9   :  { %p4474_p3 = scmp.ne.s32.totalorder %s17_s13, %s4473_s21  ;;  %p4479_p5 = scmp.lt.s32.totalorder %s4473_s21, %s4473_s21 }
   0xb   :  { %p4480_p6 = por %p4479_p5, %p4478_p4 }
   0xd   :  { %p4481_p7 = pnand %p4480_p6, %p4474_p3 }
   0xf   :  { %4484 = shalt.err (!%p4481_p7)
}
  0x10   :  { %s4512_s22 = smov 512   ;;  %s4513_s23 = smov 32  }
  0x11   :  { %22 = dma.hbm_to_vmem [thread:$0]  %s4858_s0, 2048, %s17_s13, [#allocation3], %s4512_s22, %s4512_s22, %s4513_s23  }
  0x12   :  { %s4514_s26 = smov [#allocation4]   ;;  %s4485_s30 = scalar_lea.hbm %s4859_s1, 49152 }
  0x13   :  { %s28_s27 = sshll.u32 %s4514_s26, 4  ;;  %p4486_p8 = scmp.ne.s32.totalorder %s4859_s1, %s4485_s30  ;;  %s29_s27 = int_to_ptr.vmem [resolvable:$true] %s28_s27 }
  0x14   :  { %p4489_p9 = scmp.lt.u32.totalorder %s4485_s30, %s4859_s1 }
  0x16   :  { %p4491_p10 = pnand %p4489_p9, %p4486_p8 }
  0x18   :  { %4494 = shalt.err (!%p4491_p10)
}
  0x19   :  { %s4495_s8 = scalar_lea.vmem %s29_s27, 49152  ;;  %p4500_p12 = scmp.lt.s32.totalorder %s29_s27, %s29_s27 }
  0x1a   :  { %p4496_p11 = scmp.ne.s32.totalorder %s29_s27, %s4495_s8  ;;  %p4501_p13 = scmp.lt.s32.totalorder %s4495_s8, %s4495_s8 }
  0x1c   :  { %p4502_p0 = por %p4501_p13, %p4500_p12 }
  0x1e   :  { %p4503_p1 = pnand %p4502_p0, %p4496_p11 }
  0x20   :  { %4506 = shalt.err (!%p4503_p1)
}
  0x21   :  { %s4515_s0 = smov 256   ;;  %s4516_s9 = smov 16  }
  0x22   :  { %34 = dma.hbm_to_vmem [thread:$0]  %s4859_s1, 49152, %s29_s27, [#allocation5], %s4515_s0, %s4515_s0, %s4516_s9  }
  0x23   :  { %4507 = dma.done.wait [#allocation3], 2048  }
  0x24   :  { %4508 = vsyncadd [#allocation3], 4294965248 }
  0x25   :  { %4509 = dma.done.wait [#allocation5], 49152  }
  0x26   :  { %4510 = vsyncadd [#allocation5], 4294918144  ;;  %v3879_v0 = vld [vmem:[#allocation4 + $0x404] ss:$16 sps:$4 sm:$0xff]   ;;  %v3881_v1 = vld [vmem:[#allocation4 + $0x40c] ss:$16 sps:$4 sm:$0xff]   ;;  %v171_v63 = vlaneseq }
  0x27   :  { %1193 = vmatprep.subr.bf16.mxu0 %v3879_v0  ;;  %v3883_v2 = vld [vmem:[#allocation4 + $0x400] ss:$16 sps:$4 sm:$0xff]   ;;  %v3884_v3 = vld [vmem:[#allocation4 + $0x408] ss:$16 sps:$4 sm:$0xff]   ;;  %1299 = vmatprep.subr.bf16.mxu1 %v3881_v1  ;;  %v3885_v4 = vld [vmem:[#allocation4 + $0x424] ss:$16 sps:$4 sm:$0xff]  }
  0x28   :  { %1194 = vmatpush1.bf16.msra.mxu0 %v3883_v2  ;;  %1300 = vmatpush1.bf16.msra.mxu1 %v3884_v3  ;;  %v3887_v5 = vld [vmem:[#allocation4 + $0x42c] ss:$16 sps:$4 sm:$0xff]   ;;  %v3889_v6 = vld [vmem:[#allocation4 + $0x420] ss:$16 sps:$4 sm:$0xff]   ;;  %v3890_v7 = vld [vmem:[#allocation4 + $0x428] ss:$16 sps:$4 sm:$0xff]  }
  0x29   :  { %1195 = vmatprep.subr.bf16.mxu0 %v3885_v4  ;;  %1301 = vmatprep.subr.bf16.mxu1 %v3887_v5  ;;  %v3891_v8 = vld [vmem:[#allocation4 + $0x444] ss:$16 sps:$4 sm:$0xff]   ;;  %v3893_v9 = vld [vmem:[#allocation4 + $0x44c] ss:$16 sps:$4 sm:$0xff]   ;;  %v3895_v10 = vld [vmem:[#allocation4 + $0x440] ss:$16 sps:$4 sm:$0xff]  }
  0x2a   :  { %v3896_v11 = vld [vmem:[#allocation4 + $0x448] ss:$16 sps:$4 sm:$0xff]   ;;  %v3897_v12 = vld [vmem:[#allocation4 + $0x464] ss:$16 sps:$4 sm:$0xff]   ;;  %v3899_v13 = vld [vmem:[#allocation4 + $0x46c] ss:$16 sps:$4 sm:$0xff]  }
  0x2b   :  { %v3901_v14 = vld [vmem:[#allocation4 + $0x460] ss:$16 sps:$4 sm:$0xff]   ;;  %v3902_v15 = vld [vmem:[#allocation4 + $0x468] ss:$16 sps:$4 sm:$0xff]   ;;  %v3903_v16 = vld [vmem:[#allocation4 + $0x484] ss:$16 sps:$4 sm:$0xff]  }
  0x2c   :  { %1196 = vmatpush1.bf16.msra.mxu0 %v3889_v6  ;;  %1302 = vmatpush1.bf16.msra.mxu1 %v3890_v7  ;;  %v3905_v17 = vld [vmem:[#allocation4 + $0x48c] ss:$16 sps:$4 sm:$0xff]   ;;  %v3907_v18 = vld [vmem:[#allocation4 + $0x480] ss:$16 sps:$4 sm:$0xff]   ;;  %v3908_v19 = vld [vmem:[#allocation4 + $0x488] ss:$16 sps:$4 sm:$0xff]  }
  0x2d   :  { %1197 = vmatprep.subr.bf16.mxu0 %v3891_v8  ;;  %1303 = vmatprep.subr.bf16.mxu1 %v3893_v9  ;;  %v3909_v20 = vld [vmem:[#allocation4 + $0x4a4] ss:$16 sps:$4 sm:$0xff]   ;;  %v3911_v21 = vld [vmem:[#allocation4 + $0x4ac] ss:$16 sps:$4 sm:$0xff]   ;;  %v3913_v22 = vld [vmem:[#allocation4 + $0x4a0] ss:$16 sps:$4 sm:$0xff]  }
  0x2e   :  { %v3914_v23 = vld [vmem:[#allocation4 + $0x4a8] ss:$16 sps:$4 sm:$0xff]   ;;  %v3915_v24 = vld [vmem:[#allocation4 + $0x4c4] ss:$16 sps:$4 sm:$0xff]   ;;  %v3917_v25 = vld [vmem:[#allocation4 + $0x4cc] ss:$16 sps:$4 sm:$0xff]  }
  0x2f   :  { %v3919_v26 = vld [vmem:[#allocation4 + $0x4c0] ss:$16 sps:$4 sm:$0xff]   ;;  %v3920_v27 = vld [vmem:[#allocation4 + $0x4c8] ss:$16 sps:$4 sm:$0xff]   ;;  %v3921_v28 = vld [vmem:[#allocation4 + $0x4e4] ss:$16 sps:$4 sm:$0xff]  }
  0x30   :  { %1198 = vmatpush1.bf16.msra.mxu0 %v3895_v10  ;;  %1304 = vmatpush1.bf16.msra.mxu1 %v3896_v11  ;;  %v3923_v29 = vld [vmem:[#allocation4 + $0x4ec] ss:$16 sps:$4 sm:$0xff]   ;;  %v3925_v30 = vld [vmem:[#allocation4 + $0x4e0] ss:$16 sps:$4 sm:$0xff]   ;;  %v3926_v31 = vld [vmem:[#allocation4 + $0x4e8] ss:$16 sps:$4 sm:$0xff]  }
  0x31   :  { %1199 = vmatprep.subr.bf16.mxu0 %v3897_v12  ;;  %1305 = vmatprep.subr.bf16.mxu1 %v3899_v13  ;;  %v3927_v32 = vld [vmem:[#allocation4 + $0x504] ss:$16 sps:$4 sm:$0xff]   ;;  %v3929_v33 = vld [vmem:[#allocation4 + $0x50c] ss:$16 sps:$4 sm:$0xff]   ;;  %v3931_v34 = vld [vmem:[#allocation4 + $0x500] ss:$16 sps:$4 sm:$0xff]  }
  0x32   :  { %v3932_v35 = vld [vmem:[#allocation4 + $0x508] ss:$16 sps:$4 sm:$0xff]   ;;  %v3933_v36 = vld [vmem:[#allocation4 + $0x524] ss:$16 sps:$4 sm:$0xff]   ;;  %v3935_v37 = vld [vmem:[#allocation4 + $0x52c] ss:$16 sps:$4 sm:$0xff]  }
  0x33   :  { %v3937_v38 = vld [vmem:[#allocation4 + $0x520] ss:$16 sps:$4 sm:$0xff]   ;;  %v3938_v39 = vld [vmem:[#allocation4 + $0x528] ss:$16 sps:$4 sm:$0xff]   ;;  %v3939_v40 = vld [vmem:[#allocation4 + $0x544] ss:$16 sps:$4 sm:$0xff]  }
  0x34   :  { %1200 = vmatpush1.bf16.msra.mxu0 %v3901_v14  ;;  %1306 = vmatpush1.bf16.msra.mxu1 %v3902_v15  ;;  %v3941_v41 = vld [vmem:[#allocation4 + $0x54c] ss:$16 sps:$4 sm:$0xff]   ;;  %v3943_v42 = vld [vmem:[#allocation4 + $0x540] ss:$16 sps:$4 sm:$0xff]   ;;  %v3944_v43 = vld [vmem:[#allocation4 + $0x548] ss:$16 sps:$4 sm:$0xff]  }
  0x35   :  { %1201 = vmatprep.subr.bf16.mxu0 %v3903_v16  ;;  %1307 = vmatprep.subr.bf16.mxu1 %v3905_v17  ;;  %v3945_v44 = vld [vmem:[#allocation4 + $0x564] ss:$16 sps:$4 sm:$0xff]   ;;  %v3947_v45 = vld [vmem:[#allocation4 + $0x56c] ss:$16 sps:$4 sm:$0xff]   ;;  %v3949_v48 = vld [vmem:[#allocation4 + $0x560] ss:$16 sps:$4 sm:$0xff]  }
  0x36   :  { %v4563_v46 = vld [vmem:[#allocation2 + $0x8] sm:$0xff]  ;;  %v3951_v50 = vld [vmem:[#allocation4 + $0x584] ss:$16 sps:$4 sm:$0xff]   ;;  %v3955_v53 = vld [vmem:[#allocation4 + $0x580] ss:$16 sps:$4 sm:$0xff]   ;;  %v4569_v4 = vshrl.u32 %v171_v63, 7 }
  0x37   :  { %v4565_v47 = vld [vmem:[#allocation2 + $0x28] sm:$0xff]  ;;  %v3957_v55 = vld [vmem:[#allocation4 + $0x5a4] ss:$16 sps:$4 sm:$0xff]   ;;  %v3961_v57 = vld [vmem:[#allocation4 + $0x5a0] ss:$16 sps:$4 sm:$0xff]   ;;  %v75_v6 = vrot.slane %v4563_v46, 7 }
  0x38   :  { %1202 = vmatpush1.bf16.msra.mxu0 %v3907_v18  ;;  %1308 = vmatpush1.bf16.msra.mxu1 %v3908_v19  ;;  %v3950_v49 = vld [vmem:[#allocation4 + $0x568] ss:$16 sps:$4 sm:$0xff]   ;;  %v417_v51 = vpack.c.bf16 %v4565_v47, %v4563_v46  ;;  %v3953_v52 = vld [vmem:[#allocation4 + $0x58c] ss:$16 sps:$4 sm:$0xff]   ;;  %v3963_v59 = vld [vmem:[#allocation4 + $0x5c4] ss:$16 sps:$4 sm:$0xff]  }
  0x39   :  { %1203 = vmatprep.subr.bf16.mxu0 %v3909_v20  ;;  %1309 = vmatprep.subr.bf16.mxu1 %v3911_v21  ;;  %v3956_v54 = vld [vmem:[#allocation4 + $0x588] ss:$16 sps:$4 sm:$0xff]   ;;  %v3959_v56 = vld [vmem:[#allocation4 + $0x5ac] ss:$16 sps:$4 sm:$0xff]   ;;  %v3967_v61 = vld [vmem:[#allocation4 + $0x5c0] ss:$16 sps:$4 sm:$0xff]  }
  0x3a   :  { %1225 = vmatprep.mubr.bf16.mxu0 %v417_v51  ;;  %1331 = vmatprep.mubr.bf16.mxu1 %v417_v51  ;;  %v3962_v58 = vld [vmem:[#allocation4 + $0x5a8] ss:$16 sps:$4 sm:$0xff]   ;;  %v3965_v60 = vld [vmem:[#allocation4 + $0x5cc] ss:$16 sps:$4 sm:$0xff]   ;;  %v3969_v0 = vld [vmem:[#allocation4 + $0x5e4] ss:$16 sps:$4 sm:$0xff]  }
  0x3b   :  { %v3968_v62 = vld [vmem:[#allocation4 + $0x5c8] ss:$16 sps:$4 sm:$0xff]   ;;  %v41_v1 = vld [vmem:[#allocation2] sm:$0xff]  ;;  %v3971_v2 = vld [vmem:[#allocation4 + $0x5ec] ss:$16 sps:$4 sm:$0xff]   ;;  %vm73_vm0 = vcmask 1040384  }
  0x3c   :  { %1204 = vmatpush1.bf16.msra.mxu0 %v3913_v22  ;;  %1310 = vmatpush1.bf16.msra.mxu1 %v3914_v23  ;;  %v74_v3 = vrot.slane %v41_v1, 7  ;;  %v3973_v5 = vld [vmem:[#allocation4 + $0x5e0] ss:$16 sps:$4 sm:$0xff]   ;;  %v3974_v7 = vld [vmem:[#allocation4 + $0x5e8] ss:$16 sps:$4 sm:$0xff]   ;;  %v180_v8 = vand.u32 15, %v4569_v4 }
  0x3d   :  { %1205 = vmatprep.subr.bf16.mxu0 %v3915_v24  ;;  %1311 = vmatprep.subr.bf16.mxu1 %v3917_v25  ;;  %v80_v9 = vrot.slane %v4565_v47, 7  ;;  %v3977_v10 = vld [vmem:[#allocation4 + $0x604] ss:$16 sps:$4 sm:$0xff]   ;;  %v3980_v12 = vld [vmem:[#allocation4 + $0x60c] ss:$16 sps:$4 sm:$0xff]   ;;  %v119_v15 = vsel %vm73_vm0, 0.0, %v75_v6 }
  0x3e   :  { %v4574_v11 = vld [vmem:[#allocation2 + $0x20] sm:$0xff]  ;;  %v118_v14 = vsel %vm73_vm0, 0.0, %v74_v3  ;;  %vm224_vm1 = vcmp.ne.s32.totalorder %v180_v8, 0  ;;  %v4517_v17 = vmov 0.0   ;;  %v3978_v20 = vld [vmem:[#allocation4 + $0x608] ss:$16 sps:$4 sm:$0xff]  }
  0x3f   :  { %v78_v13 = vrot.slane %v4574_v11, 7  ;;  %v416_v16 = vpack.c.bf16 %v4574_v11, %v41_v1  ;;  %v4581_v18 = vsel %vm224_vm1, 1.0, %v4517_v17  ;;  %v3975_v19 = vld [vmem:[#allocation4 + $0x600] ss:$16 sps:$4 sm:$0xff]   ;;  %v81_v21 = vsel %vm73_vm0, %v75_v6, %v80_v9  ;;  %v3983_v24 = vld [vmem:[#allocation4 + $0x624] ss:$16 sps:$4 sm:$0xff]  }
  0x40   :  { %1206 = vmatpush1.bf16.msra.mxu0 %v3919_v26  ;;  %1312 = vmatpush1.bf16.msra.mxu1 %v3920_v27  ;;  %v249_v22 = vmul.f32 %v4581_v18, %v119_v15  ;;  %v248_v23 = vmul.f32 %v4581_v18, %v118_v14  ;;  %v3986_v25 = vld [vmem:[#allocation4 + $0x62c] ss:$16 sps:$4 sm:$0xff]   ;;  %vm122_vm2 = vcmask 1046528   ;;  %v4026_v8 = vld [vmem:[#allocation4 + $0x708] ss:$16 sps:$4 sm:$0xff]  }
  0x41   :  { %1207 = vmatprep.subr.bf16.mxu0 %v3921_v28  ;;  %1313 = vmatprep.subr.bf16.mxu1 %v3923_v29  ;;  %v79_v26 = vsel %vm73_vm0, %v74_v3, %v78_v13  ;;  %v3981_v29 = vld [vmem:[#allocation4 + $0x620] ss:$16 sps:$4 sm:$0xff]   ;;  %v4597_v46 = vld [vmem:[#allocation2 + $0x68] sm:$0xff]  ;;  %v4616_v63 = vld [vmem:[#allocation2 + $0x18] sm:$0xff] }
  0x42   :  { %v4591_v27 = vpack.c.bf16 %v81_v21, %v249_v22  ;;  %v4593_v28 = vpack.c.bf16 %v79_v26, %v248_v23  ;;  %v4020_v3 = vld [vmem:[#allocation4 + $0x6e8] ss:$16 sps:$4 sm:$0xff]   ;;  %v4028_v6 = vld [vmem:[#allocation4 + $0x70c] ss:$16 sps:$4 sm:$0xff]   ;;  %v4029_v14 = vld [vmem:[#allocation4 + $0x720] ss:$16 sps:$4 sm:$0xff]  }
  0x43   :  { %v4032_v15 = vld [vmem:[#allocation4 + $0x728] ss:$16 sps:$4 sm:$0xff]   ;;  %v4043_v22 = vld [vmem:[#allocation4 + $0x764] ss:$16 sps:$4 sm:$0xff]   ;;  %v4046_v23 = vld [vmem:[#allocation4 + $0x76c] ss:$16 sps:$4 sm:$0xff]  }
  0x44   :  { %1208 = vmatpush1.bf16.msra.mxu0 %v3925_v30  ;;  %1314 = vmatpush1.bf16.msra.mxu1 %v3926_v31  ;;  %v3984_v30 = vld [vmem:[#allocation4 + $0x628] ss:$16 sps:$4 sm:$0xff]   ;;  %v3989_v31 = vld [vmem:[#allocation4 + $0x644] ss:$16 sps:$4 sm:$0xff]  }
  0x45   :  { %1209 = vmatprep.subr.bf16.mxu0 %v3927_v32  ;;  %1315 = vmatprep.subr.bf16.mxu1 %v3929_v33  ;;  %v3992_v32 = vld [vmem:[#allocation4 + $0x64c] ss:$16 sps:$4 sm:$0xff]   ;;  %v3987_v33 = vld [vmem:[#allocation4 + $0x640] ss:$16 sps:$4 sm:$0xff]   ;;  %v4038_v21 = vld [vmem:[#allocation4 + $0x748] ss:$16 sps:$4 sm:$0xff]  }
  0x46   :  { %v4049_v26 = vld [vmem:[#allocation4 + $0x784] ss:$16 sps:$4 sm:$0xff]  }
  0x47   :  { %v4067_v47 = vld [vmem:[#allocation4 + $0x7e4] ss:$16 sps:$4 sm:$0xff]  }
  0x48   :  { %1210 = vmatpush1.bf16.msra.mxu0 %v3931_v34  ;;  %1316 = vmatpush1.bf16.msra.mxu1 %v3932_v35  ;;  %v3990_v34 = vld [vmem:[#allocation4 + $0x648] ss:$16 sps:$4 sm:$0xff]   ;;  %v3995_v35 = vld [vmem:[#allocation4 + $0x664] ss:$16 sps:$4 sm:$0xff]  }
  0x49   :  { %1211 = vmatprep.subr.bf16.mxu0 %v3933_v36  ;;  %1317 = vmatprep.subr.bf16.mxu1 %v3935_v37  ;;  %v3998_v36 = vld [vmem:[#allocation4 + $0x66c] ss:$16 sps:$4 sm:$0xff]   ;;  %v3993_v37 = vld [vmem:[#allocation4 + $0x660] ss:$16 sps:$4 sm:$0xff]  }
  0x4c   :  { %1212 = vmatpush1.bf16.msra.mxu0 %v3937_v38  ;;  %1318 = vmatpush1.bf16.msra.mxu1 %v3938_v39  ;;  %v3996_v38 = vld [vmem:[#allocation4 + $0x668] ss:$16 sps:$4 sm:$0xff]   ;;  %v4001_v39 = vld [vmem:[#allocation4 + $0x684] ss:$16 sps:$4 sm:$0xff]  }
  0x4d   :  { %1213 = vmatprep.subr.bf16.mxu0 %v3939_v40  ;;  %1319 = vmatprep.subr.bf16.mxu1 %v3941_v41  ;;  %v4004_v40 = vld [vmem:[#allocation4 + $0x68c] ss:$16 sps:$4 sm:$0xff]   ;;  %v3999_v41 = vld [vmem:[#allocation4 + $0x680] ss:$16 sps:$4 sm:$0xff]  }
  0x50   :  { %1214 = vmatpush1.bf16.msra.mxu0 %v3943_v42  ;;  %1320 = vmatpush1.bf16.msra.mxu1 %v3944_v43  ;;  %v4002_v42 = vld [vmem:[#allocation4 + $0x688] ss:$16 sps:$4 sm:$0xff]   ;;  %v4007_v43 = vld [vmem:[#allocation4 + $0x6a4] ss:$16 sps:$4 sm:$0xff]  }
  0x51   :  { %1215 = vmatprep.subr.bf16.mxu0 %v3945_v44  ;;  %1321 = vmatprep.subr.bf16.mxu1 %v3947_v45  ;;  %v4010_v44 = vld [vmem:[#allocation4 + $0x6ac] ss:$16 sps:$4 sm:$0xff]  }
  0x52   :  { %v4595_v45 = vld [vmem:[#allocation2 + $0x48] sm:$0xff] }
  0x53   :  { %v421_v51 = vpack.c.bf16 %v4597_v46, %v4595_v45 }
  0x54   :  { %1216 = vmatpush1.bf16.msra.mxu0 %v3949_v48  ;;  %1322 = vmatpush1.bf16.msra.mxu1 %v3950_v49  ;;  %v124_v48 = vrot.slane %v4574_v11, 1  ;;  %v4005_v49 = vld [vmem:[#allocation4 + $0x6a0] ss:$16 sps:$4 sm:$0xff]  }
  0x55   :  { %1217 = vmatprep.subr.bf16.mxu0 %v3951_v50  ;;  %1323 = vmatprep.subr.bf16.mxu1 %v3953_v52  ;;  %v4008_v50 = vld [vmem:[#allocation4 + $0x6a8] ss:$16 sps:$4 sm:$0xff]   ;;  %v4013_v52 = vld [vmem:[#allocation4 + $0x6c4] ss:$16 sps:$4 sm:$0xff]   ;;  %v4179_v11 = vld [vmem:[#allocation4 + $0x240] ss:$16 sps:$4 sm:$0xff]  }
  0x58   :  { %1218 = vmatpush1.bf16.msra.mxu0 %v3955_v53  ;;  %1324 = vmatpush1.bf16.msra.mxu1 %v3956_v54  ;;  %v4016_v53 = vld [vmem:[#allocation4 + $0x6cc] ss:$16 sps:$4 sm:$0xff]   ;;  %v4602_v54 = vld [vmem:[#allocation2 + $0x40] sm:$0xff] }
  0x59   :  { %1219 = vmatprep.subr.bf16.mxu0 %v3957_v55  ;;  %1325 = vmatprep.subr.bf16.mxu1 %v3959_v56  ;;  %v4604_v55 = vld [vmem:[#allocation2 + $0x60] sm:$0xff]  ;;  %v135_v56 = vrot.slane %v4602_v54, 1 }
  0x5c   :  { %1220 = vmatpush1.bf16.msra.mxu0 %v3961_v57  ;;  %1326 = vmatpush1.bf16.msra.mxu1 %v3962_v58  ;;  %v4011_v57 = vld [vmem:[#allocation4 + $0x6c0] ss:$16 sps:$4 sm:$0xff]   ;;  %v4014_v58 = vld [vmem:[#allocation4 + $0x6c8] ss:$16 sps:$4 sm:$0xff]  }
  0x5d   :  { %1221 = vmatprep.subr.bf16.mxu0 %v3963_v59  ;;  %1327 = vmatprep.subr.bf16.mxu1 %v3965_v60  ;;  %v420_v59 = vpack.c.bf16 %v4604_v55, %v4602_v54  ;;  %v4019_v60 = vld [vmem:[#allocation4 + $0x6e4] ss:$16 sps:$4 sm:$0xff]  }
  0x60   :  { %1222 = vmatpush1.bf16.msra.mxu0 %v3967_v61  ;;  %1328 = vmatpush1.bf16.msra.mxu1 %v3968_v62  ;;  %v4614_v61 = vsel %vm122_vm2, %v124_v48, %v135_v56  ;;  %v4022_v62 = vld [vmem:[#allocation4 + $0x6ec] ss:$16 sps:$4 sm:$0xff]  }
  0x61   :  { %1223 = vmatprep.subr.bf16.mxu0 %v3969_v0  ;;  %1329 = vmatprep.subr.bf16.mxu1 %v3971_v2  ;;  %v4618_v0 = vld [vmem:[#allocation2 + $0x38] sm:$0xff]  ;;  %v4017_v2 = vld [vmem:[#allocation4 + $0x6e0] ss:$16 sps:$4 sm:$0xff]  }
  0x62   :  { %v419_v1 = vpack.c.bf16 %v4618_v0, %v4616_v63 }
  0x64   :  { %1224 = vmatpush1.bf16.msra.mxu0 %v3973_v5  ;;  %1330 = vmatpush1.bf16.msra.mxu1 %v3974_v7  ;;  %v4025_v5 = vld [vmem:[#allocation4 + $0x704] ss:$16 sps:$4 sm:$0xff]   ;;  %v4023_v7 = vld [vmem:[#allocation4 + $0x700] ss:$16 sps:$4 sm:$0xff]  }
  0x65   :  { %1246 = vmatprep.subr.bf16.mxu0 %v3977_v10  ;;  %1352 = vmatprep.subr.bf16.mxu1 %v3980_v12  ;;  %v4031_v10 = vld [vmem:[#allocation4 + $0x724] ss:$16 sps:$4 sm:$0xff]   ;;  %v4034_v12 = vld [vmem:[#allocation4 + $0x72c] ss:$16 sps:$4 sm:$0xff]  }
  0x67   :  { %1226 = vmatmul.mubr.bf16.vlgmr.msra.gmra.mrb[0].mxu0 %v416_v16  ;;  %1332 = vmatmul.mubr.bf16.vlgmr.msra.gmra.mrb[0].mxu1 %v416_v16  ;;  %v4037_v16 = vld [vmem:[#allocation4 + $0x744] ss:$16 sps:$4 sm:$0xff]  }
  0x68   :  { %1247 = vmatpush1.bf16.msra.mxu0 %v3975_v19  ;;  %1353 = vmatpush1.bf16.msra.mxu1 %v3978_v20  ;;  %v4040_v19 = vld [vmem:[#allocation4 + $0x74c] ss:$16 sps:$4 sm:$0xff]   ;;  %v4035_v20 = vld [vmem:[#allocation4 + $0x740] ss:$16 sps:$4 sm:$0xff]  }
  0x69   :  { %1248 = vmatprep.subr.bf16.mxu0 %v3983_v24  ;;  %1354 = vmatprep.subr.bf16.mxu1 %v3986_v25  ;;  %v4041_v24 = vld [vmem:[#allocation4 + $0x760] ss:$16 sps:$4 sm:$0xff]   ;;  %v4044_v25 = vld [vmem:[#allocation4 + $0x768] ss:$16 sps:$4 sm:$0xff]  }
  0x6a   :  { %1235 = vmatprep.mubr.bf16.mxu0 %v421_v51  ;;  %1341 = vmatprep.mubr.bf16.mxu1 %v421_v51  ;;  %v4059_v51 = vld [vmem:[#allocation4 + $0x7c0] ss:$16 sps:$4 sm:$0xff]  }
  0x6c   :  { %1249 = vmatpush1.bf16.msra.mxu0 %v3981_v29  ;;  %1355 = vmatpush1.bf16.msra.mxu1 %v3984_v30  ;;  %v4052_v29 = vld [vmem:[#allocation4 + $0x78c] ss:$16 sps:$4 sm:$0xff]   ;;  %v4047_v30 = vld [vmem:[#allocation4 + $0x780] ss:$16 sps:$4 sm:$0xff]  }
  0x6d   :  { %1250 = vmatprep.subr.bf16.mxu0 %v3989_v31  ;;  %1356 = vmatprep.subr.bf16.mxu1 %v3992_v32  ;;  %v4050_v31 = vld [vmem:[#allocation4 + $0x788] ss:$16 sps:$4 sm:$0xff]   ;;  %v4055_v32 = vld [vmem:[#allocation4 + $0x7a4] ss:$16 sps:$4 sm:$0xff]  }
  0x6f   :  { %1236 = vmatmul.mubr.bf16.gmra.mrb[4].mxu0 %v420_v59  ;;  %1342 = vmatmul.mubr.bf16.gmra.mrb[4].mxu1 %v420_v59  ;;  %v77_v59 = vrot.slane %v4616_v63, 7 }
  0x70   :  { %1251 = vmatpush1.bf16.msra.mxu0 %v3987_v33  ;;  %1357 = vmatpush1.bf16.msra.mxu1 %v3990_v34  ;;  %v4058_v33 = vld [vmem:[#allocation4 + $0x7ac] ss:$16 sps:$4 sm:$0xff]   ;;  %v174_v34 = vadd.s32 16, %v4569_v4 }
  0x71   :  { %1252 = vmatprep.subr.bf16.mxu0 %v3995_v35  ;;  %1358 = vmatprep.subr.bf16.mxu1 %v3998_v36  ;;  %v88_v35 = vrot.slane %v4595_v45, 7  ;;  %v4053_v36 = vld [vmem:[#allocation4 + $0x7a0] ss:$16 sps:$4 sm:$0xff]   ;;  %v121_v63 = vsel %vm73_vm0, 0.0, %v77_v59 }
  0x72   :  { %1278 = vmatprep.mubr.bf16.mxu0 %v419_v1  ;;  %1384 = vmatprep.mubr.bf16.mxu1 %v419_v1 }
  0x74   :  { %1253 = vmatpush1.bf16.msra.mxu0 %v3993_v37  ;;  %1359 = vmatpush1.bf16.msra.mxu1 %v3996_v38  ;;  %v86_v37 = vrot.slane %v4602_v54, 7  ;;  %v194_v38 = vand.u32 15, %v174_v34  ;;  %v4671_v34 = vld [vmem:[#allocation2 + $0x50] sm:$0xff] }
  0x75   :  { %1254 = vmatprep.subr.bf16.mxu0 %v4001_v39  ;;  %1360 = vmatprep.subr.bf16.mxu1 %v4004_v40  ;;  %v4056_v39 = vld [vmem:[#allocation4 + $0x7a8] ss:$16 sps:$4 sm:$0xff]   ;;  %v96_v40 = vrot.slane %v4597_v46, 7  ;;  %v4265_v54 = vld [vmem:[#allocation4 + $0x804] ss:$16 sps:$4 sm:$0xff]  }
  0x76   :  { %vm226_vm3 = vcmp.ne.s32.totalorder %v194_v38, 0  ;;  %v87_v46 = vsel %vm73_vm0, %v78_v13, %v86_v37  ;;  %v4083_v38 = vld [vmem:[#allocation4 + $0x40] ss:$16 sps:$4 sm:$0xff]  }
  0x78   :  { %1255 = vmatpush1.bf16.msra.mxu0 %v3999_v41  ;;  %1361 = vmatpush1.bf16.msra.mxu1 %v4002_v42  ;;  %v4061_v41 = vld [vmem:[#allocation4 + $0x7c4] ss:$16 sps:$4 sm:$0xff]   ;;  %v4064_v42 = vld [vmem:[#allocation4 + $0x7cc] ss:$16 sps:$4 sm:$0xff]  }
  0x79   :  { %1256 = vmatprep.subr.bf16.mxu0 %v4007_v43  ;;  %1362 = vmatprep.subr.bf16.mxu1 %v4010_v44  ;;  %v94_v43 = vrot.slane %v4604_v55, 7  ;;  %v89_v44 = vsel %vm73_vm0, %v80_v9, %v88_v35  ;;  %v4070_v9 = vld [vmem:[#allocation4 + $0x7ec] ss:$16 sps:$4 sm:$0xff]  }
  0x7c   :  { %1257 = vmatpush1.bf16.msra.mxu0 %v4005_v49  ;;  %1363 = vmatpush1.bf16.msra.mxu1 %v4008_v50  ;;  %v4631_v49 = vsel %vm226_vm3, 1.0, %v4517_v17 }
  0x7d   :  { %1258 = vmatprep.subr.bf16.mxu0 %v4013_v52  ;;  %1364 = vmatprep.subr.bf16.mxu1 %v4016_v53  ;;  %v257_v50 = vmul.f32 %v4631_v49, %v89_v44  ;;  %v4062_v52 = vld [vmem:[#allocation4 + $0x7c8] ss:$16 sps:$4 sm:$0xff]   ;;  %v97_v53 = vsel %vm73_vm0, %v88_v35, %v96_v40  ;;  %v256_v55 = vmul.f32 %v4631_v49, %v87_v46  ;;  %v4673_v35 = vld [vmem:[#allocation2 + $0x70] sm:$0xff] }
  0x7e   :  { %v4089_v44 = vld [vmem:[#allocation4 + $0x60] ss:$16 sps:$4 sm:$0xff]   ;;  %v4097_v46 = vld [vmem:[#allocation4 + $0x84] ss:$16 sps:$4 sm:$0xff]  }
  0x80   :  { %1259 = vmatpush1.bf16.msra.mxu0 %v4011_v57  ;;  %1365 = vmatpush1.bf16.msra.mxu1 %v4014_v58  ;;  %v4639_v57 = vpack.c.bf16 %v97_v53, %v257_v50  ;;  %v95_v58 = vsel %vm73_vm0, %v86_v37, %v94_v43  ;;  %v139_v37 = vrot.slane %v4671_v34, 1  ;;  %v4094_v43 = vld [vmem:[#allocation4 + $0x6c] ss:$16 sps:$4 sm:$0xff]   ;;  %v4092_v50 = vld [vmem:[#allocation4 + $0x68] ss:$16 sps:$4 sm:$0xff]  }
  0x81   :  { %1260 = vmatprep.subr.bf16.mxu0 %v4019_v60  ;;  %1366 = vmatprep.subr.bf16.mxu1 %v4022_v62  ;;  %v43_v60 = vld [vmem:[#allocation2 + $0x10] sm:$0xff]  ;;  %v4643_v13 = vpack.c.bf16 %v95_v58, %v256_v55  ;;  %v4098_v53 = vld [vmem:[#allocation4 + $0x88] ss:$16 sps:$4 sm:$0xff]  }
  0x82   :  { %v4065_v62 = vld [vmem:[#allocation4 + $0x7e0] ss:$16 sps:$4 sm:$0xff]   ;;  %v76_v1 = vrot.slane %v43_v60, 7  ;;  %v4103_v55 = vld [vmem:[#allocation4 + $0xa4] ss:$16 sps:$4 sm:$0xff]  }
  0x83   :  { %v4104_v58 = vld [vmem:[#allocation4 + $0xa8] ss:$16 sps:$4 sm:$0xff]  }
  0x84   :  { %1261 = vmatpush1.bf16.msra.mxu0 %v4017_v2  ;;  %1367 = vmatpush1.bf16.msra.mxu1 %v4020_v3  ;;  %v4068_v2 = vld [vmem:[#allocation4 + $0x7e8] ss:$16 sps:$4 sm:$0xff]   ;;  %v84_v3 = vrot.slane %v4618_v0, 7  ;;  %v4166_v0 = vld [vmem:[#allocation4 + $0x1ec] ss:$16 sps:$4 sm:$0xff]  }
  0x85   :  { %1262 = vmatprep.subr.bf16.mxu0 %v4025_v5  ;;  %1368 = vmatprep.subr.bf16.mxu1 %v4028_v6  ;;  %v4646_v5 = vld [vmem:[#allocation2 + $0x30] sm:$0xff] }
  0x86   :  { %v4073_v6 = vld [vmem:[#allocation4 + $0x4] ss:$16 sps:$4 sm:$0xff]  }
  0x88   :  { %1263 = vmatpush1.bf16.msra.mxu0 %v4023_v7  ;;  %1369 = vmatpush1.bf16.msra.mxu1 %v4026_v8  ;;  %v4076_v7 = vld [vmem:[#allocation4 + $0xc] ss:$16 sps:$4 sm:$0xff]   ;;  %v82_v8 = vrot.slane %v4646_v5, 7 }
  0x89   :  { %1264 = vmatprep.subr.bf16.mxu0 %v4031_v10  ;;  %1370 = vmatprep.subr.bf16.mxu1 %v4034_v12  ;;  %v4071_v10 = vld [vmem:[#allocation4] ss:$16 sps:$4 sm:$0xff]   ;;  %v4074_v12 = vld [vmem:[#allocation4 + $0x8] ss:$16 sps:$4 sm:$0xff]  }
  0x8c   :  { %1265 = vmatpush1.bf16.msra.mxu0 %v4029_v14  ;;  %1371 = vmatpush1.bf16.msra.mxu1 %v4032_v15  ;;  %v418_v14 = vpack.c.bf16 %v4646_v5, %v43_v60  ;;  %v251_v15 = vmul.f32 %v4581_v18, %v121_v63  ;;  %v4112_v60 = vld [vmem:[#allocation4 + $0xcc] ss:$16 sps:$4 sm:$0xff]  }
  0x8d   :  { %1266 = vmatprep.subr.bf16.mxu0 %v4037_v16  ;;  %1372 = vmatprep.subr.bf16.mxu1 %v4040_v19  ;;  %v120_v16 = vsel %vm73_vm0, 0.0, %v76_v1  ;;  %v4079_v19 = vld [vmem:[#allocation4 + $0x24] ss:$16 sps:$4 sm:$0xff]   ;;  %v4124_v63 = vld [vmem:[#allocation4 + $0x10c] ss:$16 sps:$4 sm:$0xff]  }
  0x90   :  { %1267 = vmatpush1.bf16.msra.mxu0 %v4035_v20  ;;  %1373 = vmatpush1.bf16.msra.mxu1 %v4038_v21  ;;  %v4082_v20 = vld [vmem:[#allocation4 + $0x2c] ss:$16 sps:$4 sm:$0xff]  }
  0x91   :  { %1268 = vmatprep.subr.bf16.mxu0 %v4043_v22  ;;  %1374 = vmatprep.subr.bf16.mxu1 %v4046_v23  ;;  %v4653_v21 = vld [vmem:[#allocation2 + $0x58] sm:$0xff]  ;;  %v85_v22 = vsel %vm73_vm0, %v77_v59, %v84_v3  ;;  %v250_v23 = vmul.f32 %v4581_v18, %v120_v16  ;;  %v4109_v59 = vld [vmem:[#allocation4 + $0xc4] ss:$16 sps:$4 sm:$0xff]  }
  0x92   :  { %v4080_v18 = vld [vmem:[#allocation4 + $0x28] ss:$16 sps:$4 sm:$0xff]   ;;  %v4130_v16 = vld [vmem:[#allocation4 + $0x12c] ss:$16 sps:$4 sm:$0xff]  }
  0x94   :  { %1269 = vmatpush1.bf16.msra.mxu0 %v4041_v24  ;;  %1375 = vmatpush1.bf16.msra.mxu1 %v4044_v25  ;;  %v4659_v24 = vld [vmem:[#allocation2 + $0x78] sm:$0xff]  ;;  %v4661_v25 = vpack.c.bf16 %v85_v22, %v251_v15  ;;  %v4127_v15 = vld [vmem:[#allocation4 + $0x124] ss:$16 sps:$4 sm:$0xff]  }
  0x95   :  { %1270 = vmatprep.subr.bf16.mxu0 %v4049_v26  ;;  %1376 = vmatprep.subr.bf16.mxu1 %v4052_v29  ;;  %v83_v26 = vsel %vm73_vm0, %v76_v1, %v82_v8  ;;  %v4077_v29 = vld [vmem:[#allocation4 + $0x20] ss:$16 sps:$4 sm:$0xff]   ;;  %v4110_v1 = vld [vmem:[#allocation4 + $0xc8] ss:$16 sps:$4 sm:$0xff]   ;;  %v4133_v22 = vld [vmem:[#allocation4 + $0x144] ss:$16 sps:$4 sm:$0xff]  }
  0x98   :  { %1271 = vmatpush1.bf16.msra.mxu0 %v4047_v30  ;;  %1377 = vmatpush1.bf16.msra.mxu1 %v4050_v31  ;;  %v423_v30 = vpack.c.bf16 %v4659_v24, %v4653_v21  ;;  %v4668_v31 = vpack.c.bf16 %v83_v26, %v250_v23  ;;  %v4136_v23 = vld [vmem:[#allocation4 + $0x14c] ss:$16 sps:$4 sm:$0xff]   ;;  %v4131_v26 = vld [vmem:[#allocation4 + $0x140] ss:$16 sps:$4 sm:$0xff]  }
  0x99   :  { %1272 = vmatprep.subr.bf16.mxu0 %v4055_v32  ;;  %1378 = vmatprep.subr.bf16.mxu1 %v4058_v33  ;;  %v130_v32 = vrot.slane %v4646_v5, 1  ;;  %v4085_v33 = vld [vmem:[#allocation4 + $0x44] ss:$16 sps:$4 sm:$0xff]  }
  0x9a   :  { %v4277_v5 = vld [vmem:[#allocation4 + $0x844] ss:$16 sps:$4 sm:$0xff]  }
  0x9b   :  { %v4681_v40 = vsel %vm122_vm2, %v130_v32, %v139_v37 }
  0x9c   :  { %1273 = vmatpush1.bf16.msra.mxu0 %v4053_v36  ;;  %1379 = vmatpush1.bf16.msra.mxu1 %v4056_v39  ;;  %v4088_v36 = vld [vmem:[#allocation4 + $0x4c] ss:$16 sps:$4 sm:$0xff]   ;;  %v4086_v39 = vld [vmem:[#allocation4 + $0x48] ss:$16 sps:$4 sm:$0xff]  }
  0x9d   :  { %1274 = vmatprep.subr.bf16.mxu0 %v4061_v41  ;;  %1380 = vmatprep.subr.bf16.mxu1 %v4064_v42  ;;  %v422_v41 = vpack.c.bf16 %v4673_v35, %v4671_v34  ;;  %v4091_v42 = vld [vmem:[#allocation4 + $0x64] ss:$16 sps:$4 sm:$0xff]  }
  0xa0   :  { %1275 = vmatpush1.bf16.msra.mxu0 %v4059_v51  ;;  %1381 = vmatpush1.bf16.msra.mxu1 %v4062_v52  ;;  %v4100_v51 = vld [vmem:[#allocation4 + $0x8c] ss:$16 sps:$4 sm:$0xff]   ;;  %v4095_v52 = vld [vmem:[#allocation4 + $0x80] ss:$16 sps:$4 sm:$0xff]  }
  0xa1   :  { %1276 = vmatprep.subr.bf16.mxu0 %v4067_v47  ;;  %1382 = vmatprep.subr.bf16.mxu1 %v4070_v9  ;;  %v4106_v47 = vld [vmem:[#allocation4 + $0xac] ss:$16 sps:$4 sm:$0xff]   ;;  %v4101_v9 = vld [vmem:[#allocation4 + $0xa0] ss:$16 sps:$4 sm:$0xff]  }
  0xa4   :  { %1277 = vmatpush1.bf16.msra.mxu0 %v4065_v62  ;;  %1383 = vmatpush1.bf16.msra.mxu1 %v4068_v2  ;;  %v4107_v62 = vld [vmem:[#allocation4 + $0xc0] ss:$16 sps:$4 sm:$0xff]   ;;  %v4118_v2 = vld [vmem:[#allocation4 + $0xec] ss:$16 sps:$4 sm:$0xff]  }
  0xa5   :  { %2045 = vmatprep.subr.bf16.mxu0 %v4073_v6  ;;  %2151 = vmatprep.subr.bf16.mxu1 %v4076_v7  ;;  %v4113_v6 = vld [vmem:[#allocation4 + $0xe0] ss:$16 sps:$4 sm:$0xff]   ;;  %v4116_v7 = vld [vmem:[#allocation4 + $0xe8] ss:$16 sps:$4 sm:$0xff]  }
  0xa7   :  { %1279 = vmatmul.mubr.bf16.vlgmr.msra.gmra.mrb[0].mxu0 %v418_v14  ;;  %1385 = vmatmul.mubr.bf16.vlgmr.msra.gmra.mrb[0].mxu1 %v418_v14  ;;  %v4122_v14 = vld [vmem:[#allocation4 + $0x108] ss:$16 sps:$4 sm:$0xff]  }
  0xa8   :  { %2046 = vmatpush1.bf16.msra.mxu0 %v4071_v10  ;;  %2152 = vmatpush1.bf16.msra.mxu1 %v4074_v12  ;;  %v4121_v10 = vld [vmem:[#allocation4 + $0x104] ss:$16 sps:$4 sm:$0xff]   ;;  %v4119_v12 = vld [vmem:[#allocation4 + $0x100] ss:$16 sps:$4 sm:$0xff]  }
  0xa9   :  { %2047 = vmatprep.subr.bf16.mxu0 %v4079_v19  ;;  %2153 = vmatprep.subr.bf16.mxu1 %v4082_v20  ;;  %v4125_v19 = vld [vmem:[#allocation4 + $0x120] ss:$16 sps:$4 sm:$0xff]   ;;  %v4128_v20 = vld [vmem:[#allocation4 + $0x128] ss:$16 sps:$4 sm:$0xff]  }
  0xaa   :  { %1288 = vmatprep.mubr.bf16.mxu0 %v423_v30  ;;  %1394 = vmatprep.mubr.bf16.mxu1 %v423_v30  ;;  %v4139_v30 = vld [vmem:[#allocation4 + $0x164] ss:$16 sps:$4 sm:$0xff]  }
  0xac   :  { %2048 = vmatpush1.bf16.msra.mxu0 %v4077_v29  ;;  %2154 = vmatpush1.bf16.msra.mxu1 %v4080_v18  ;;  %v4134_v29 = vld [vmem:[#allocation4 + $0x148] ss:$16 sps:$4 sm:$0xff]   ;;  %v4142_v18 = vld [vmem:[#allocation4 + $0x16c] ss:$16 sps:$4 sm:$0xff]  }
  0xad   :  { %2049 = vmatprep.subr.bf16.mxu0 %v4085_v33  ;;  %2155 = vmatprep.subr.bf16.mxu1 %v4088_v36  ;;  %v4137_v33 = vld [vmem:[#allocation4 + $0x160] ss:$16 sps:$4 sm:$0xff]   ;;  %v4140_v36 = vld [vmem:[#allocation4 + $0x168] ss:$16 sps:$4 sm:$0xff]  }
  0xaf   :  { %1289 = vmatmul.mubr.bf16.gmra.mrb[4].mxu0 %v422_v41  ;;  %1395 = vmatmul.mubr.bf16.gmra.mrb[4].mxu1 %v422_v41  ;;  %v4143_v41 = vld [vmem:[#allocation4 + $0x180] ss:$16 sps:$4 sm:$0xff]  }
  0xb0   :  { %2050 = vmatpush1.bf16.msra.mxu0 %v4083_v38  ;;  %2156 = vmatpush1.bf16.msra.mxu1 %v4086_v39  ;;  %v4145_v38 = vld [vmem:[#allocation4 + $0x184] ss:$16 sps:$4 sm:$0xff]   ;;  %v4148_v39 = vld [vmem:[#allocation4 + $0x18c] ss:$16 sps:$4 sm:$0xff]  }
  0xb1   :  { %2051 = vmatprep.subr.bf16.mxu0 %v4091_v42  ;;  %2157 = vmatprep.subr.bf16.mxu1 %v4094_v43  ;;  %v4146_v42 = vld [vmem:[#allocation4 + $0x188] ss:$16 sps:$4 sm:$0xff]   ;;  %v4151_v43 = vld [vmem:[#allocation4 + $0x1a4] ss:$16 sps:$4 sm:$0xff]  }
  0xb2   :  { %2077 = vmatprep.mubr.bf16.mxu0 %v4591_v27  ;;  %2183 = vmatprep.mubr.bf16.mxu1 %v4591_v27  ;;  %v4115_v27 = vld [vmem:[#allocation4 + $0xe4] ss:$16 sps:$4 sm:$0xff]  }
  0xb4   :  { %2052 = vmatpush1.bf16.msra.mxu0 %v4089_v44  ;;  %2158 = vmatpush1.bf16.msra.mxu1 %v4092_v50  ;;  %v4154_v44 = vld [vmem:[#allocation4 + $0x1ac] ss:$16 sps:$4 sm:$0xff]   ;;  %v92_v50 = vrot.slane %v4653_v21, 7 }
  0xb5   :  { %2053 = vmatprep.subr.bf16.mxu0 %v4097_v46  ;;  %2159 = vmatprep.subr.bf16.mxu1 %v4100_v51  ;;  %v4149_v46 = vld [vmem:[#allocation4 + $0x1a0] ss:$16 sps:$4 sm:$0xff]   ;;  %v4152_v51 = vld [vmem:[#allocation4 + $0x1a8] ss:$16 sps:$4 sm:$0xff]  }
  0xb8   :  { %2054 = vmatpush1.bf16.msra.mxu0 %v4095_v52  ;;  %2160 = vmatpush1.bf16.msra.mxu1 %v4098_v53  ;;  %v90_v52 = vrot.slane %v4671_v34, 7  ;;  %v100_v53 = vrot.slane %v4659_v24, 7  ;;  %v4275_v34 = vld [vmem:[#allocation4 + $0x840] ss:$16 sps:$4 sm:$0xff]  }
  0xb9   :  { %2055 = vmatprep.subr.bf16.mxu0 %v4103_v55  ;;  %2161 = vmatprep.subr.bf16.mxu1 %v4106_v47  ;;  %v4157_v55 = vld [vmem:[#allocation4 + $0x1c4] ss:$16 sps:$4 sm:$0xff]   ;;  %v4160_v47 = vld [vmem:[#allocation4 + $0x1cc] ss:$16 sps:$4 sm:$0xff]  }
  0xbc   :  { %2056 = vmatpush1.bf16.msra.mxu0 %v4101_v9  ;;  %2162 = vmatpush1.bf16.msra.mxu1 %v4104_v58  ;;  %v98_v9 = vrot.slane %v4673_v35, 7  ;;  %v93_v58 = vsel %vm73_vm0, %v84_v3, %v92_v50 }
  0xbd   :  { %2057 = vmatprep.subr.bf16.mxu0 %v4109_v59  ;;  %2163 = vmatprep.subr.bf16.mxu1 %v4112_v60  ;;  %v4155_v59 = vld [vmem:[#allocation4 + $0x1c0] ss:$16 sps:$4 sm:$0xff]   ;;  %v4158_v60 = vld [vmem:[#allocation4 + $0x1c8] ss:$16 sps:$4 sm:$0xff]  }
  0xbe   :  { %v99_v3 = vsel %vm73_vm0, %v90_v52, %v98_v9  ;;  %v4188_v9 = vld [vmem:[#allocation4 + $0x268] ss:$16 sps:$4 sm:$0xff]  }
  0xc0   :  { %2058 = vmatpush1.bf16.msra.mxu0 %v4107_v62  ;;  %2164 = vmatpush1.bf16.msra.mxu1 %v4110_v1  ;;  %v259_v62 = vmul.f32 %v4631_v49, %v93_v58  ;;  %v91_v1 = vsel %vm73_vm0, %v82_v8, %v90_v52  ;;  %v137_v8 = vrot.slane %v4595_v45, 1  ;;  %v4176_v52 = vld [vmem:[#allocation4 + $0x228] ss:$16 sps:$4 sm:$0xff]   ;;  %v4193_v58 = vld [vmem:[#allocation4 + $0x284] ss:$16 sps:$4 sm:$0xff]  }
  0xc1   :  { %2059 = vmatprep.subr.bf16.mxu0 %v4115_v27  ;;  %2165 = vmatprep.subr.bf16.mxu1 %v4118_v2  ;;  %v4163_v27 = vld [vmem:[#allocation4 + $0x1e4] ss:$16 sps:$4 sm:$0xff]   ;;  %v101_v2 = vsel %vm73_vm0, %v92_v50, %v100_v53  ;;  %v4184_v53 = vld [vmem:[#allocation4 + $0x24c] ss:$16 sps:$4 sm:$0xff]  }
  0xc2   :  { %v4262_v45 = vld [vmem:[#allocation4 + $0x3ec] ss:$16 sps:$4 sm:$0xff]  }
  0xc4   :  { %2060 = vmatpush1.bf16.msra.mxu0 %v4113_v6  ;;  %2166 = vmatpush1.bf16.msra.mxu1 %v4116_v7  ;;  %v258_v6 = vmul.f32 %v4631_v49, %v91_v1  ;;  %v4700_v7 = vpack.c.bf16 %v101_v2, %v259_v62  ;;  %v4199_v62 = vld [vmem:[#allocation4 + $0x2a4] ss:$16 sps:$4 sm:$0xff]   ;;  %v4202_v1 = vld [vmem:[#allocation4 + $0x2ac] ss:$16 sps:$4 sm:$0xff]  }
  0xc5   :  { %2061 = vmatprep.subr.bf16.mxu0 %v4121_v10  ;;  %2167 = vmatprep.subr.bf16.mxu1 %v4124_v63  ;;  %v173_v10 = vadd.s32 8, %v4569_v4  ;;  %v4455_v63 = vld [vmem:[#allocation2 + $0x28] sm:$0xff]  ;;  %v4205_v2 = vld [vmem:[#allocation4 + $0x2c4] ss:$16 sps:$4 sm:$0xff]  }
  0xc8   :  { %2062 = vmatpush1.bf16.msra.mxu0 %v4119_v12  ;;  %2168 = vmatpush1.bf16.msra.mxu1 %v4122_v14  ;;  %v127_v12 = vrot.slane %v4455_v63, 1  ;;  %v4705_v14 = vpack.c.bf16 %v99_v3, %v258_v6  ;;  %v4208_v6 = vld [vmem:[#allocation4 + $0x2cc] ss:$16 sps:$4 sm:$0xff]   ;;  %v4206_v3 = vld [vmem:[#allocation4 + $0x2c8] ss:$16 sps:$4 sm:$0xff]  }
  0xc9   :  { %2063 = vmatprep.subr.bf16.mxu0 %v4127_v15  ;;  %2169 = vmatprep.subr.bf16.mxu1 %v4130_v16  ;;  %v4161_v15 = vld [vmem:[#allocation4 + $0x1e0] ss:$16 sps:$4 sm:$0xff]   ;;  %v4164_v16 = vld [vmem:[#allocation4 + $0x1e8] ss:$16 sps:$4 sm:$0xff]  }
  0xca   :  { %v4209_v63 = vld [vmem:[#allocation4 + $0x2e0] ss:$16 sps:$4 sm:$0xff]  }
  0xcc   :  { %2064 = vmatpush1.bf16.msra.mxu0 %v4125_v19  ;;  %2170 = vmatpush1.bf16.msra.mxu1 %v4128_v20  ;;  %v187_v19 = vand.u32 15, %v173_v10  ;;  %v4456_v20 = vld [vmem:[#allocation2 + $0x8] sm:$0xff] }
  0xcd   :  { %2065 = vmatprep.subr.bf16.mxu0 %v4133_v22  ;;  %2171 = vmatprep.subr.bf16.mxu1 %v4136_v23  ;;  %v126_v49 = vrot.slane %v4456_v20, 1  ;;  %v4169_v22 = vld [vmem:[#allocation4 + $0x204] ss:$16 sps:$4 sm:$0xff]   ;;  %v4214_v10 = vld [vmem:[#allocation4 + $0x2ec] ss:$16 sps:$4 sm:$0xff]  }
  0xce   :  { %v4457_v23 = vld [vmem:[#allocation2] sm:$0xff]  ;;  %vm237_vm4 = vcmp.ne.s32.totalorder %v187_v19, 15  ;;  %v4218_v20 = vld [vmem:[#allocation4 + $0x308] ss:$16 sps:$4 sm:$0xff]  }
  0xcf   :  { %v4215_v19 = vld [vmem:[#allocation4 + $0x300] ss:$16 sps:$4 sm:$0xff]  }
  0xd0   :  { %2066 = vmatpush1.bf16.msra.mxu0 %v4131_v26  ;;  %2172 = vmatpush1.bf16.msra.mxu1 %v4134_v29  ;;  %v123_v26 = vrot.slane %v4457_v23, 1  ;;  %v4172_v29 = vld [vmem:[#allocation4 + $0x20c] ss:$16 sps:$4 sm:$0xff]   ;;  %v4221_v23 = vld [vmem:[#allocation4 + $0x320] ss:$16 sps:$4 sm:$0xff]  }
  0xd1   :  { %2067 = vmatprep.subr.bf16.mxu0 %v4139_v30  ;;  %2173 = vmatprep.subr.bf16.mxu1 %v4142_v18  ;;  %v138_v30 = vsel %vm122_vm2, %v127_v12, %v137_v8  ;;  %v4711_v18 = vsel %vm237_vm4, 1.0, %v4517_v17 }
  0xd2   :  { %v125_v50 = vsel %vm122_vm2, %v123_v26, %v124_v48  ;;  %v4182_v48 = vld [vmem:[#allocation4 + $0x248] ss:$16 sps:$4 sm:$0xff]  }
  0xd3   :  { %v4224_v26 = vld [vmem:[#allocation4 + $0x328] ss:$16 sps:$4 sm:$0xff]  }
  0xd4   :  { %2068 = vmatpush1.bf16.msra.mxu0 %v4137_v33  ;;  %2174 = vmatpush1.bf16.msra.mxu1 %v4140_v36  ;;  %v4167_v33 = vld [vmem:[#allocation4 + $0x200] ss:$16 sps:$4 sm:$0xff]   ;;  %v4170_v36 = vld [vmem:[#allocation4 + $0x208] ss:$16 sps:$4 sm:$0xff]  }
  0xd5   :  { %2069 = vmatprep.subr.bf16.mxu0 %v4145_v38  ;;  %2175 = vmatprep.subr.bf16.mxu1 %v4148_v39  ;;  %v269_v38 = vmul.f32 %v4711_v18, %v138_v30  ;;  %v4175_v39 = vld [vmem:[#allocation4 + $0x224] ss:$16 sps:$4 sm:$0xff]   ;;  %v4232_v30 = vld [vmem:[#allocation4 + $0x34c] ss:$16 sps:$4 sm:$0xff]  }
  0xd8   :  { %2070 = vmatpush1.bf16.msra.mxu0 %v4143_v41  ;;  %2176 = vmatpush1.bf16.msra.mxu1 %v4146_v42  ;;  %v128_v41 = vsel %vm122_vm2, %v126_v49, %v127_v12  ;;  %v268_v42 = vmul.f32 %v4711_v18, %v4614_v61  ;;  %v4181_v61 = vld [vmem:[#allocation4 + $0x244] ss:$16 sps:$4 sm:$0xff]   ;;  %v4212_v12 = vld [vmem:[#allocation4 + $0x2e8] ss:$16 sps:$4 sm:$0xff]  }
  0xd9   :  { %2071 = vmatprep.subr.bf16.mxu0 %v4151_v43  ;;  %2177 = vmatprep.subr.bf16.mxu1 %v4154_v44  ;;  %v4178_v43 = vld [vmem:[#allocation4 + $0x22c] ss:$16 sps:$4 sm:$0xff]   ;;  %v4717_v44 = vpack.c.bf16 %v269_v38, %v128_v41  ;;  %v4223_v49 = vld [vmem:[#allocation4 + $0x324] ss:$16 sps:$4 sm:$0xff]   ;;  %v4233_v41 = vld [vmem:[#allocation4 + $0x360] ss:$16 sps:$4 sm:$0xff]  }
  0xda   :  { %v4235_v38 = vld [vmem:[#allocation4 + $0x364] ss:$16 sps:$4 sm:$0xff]  }
  0xdc   :  { %2072 = vmatpush1.bf16.msra.mxu0 %v4149_v46  ;;  %2178 = vmatpush1.bf16.msra.mxu1 %v4152_v51  ;;  %v4722_v46 = vpack.c.bf16 %v268_v42, %v125_v50  ;;  %v4173_v51 = vld [vmem:[#allocation4 + $0x220] ss:$16 sps:$4 sm:$0xff]   ;;  %v4236_v42 = vld [vmem:[#allocation4 + $0x368] ss:$16 sps:$4 sm:$0xff]   ;;  %v4244_v50 = vld [vmem:[#allocation4 + $0x38c] ss:$16 sps:$4 sm:$0xff]  }
  0xdd   :  { %2073 = vmatprep.subr.bf16.mxu0 %v4157_v55  ;;  %2179 = vmatprep.subr.bf16.mxu1 %v4160_v47  ;;  %v4187_v55 = vld [vmem:[#allocation4 + $0x264] ss:$16 sps:$4 sm:$0xff]   ;;  %v4185_v47 = vld [vmem:[#allocation4 + $0x260] ss:$16 sps:$4 sm:$0xff]  }
  0xe0   :  { %2074 = vmatpush1.bf16.msra.mxu0 %v4155_v59  ;;  %2180 = vmatpush1.bf16.msra.mxu1 %v4158_v60  ;;  %v4191_v59 = vld [vmem:[#allocation4 + $0x280] ss:$16 sps:$4 sm:$0xff]   ;;  %v4194_v60 = vld [vmem:[#allocation4 + $0x288] ss:$16 sps:$4 sm:$0xff]  }
  0xe1   :  { %2075 = vmatprep.subr.bf16.mxu0 %v4163_v27  ;;  %2181 = vmatprep.subr.bf16.mxu1 %v4166_v0  ;;  %v4197_v27 = vld [vmem:[#allocation4 + $0x2a0] ss:$16 sps:$4 sm:$0xff]  }
  0xe2   :  { %v4203_v0 = vld [vmem:[#allocation4 + $0x2c0] ss:$16 sps:$4 sm:$0xff]  }
  0xe4   :  { %2076 = vmatpush1.bf16.msra.mxu0 %v4161_v15  ;;  %2182 = vmatpush1.bf16.msra.mxu1 %v4164_v16  ;;  %v4217_v15 = vld [vmem:[#allocation4 + $0x304] ss:$16 sps:$4 sm:$0xff]   ;;  %v4220_v16 = vld [vmem:[#allocation4 + $0x30c] ss:$16 sps:$4 sm:$0xff]  }
  0xe5   :  { %2098 = vmatprep.subr.bf16.mxu0 %v4169_v22  ;;  %2204 = vmatprep.subr.bf16.mxu1 %v4172_v29  ;;  %v4226_v22 = vld [vmem:[#allocation4 + $0x32c] ss:$16 sps:$4 sm:$0xff]   ;;  %v4229_v29 = vld [vmem:[#allocation4 + $0x344] ss:$16 sps:$4 sm:$0xff]  }
  0xe7   :  { %2078 = vmatmul.mubr.bf16.vlgmr.msra.gmra.mrb[0].mxu0 %v4593_v28  ;;  %2184 = vmatmul.mubr.bf16.vlgmr.msra.gmra.mrb[0].mxu1 %v4593_v28  ;;  %v4190_v28 = vld [vmem:[#allocation4 + $0x26c] ss:$16 sps:$4 sm:$0xff]  }
  0xe8   :  { %2099 = vmatpush1.bf16.msra.mxu0 %v4167_v33  ;;  %2205 = vmatpush1.bf16.msra.mxu1 %v4170_v36  ;;  %v4227_v33 = vld [vmem:[#allocation4 + $0x340] ss:$16 sps:$4 sm:$0xff]   ;;  %v4230_v36 = vld [vmem:[#allocation4 + $0x348] ss:$16 sps:$4 sm:$0xff]  }
  0xe9   :  { %2100 = vmatprep.subr.bf16.mxu0 %v4175_v39  ;;  %2206 = vmatprep.subr.bf16.mxu1 %v4178_v43  ;;  %v4238_v39 = vld [vmem:[#allocation4 + $0x36c] ss:$16 sps:$4 sm:$0xff]   ;;  %v4241_v43 = vld [vmem:[#allocation4 + $0x384] ss:$16 sps:$4 sm:$0xff]  }
  0xea   :  { %2087 = vmatprep.mubr.bf16.mxu0 %v4639_v57  ;;  %2193 = vmatprep.mubr.bf16.mxu1 %v4639_v57  ;;  %v4196_v57 = vld [vmem:[#allocation4 + $0x28c] ss:$16 sps:$4 sm:$0xff]  }
  0xec   :  { %2101 = vmatpush1.bf16.msra.mxu0 %v4173_v51  ;;  %2207 = vmatpush1.bf16.msra.mxu1 %v4176_v52  ;;  %v4239_v51 = vld [vmem:[#allocation4 + $0x380] ss:$16 sps:$4 sm:$0xff]   ;;  %v4242_v52 = vld [vmem:[#allocation4 + $0x388] ss:$16 sps:$4 sm:$0xff]  }
  0xed   :  { %2102 = vmatprep.subr.bf16.mxu0 %v4181_v61  ;;  %2208 = vmatprep.subr.bf16.mxu1 %v4184_v53  ;;  %v4247_v61 = vld [vmem:[#allocation4 + $0x3a4] ss:$16 sps:$4 sm:$0xff]   ;;  %v175_v53 = vadd.s32 24, %v4569_v4 }
  0xef   :  { %2088 = vmatmul.mubr.bf16.gmra.mrb[4].mxu0 %v4643_v13  ;;  %2194 = vmatmul.mubr.bf16.gmra.mrb[4].mxu1 %v4643_v13  ;;  %v4200_v13 = vld [vmem:[#allocation4 + $0x2a8] ss:$16 sps:$4 sm:$0xff]  }
  0xf0   :  { %2103 = vmatpush1.bf16.msra.mxu0 %v4179_v11  ;;  %2209 = vmatpush1.bf16.msra.mxu1 %v4182_v48  ;;  %v4458_v11 = vld [vmem:[#allocation2 + $0x68] sm:$0xff] }
  0xf1   :  { %2104 = vmatprep.subr.bf16.mxu0 %v4187_v55  ;;  %2210 = vmatprep.subr.bf16.mxu1 %v4190_v28  ;;  %v145_v48 = vrot.slane %v4458_v11, 1  ;;  %v4250_v55 = vld [vmem:[#allocation4 + $0x3ac] ss:$16 sps:$4 sm:$0xff]   ;;  %v4459_v28 = vld [vmem:[#allocation2 + $0x60] sm:$0xff] }
  0xf2   :  { %2130 = vmatprep.mubr.bf16.mxu0 %v4661_v25  ;;  %2236 = vmatprep.mubr.bf16.mxu1 %v4661_v25  ;;  %v4211_v25 = vld [vmem:[#allocation4 + $0x2e4] ss:$16 sps:$4 sm:$0xff]  }
  0xf4   :  { %2105 = vmatpush1.bf16.msra.mxu0 %v4185_v47  ;;  %2211 = vmatpush1.bf16.msra.mxu1 %v4188_v9  ;;  %v143_v47 = vrot.slane %v4459_v28, 1  ;;  %v201_v9 = vand.u32 15, %v175_v53  ;;  %v4286_v28 = vld [vmem:[#allocation4 + $0x86c] ss:$16 sps:$4 sm:$0xff]  }
  0xf5   :  { %2106 = vmatprep.subr.bf16.mxu0 %v4193_v58  ;;  %2212 = vmatprep.subr.bf16.mxu1 %v4196_v57  ;;  %v4245_v58 = vld [vmem:[#allocation4 + $0x3a0] ss:$16 sps:$4 sm:$0xff]   ;;  %v4248_v57 = vld [vmem:[#allocation4 + $0x3a8] ss:$16 sps:$4 sm:$0xff]  }
  0xf6   :  { %vm239_vm5 = vcmp.ne.s32.totalorder %v201_v9, 15  ;;  %v4289_v9 = vld [vmem:[#allocation4 + $0x884] ss:$16 sps:$4 sm:$0xff]  }
  0xf8   :  { %2107 = vmatpush1.bf16.msra.mxu0 %v4191_v59  ;;  %2213 = vmatpush1.bf16.msra.mxu1 %v4194_v60  ;;  %v4253_v59 = vld [vmem:[#allocation4 + $0x3c4] ss:$16 sps:$4 sm:$0xff]   ;;  %v4256_v60 = vld [vmem:[#allocation4 + $0x3cc] ss:$16 sps:$4 sm:$0xff]  }
  0xf9   :  { %2108 = vmatprep.subr.bf16.mxu0 %v4199_v62  ;;  %2214 = vmatprep.subr.bf16.mxu1 %v4202_v1  ;;  %v168_v62 = vsel %vm122_vm2, %v145_v48, 0.0  ;;  %v4735_v1 = vsel %vm239_vm5, 1.0, %v4517_v17  ;;  %v144_v17 = vsel %vm122_vm2, %v135_v56, %v143_v47  ;;  %v4268_v56 = vld [vmem:[#allocation4 + $0x80c] ss:$16 sps:$4 sm:$0xff]  }
  0xfc   :  { %2109 = vmatpush1.bf16.msra.mxu0 %v4197_v27  ;;  %2215 = vmatpush1.bf16.msra.mxu1 %v4200_v13  ;;  %v277_v27 = vmul.f32 %v4735_v1, %v168_v62  ;;  %v167_v13 = vsel %vm122_vm2, %v143_v47, 0.0  ;;  %v4281_v47 = vld [vmem:[#allocation4 + $0x860] ss:$16 sps:$4 sm:$0xff]  }
  0xfd   :  { %2110 = vmatprep.subr.bf16.mxu0 %v4205_v2  ;;  %2216 = vmatprep.subr.bf16.mxu1 %v4208_v6  ;;  %v4251_v2 = vld [vmem:[#allocation4 + $0x3c0] ss:$16 sps:$4 sm:$0xff]   ;;  %v4254_v6 = vld [vmem:[#allocation4 + $0x3c8] ss:$16 sps:$4 sm:$0xff]  }
  0xfe   :  { %v4293_v62 = vld [vmem:[#allocation4 + $0x8a0] ss:$16 sps:$4 sm:$0xff]  }
 0x100   :  { %2111 = vmatpush1.bf16.msra.mxu0 %v4203_v0  ;;  %2217 = vmatpush1.bf16.msra.mxu1 %v4206_v3  ;;  %v146_v0 = vsel %vm122_vm2, %v137_v8, %v145_v48  ;;  %v276_v3 = vmul.f32 %v4735_v1, %v167_v13  ;;  %v4461_v8 = vld [vmem:[#allocation2 + $0x18] sm:$0xff] }
 0x101   :  { %2112 = vmatprep.subr.bf16.mxu0 %v4211_v25  ;;  %2218 = vmatprep.subr.bf16.mxu1 %v4214_v10  ;;  %v4259_v25 = vld [vmem:[#allocation4 + $0x3e4] ss:$16 sps:$4 sm:$0xff]   ;;  %v4743_v10 = vpack.c.bf16 %v277_v27, %v146_v0  ;;  %v4304_v13 = vld [vmem:[#allocation4 + $0x8cc] ss:$16 sps:$4 sm:$0xff]  }
 0x102   :  { %v4301_v27 = vld [vmem:[#allocation4 + $0x8c4] ss:$16 sps:$4 sm:$0xff]   ;;  %v4310_v0 = vld [vmem:[#allocation4 + $0x8ec] ss:$16 sps:$4 sm:$0xff]  }
 0x104   :  { %2113 = vmatpush1.bf16.msra.mxu0 %v4209_v63  ;;  %2219 = vmatpush1.bf16.msra.mxu1 %v4212_v12  ;;  %v4460_v63 = vld [vmem:[#allocation2 + $0x38] sm:$0xff] }
 0x105   :  { %2114 = vmatprep.subr.bf16.mxu0 %v4217_v15  ;;  %2220 = vmatprep.subr.bf16.mxu1 %v4220_v16  ;;  %v133_v12 = vrot.slane %v4460_v63, 1  ;;  %v141_v15 = vrot.slane %v4653_v21, 1  ;;  %v4749_v16 = vpack.c.bf16 %v276_v3, %v144_v17  ;;  %v4305_v3 = vld [vmem:[#allocation4 + $0x8e0] ss:$16 sps:$4 sm:$0xff]   ;;  %v4313_v17 = vld [vmem:[#allocation4 + $0x904] ss:$16 sps:$4 sm:$0xff]  }
 0x106   :  { %v4316_v63 = vld [vmem:[#allocation4 + $0x90c] ss:$16 sps:$4 sm:$0xff]  }
 0x108   :  { %2115 = vmatpush1.bf16.msra.mxu0 %v4215_v19  ;;  %2221 = vmatpush1.bf16.msra.mxu1 %v4218_v20  ;;  %v132_v19 = vrot.slane %v4461_v8, 1  ;;  %v4257_v20 = vld [vmem:[#allocation4 + $0x3e0] ss:$16 sps:$4 sm:$0xff]   ;;  %v4322_v8 = vld [vmem:[#allocation4 + $0x92c] ss:$16 sps:$4 sm:$0xff]  }
 0x109   :  { %2116 = vmatprep.subr.bf16.mxu0 %v4223_v49  ;;  %2222 = vmatprep.subr.bf16.mxu1 %v4226_v22  ;;  %v4260_v49 = vld [vmem:[#allocation4 + $0x3e8] ss:$16 sps:$4 sm:$0xff]   ;;  %v4462_v22 = vld [vmem:[#allocation2 + $0x10] sm:$0xff] }
 0x10c   :  { %2117 = vmatpush1.bf16.msra.mxu0 %v4221_v23  ;;  %2223 = vmatpush1.bf16.msra.mxu1 %v4224_v26  ;;  %v129_v23 = vrot.slane %v4462_v22, 1  ;;  %v142_v26 = vsel %vm122_vm2, %v133_v12, %v141_v15  ;;  %v4328_v22 = vld [vmem:[#allocation4 + $0x94c] ss:$16 sps:$4 sm:$0xff]  }
 0x10d   :  { %2118 = vmatprep.subr.bf16.mxu0 %v4229_v29  ;;  %2224 = vmatprep.subr.bf16.mxu1 %v4232_v30  ;;  %v271_v21 = vmul.f32 %v4711_v18, %v142_v26  ;;  %v149_v29 = vrot.slane %v4659_v24, 1  ;;  %v4263_v30 = vld [vmem:[#allocation4 + $0x800] ss:$16 sps:$4 sm:$0xff]   ;;  %v4274_v24 = vld [vmem:[#allocation4 + $0x82c] ss:$16 sps:$4 sm:$0xff]  }
 0x10e   :  { %v4334_v26 = vld [vmem:[#allocation4 + $0x96c] ss:$16 sps:$4 sm:$0xff]  }
 0x110   :  { %2119 = vmatpush1.bf16.msra.mxu0 %v4227_v33  ;;  %2225 = vmatpush1.bf16.msra.mxu1 %v4230_v36  ;;  %v4266_v33 = vld [vmem:[#allocation4 + $0x808] ss:$16 sps:$4 sm:$0xff]   ;;  %v134_v36 = vsel %vm122_vm2, %v132_v19, %v133_v12  ;;  %v4311_v12 = vld [vmem:[#allocation4 + $0x900] ss:$16 sps:$4 sm:$0xff]  }
 0x111   :  { %2120 = vmatprep.subr.bf16.mxu0 %v4235_v38  ;;  %2226 = vmatprep.subr.bf16.mxu1 %v4238_v39  ;;  %v270_v38 = vmul.f32 %v4711_v18, %v4681_v40  ;;  %v147_v39 = vrot.slane %v4673_v35, 1  ;;  %v4269_v40 = vld [vmem:[#allocation4 + $0x820] ss:$16 sps:$4 sm:$0xff]   ;;  %v4272_v35 = vld [vmem:[#allocation4 + $0x828] ss:$16 sps:$4 sm:$0xff]   ;;  %v150_v18 = vsel %vm122_vm2, %v141_v15, %v149_v29 }
 0x112   :  { %v4314_v15 = vld [vmem:[#allocation4 + $0x908] ss:$16 sps:$4 sm:$0xff]   ;;  %v4317_v19 = vld [vmem:[#allocation4 + $0x920] ss:$16 sps:$4 sm:$0xff]  }
 0x114   :  { %2121 = vmatpush1.bf16.msra.mxu0 %v4233_v41  ;;  %2227 = vmatpush1.bf16.msra.mxu1 %v4236_v42  ;;  %v4271_v41 = vld [vmem:[#allocation4 + $0x824] ss:$16 sps:$4 sm:$0xff]   ;;  %v4758_v42 = vpack.c.bf16 %v271_v21, %v134_v36  ;;  %v4329_v21 = vld [vmem:[#allocation4 + $0x960] ss:$16 sps:$4 sm:$0xff]  }
 0x115   :  { %2122 = vmatprep.subr.bf16.mxu0 %v4241_v43  ;;  %2228 = vmatprep.subr.bf16.mxu1 %v4244_v50  ;;  %v131_v43 = vsel %vm122_vm2, %v129_v23, %v130_v32  ;;  %v4323_v23 = vld [vmem:[#allocation4 + $0x940] ss:$16 sps:$4 sm:$0xff]  }
 0x116   :  { %v4763_v50 = vpack.c.bf16 %v270_v38, %v131_v43  ;;  %v4335_v36 = vld [vmem:[#allocation4 + $0x980] ss:$16 sps:$4 sm:$0xff]   ;;  %v4338_v38 = vld [vmem:[#allocation4 + $0x988] ss:$16 sps:$4 sm:$0xff]  }
 0x117   :  { %v4341_v43 = vld [vmem:[#allocation4 + $0x9a0] ss:$16 sps:$4 sm:$0xff]  }
 0x118   :  { %2123 = vmatpush1.bf16.msra.mxu0 %v4239_v51  ;;  %2229 = vmatpush1.bf16.msra.mxu1 %v4242_v52  ;;  %v170_v51 = vsel %vm122_vm2, %v149_v29, 0.0  ;;  %v148_v52 = vsel %vm122_vm2, %v139_v37, %v147_v39  ;;  %v4283_v37 = vld [vmem:[#allocation4 + $0x864] ss:$16 sps:$4 sm:$0xff]   ;;  %v4332_v29 = vld [vmem:[#allocation4 + $0x968] ss:$16 sps:$4 sm:$0xff]  }
 0x119   :  { %2124 = vmatprep.subr.bf16.mxu0 %v4247_v61  ;;  %2230 = vmatprep.subr.bf16.mxu1 %v4250_v55  ;;  %v279_v32 = vmul.f32 %v4735_v1, %v170_v51  ;;  %v169_v61 = vsel %vm122_vm2, %v147_v39, 0.0  ;;  %v4278_v55 = vld [vmem:[#allocation4 + $0x848] ss:$16 sps:$4 sm:$0xff]   ;;  %v4343_v39 = vld [vmem:[#allocation4 + $0x9a4] ss:$16 sps:$4 sm:$0xff]  }
 0x11a   :  { %v278_v53 = vmul.f32 %v4735_v1, %v169_v61  ;;  %v4296_v1 = vld [vmem:[#allocation4 + $0x8a8] ss:$16 sps:$4 sm:$0xff]  }
 0x11b   :  { %v4777_v11 = vpack.c.bf16 %v279_v32, %v150_v18  ;;  %v4347_v18 = vld [vmem:[#allocation4 + $0x9c0] ss:$16 sps:$4 sm:$0xff]   ;;  %v4350_v51 = vld [vmem:[#allocation4 + $0x9c8] ss:$16 sps:$4 sm:$0xff]   ;;  %v4358_v32 = vld [vmem:[#allocation4 + $0x9ec] ss:$16 sps:$4 sm:$0xff]  }
 0x11c   :  { %2125 = vmatpush1.bf16.msra.mxu0 %v4245_v58  ;;  %2231 = vmatpush1.bf16.msra.mxu1 %v4248_v57  ;;  %v4779_v48 = vpack.c.bf16 %v278_v53, %v148_v52  ;;  %v4292_v58 = vld [vmem:[#allocation4 + $0x88c] ss:$16 sps:$4 sm:$0xff]   ;;  %v4287_v57 = vld [vmem:[#allocation4 + $0x880] ss:$16 sps:$4 sm:$0xff]   ;;  %v4356_v61 = vld [vmem:[#allocation4 + $0x9e8] ss:$16 sps:$4 sm:$0xff]  }
 0x11d   :  { %2126 = vmatprep.subr.bf16.mxu0 %v4253_v59  ;;  %2232 = vmatprep.subr.bf16.mxu1 %v4256_v60  ;;  %v4290_v59 = vld [vmem:[#allocation4 + $0x888] ss:$16 sps:$4 sm:$0xff]   ;;  %v4295_v60 = vld [vmem:[#allocation4 + $0x8a4] ss:$16 sps:$4 sm:$0xff]   ;;  %v4353_v52 = vld [vmem:[#allocation4 + $0x9e0] ss:$16 sps:$4 sm:$0xff]  }
 0x11e   :  { %v4364_v53 = vld [vmem:[#allocation4 + $0xa0c] ss:$16 sps:$4 sm:$0xff]  }
 0x120   :  { %2127 = vmatpush1.bf16.msra.mxu0 %v4251_v2  ;;  %2233 = vmatpush1.bf16.msra.mxu1 %v4254_v6  ;;  %v4299_v2 = vld [vmem:[#allocation4 + $0x8c0] ss:$16 sps:$4 sm:$0xff]   ;;  %v4307_v6 = vld [vmem:[#allocation4 + $0x8e4] ss:$16 sps:$4 sm:$0xff]  }
 0x121   :  { %2128 = vmatprep.subr.bf16.mxu0 %v4259_v25  ;;  %2234 = vmatprep.subr.bf16.mxu1 %v4262_v45  ;;  %v4308_v25 = vld [vmem:[#allocation4 + $0x8e8] ss:$16 sps:$4 sm:$0xff]   ;;  %v4319_v45 = vld [vmem:[#allocation4 + $0x924] ss:$16 sps:$4 sm:$0xff]  }
 0x124   :  { %2129 = vmatpush1.bf16.msra.mxu0 %v4257_v20  ;;  %2235 = vmatpush1.bf16.msra.mxu1 %v4260_v49  ;;  %v4320_v20 = vld [vmem:[#allocation4 + $0x928] ss:$16 sps:$4 sm:$0xff]   ;;  %v4325_v49 = vld [vmem:[#allocation4 + $0x944] ss:$16 sps:$4 sm:$0xff]  }
 0x125   :  { %3034 = vmatprep.subr.bf16.mxu0 %v4265_v54  ;;  %3140 = vmatprep.subr.bf16.mxu1 %v4268_v56  ;;  %v4326_v54 = vld [vmem:[#allocation4 + $0x948] ss:$16 sps:$4 sm:$0xff]   ;;  %v4331_v56 = vld [vmem:[#allocation4 + $0x964] ss:$16 sps:$4 sm:$0xff]  }
 0x127   :  { %2131 = vmatmul.mubr.bf16.vlgmr.msra.gmra.mrb[0].mxu0 %v4668_v31  ;;  %2237 = vmatmul.mubr.bf16.vlgmr.msra.gmra.mrb[0].mxu1 %v4668_v31  ;;  %v4280_v31 = vld [vmem:[#allocation4 + $0x84c] ss:$16 sps:$4 sm:$0xff]  }
 0x128   :  { %3035 = vmatpush1.bf16.msra.mxu0 %v4263_v30  ;;  %3141 = vmatpush1.bf16.msra.mxu1 %v4266_v33  ;;  %v4337_v30 = vld [vmem:[#allocation4 + $0x984] ss:$16 sps:$4 sm:$0xff]   ;;  %v4340_v33 = vld [vmem:[#allocation4 + $0x98c] ss:$16 sps:$4 sm:$0xff]  }
 0x129   :  { %3036 = vmatprep.subr.bf16.mxu0 %v4271_v41  ;;  %3142 = vmatprep.subr.bf16.mxu1 %v4274_v24  ;;  %v4346_v41 = vld [vmem:[#allocation4 + $0x9ac] ss:$16 sps:$4 sm:$0xff]   ;;  %v4344_v24 = vld [vmem:[#allocation4 + $0x9a8] ss:$16 sps:$4 sm:$0xff]  }
 0x12a   :  { %2140 = vmatprep.mubr.bf16.mxu0 %v4700_v7  ;;  %2246 = vmatprep.mubr.bf16.mxu1 %v4700_v7  ;;  %v4284_v7 = vld [vmem:[#allocation4 + $0x868] ss:$16 sps:$4 sm:$0xff]  }
 0x12c   :  { %3037 = vmatpush1.bf16.msra.mxu0 %v4269_v40  ;;  %3143 = vmatpush1.bf16.msra.mxu1 %v4272_v35  ;;  %v4349_v40 = vld [vmem:[#allocation4 + $0x9c4] ss:$16 sps:$4 sm:$0xff]   ;;  %v4352_v35 = vld [vmem:[#allocation4 + $0x9cc] ss:$16 sps:$4 sm:$0xff]  }
 0x12d   :  { %3038 = vmatprep.subr.bf16.mxu0 %v4277_v5  ;;  %3144 = vmatprep.subr.bf16.mxu1 %v4280_v31  ;;  %v4355_v5 = vld [vmem:[#allocation4 + $0x9e4] ss:$16 sps:$4 sm:$0xff]  }
 0x12e   :  { %v4361_v31 = vld [vmem:[#allocation4 + $0xa04] ss:$16 sps:$4 sm:$0xff]  }
 0x12f   :  { %2141 = vmatmul.mubr.bf16.gmra.mrb[4].mxu0 %v4705_v14  ;;  %2247 = vmatmul.mubr.bf16.gmra.mrb[4].mxu1 %v4705_v14  ;;  %v4298_v14 = vld [vmem:[#allocation4 + $0x8ac] ss:$16 sps:$4 sm:$0xff]  }
 0x130   :  { %3039 = vmatpush1.bf16.msra.mxu0 %v4275_v34  ;;  %3145 = vmatpush1.bf16.msra.mxu1 %v4278_v55  ;;  %v4359_v34 = vld [vmem:[#allocation4 + $0xa00] ss:$16 sps:$4 sm:$0xff]   ;;  %v4362_v55 = vld [vmem:[#allocation4 + $0xa08] ss:$16 sps:$4 sm:$0xff]  }
 0x131   :  { %3040 = vmatprep.subr.bf16.mxu0 %v4283_v37  ;;  %3146 = vmatprep.subr.bf16.mxu1 %v4286_v28  ;;  %v4367_v37 = vld [vmem:[#allocation4 + $0xa24] ss:$16 sps:$4 sm:$0xff]   ;;  %v4370_v28 = vld [vmem:[#allocation4 + $0xa2c] ss:$16 sps:$4 sm:$0xff]  }
 0x132   :  { %3066 = vmatprep.mubr.bf16.mxu0 %v4717_v44  ;;  %3172 = vmatprep.mubr.bf16.mxu1 %v4717_v44  ;;  %v4302_v44 = vld [vmem:[#allocation4 + $0x8c8] ss:$16 sps:$4 sm:$0xff]  }
 0x134   :  { %3041 = vmatpush1.bf16.msra.mxu0 %v4281_v47  ;;  %3147 = vmatpush1.bf16.msra.mxu1 %v4284_v7  ;;  %v4365_v47 = vld [vmem:[#allocation4 + $0xa20] ss:$16 sps:$4 sm:$0xff]   ;;  %v4368_v7 = vld [vmem:[#allocation4 + $0xa28] ss:$16 sps:$4 sm:$0xff]  }
 0x135   :  { %3042 = vmatprep.subr.bf16.mxu0 %v4289_v9  ;;  %3148 = vmatprep.subr.bf16.mxu1 %v4292_v58  ;;  %v4373_v9 = vld [vmem:[#allocation4 + $0xa44] ss:$16 sps:$4 sm:$0xff]   ;;  %v4376_v58 = vld [vmem:[#allocation4 + $0xa4c] ss:$16 sps:$4 sm:$0xff]  }
 0x138   :  { %3043 = vmatpush1.bf16.msra.mxu0 %v4287_v57  ;;  %3149 = vmatpush1.bf16.msra.mxu1 %v4290_v59  ;;  %v4371_v57 = vld [vmem:[#allocation4 + $0xa40] ss:$16 sps:$4 sm:$0xff]   ;;  %v4374_v59 = vld [vmem:[#allocation4 + $0xa48] ss:$16 sps:$4 sm:$0xff]  }
 0x139   :  { %3044 = vmatprep.subr.bf16.mxu0 %v4295_v60  ;;  %3150 = vmatprep.subr.bf16.mxu1 %v4298_v14  ;;  %v4379_v60 = vld [vmem:[#allocation4 + $0xa64] ss:$16 sps:$4 sm:$0xff]   ;;  %v4377_v14 = vld [vmem:[#allocation4 + $0xa60] ss:$16 sps:$4 sm:$0xff]  }
 0x13c   :  { %3045 = vmatpush1.bf16.msra.mxu0 %v4293_v62  ;;  %3151 = vmatpush1.bf16.msra.mxu1 %v4296_v1  ;;  %v4380_v62 = vld [vmem:[#allocation4 + $0xa68] ss:$16 sps:$4 sm:$0xff]   ;;  %v4385_v1 = vld [vmem:[#allocation4 + $0xa84] ss:$16 sps:$4 sm:$0xff]  }
 0x13d   :  { %3046 = vmatprep.subr.bf16.mxu0 %v4301_v27  ;;  %3152 = vmatprep.subr.bf16.mxu1 %v4304_v13  ;;  %v4383_v27 = vld [vmem:[#allocation4 + $0xa80] ss:$16 sps:$4 sm:$0xff]   ;;  %v4386_v13 = vld [vmem:[#allocation4 + $0xa88] ss:$16 sps:$4 sm:$0xff]  }
 0x140   :  { %3047 = vmatpush1.bf16.msra.mxu0 %v4299_v2  ;;  %3153 = vmatpush1.bf16.msra.mxu1 %v4302_v44  ;;  %v4391_v2 = vld [vmem:[#allocation4 + $0xaa4] ss:$16 sps:$4 sm:$0xff]   ;;  %v4389_v44 = vld [vmem:[#allocation4 + $0xaa0] ss:$16 sps:$4 sm:$0xff]  }
 0x141   :  { %3048 = vmatprep.subr.bf16.mxu0 %v4307_v6  ;;  %3154 = vmatprep.subr.bf16.mxu1 %v4310_v0  ;;  %v4392_v6 = vld [vmem:[#allocation4 + $0xaa8] ss:$16 sps:$4 sm:$0xff]   ;;  %v4397_v0 = vld [vmem:[#allocation4 + $0xac4] ss:$16 sps:$4 sm:$0xff]  }
 0x144   :  { %3049 = vmatpush1.bf16.msra.mxu0 %v4305_v3  ;;  %3155 = vmatpush1.bf16.msra.mxu1 %v4308_v25  ;;  %v4400_v3 = vld [vmem:[#allocation4 + $0xacc] ss:$16 sps:$4 sm:$0xff]   ;;  %v4395_v25 = vld [vmem:[#allocation4 + $0xac0] ss:$16 sps:$4 sm:$0xff]  }
 0x145   :  { %3050 = vmatprep.subr.bf16.mxu0 %v4313_v17  ;;  %3156 = vmatprep.subr.bf16.mxu1 %v4316_v63  ;;  %v4403_v17 = vld [vmem:[#allocation4 + $0xae4] ss:$16 sps:$4 sm:$0xff]   ;;  %v4406_v63 = vld [vmem:[#allocation4 + $0xaec] ss:$16 sps:$4 sm:$0xff]  }
 0x148   :  { %3051 = vmatpush1.bf16.msra.mxu0 %v4311_v12  ;;  %3157 = vmatpush1.bf16.msra.mxu1 %v4314_v15  ;;  %v4401_v12 = vld [vmem:[#allocation4 + $0xae0] ss:$16 sps:$4 sm:$0xff]   ;;  %v4404_v15 = vld [vmem:[#allocation4 + $0xae8] ss:$16 sps:$4 sm:$0xff]  }
 0x149   :  { %3052 = vmatprep.subr.bf16.mxu0 %v4319_v45  ;;  %3158 = vmatprep.subr.bf16.mxu1 %v4322_v8  ;;  %v4409_v45 = vld [vmem:[#allocation4 + $0xb04] ss:$16 sps:$4 sm:$0xff]   ;;  %v4412_v8 = vld [vmem:[#allocation4 + $0xb0c] ss:$16 sps:$4 sm:$0xff]  }
 0x14c   :  { %3053 = vmatpush1.bf16.msra.mxu0 %v4317_v19  ;;  %3159 = vmatpush1.bf16.msra.mxu1 %v4320_v20  ;;  %v4407_v19 = vld [vmem:[#allocation4 + $0xb00] ss:$16 sps:$4 sm:$0xff]   ;;  %v4410_v20 = vld [vmem:[#allocation4 + $0xb08] ss:$16 sps:$4 sm:$0xff]  }
 0x14d   :  { %3054 = vmatprep.subr.bf16.mxu0 %v4325_v49  ;;  %3160 = vmatprep.subr.bf16.mxu1 %v4328_v22  ;;  %v4415_v49 = vld [vmem:[#allocation4 + $0xb24] ss:$16 sps:$4 sm:$0xff]   ;;  %v4418_v22 = vld [vmem:[#allocation4 + $0xb2c] ss:$16 sps:$4 sm:$0xff]  }
 0x150   :  { %3055 = vmatpush1.bf16.msra.mxu0 %v4323_v23  ;;  %3161 = vmatpush1.bf16.msra.mxu1 %v4326_v54  ;;  %v4413_v23 = vld [vmem:[#allocation4 + $0xb20] ss:$16 sps:$4 sm:$0xff]   ;;  %v4416_v54 = vld [vmem:[#allocation4 + $0xb28] ss:$16 sps:$4 sm:$0xff]  }
 0x151   :  { %3056 = vmatprep.subr.bf16.mxu0 %v4331_v56  ;;  %3162 = vmatprep.subr.bf16.mxu1 %v4334_v26  ;;  %v4421_v56 = vld [vmem:[#allocation4 + $0xb44] ss:$16 sps:$4 sm:$0xff]   ;;  %v4424_v26 = vld [vmem:[#allocation4 + $0xb4c] ss:$16 sps:$4 sm:$0xff]  }
 0x154   :  { %3057 = vmatpush1.bf16.msra.mxu0 %v4329_v21  ;;  %3163 = vmatpush1.bf16.msra.mxu1 %v4332_v29  ;;  %v4419_v21 = vld [vmem:[#allocation4 + $0xb40] ss:$16 sps:$4 sm:$0xff]   ;;  %v4422_v29 = vld [vmem:[#allocation4 + $0xb48] ss:$16 sps:$4 sm:$0xff]  }
 0x155   :  { %3058 = vmatprep.subr.bf16.mxu0 %v4337_v30  ;;  %3164 = vmatprep.subr.bf16.mxu1 %v4340_v33  ;;  %v4427_v30 = vld [vmem:[#allocation4 + $0xb64] ss:$16 sps:$4 sm:$0xff]   ;;  %v4430_v33 = vld [vmem:[#allocation4 + $0xb6c] ss:$16 sps:$4 sm:$0xff]  }
 0x158   :  { %3059 = vmatpush1.bf16.msra.mxu0 %v4335_v36  ;;  %3165 = vmatpush1.bf16.msra.mxu1 %v4338_v38  ;;  %v4425_v36 = vld [vmem:[#allocation4 + $0xb60] ss:$16 sps:$4 sm:$0xff]   ;;  %v4428_v38 = vld [vmem:[#allocation4 + $0xb68] ss:$16 sps:$4 sm:$0xff]  }
 0x159   :  { %3060 = vmatprep.subr.bf16.mxu0 %v4343_v39  ;;  %3166 = vmatprep.subr.bf16.mxu1 %v4346_v41  ;;  %v4433_v39 = vld [vmem:[#allocation4 + $0xb84] ss:$16 sps:$4 sm:$0xff]   ;;  %v4436_v41 = vld [vmem:[#allocation4 + $0xb8c] ss:$16 sps:$4 sm:$0xff]  }
 0x15c   :  { %3061 = vmatpush1.bf16.msra.mxu0 %v4341_v43  ;;  %3167 = vmatpush1.bf16.msra.mxu1 %v4344_v24  ;;  %v4431_v43 = vld [vmem:[#allocation4 + $0xb80] ss:$16 sps:$4 sm:$0xff]   ;;  %v4434_v24 = vld [vmem:[#allocation4 + $0xb88] ss:$16 sps:$4 sm:$0xff]  }
 0x15d   :  { %3062 = vmatprep.subr.bf16.mxu0 %v4349_v40  ;;  %3168 = vmatprep.subr.bf16.mxu1 %v4352_v35  ;;  %v4439_v40 = vld [vmem:[#allocation4 + $0xba4] ss:$16 sps:$4 sm:$0xff]   ;;  %v4442_v35 = vld [vmem:[#allocation4 + $0xbac] ss:$16 sps:$4 sm:$0xff]  }
 0x160   :  { %3063 = vmatpush1.bf16.msra.mxu0 %v4347_v18  ;;  %3169 = vmatpush1.bf16.msra.mxu1 %v4350_v51  ;;  %v4437_v18 = vld [vmem:[#allocation4 + $0xba0] ss:$16 sps:$4 sm:$0xff]   ;;  %v4440_v51 = vld [vmem:[#allocation4 + $0xba8] ss:$16 sps:$4 sm:$0xff]  }
 0x161   :  { %3064 = vmatprep.subr.bf16.mxu0 %v4355_v5  ;;  %3170 = vmatprep.subr.bf16.mxu1 %v4358_v32  ;;  %v4445_v5 = vld [vmem:[#allocation4 + $0xbc4] ss:$16 sps:$4 sm:$0xff]   ;;  %v4448_v32 = vld [vmem:[#allocation4 + $0xbcc] ss:$16 sps:$4 sm:$0xff]  }
 0x164   :  { %3065 = vmatpush1.bf16.msra.mxu0 %v4353_v52  ;;  %3171 = vmatpush1.bf16.msra.mxu1 %v4356_v61  ;;  %v4443_v52 = vld [vmem:[#allocation4 + $0xbc0] ss:$16 sps:$4 sm:$0xff]   ;;  %v4446_v61 = vld [vmem:[#allocation4 + $0xbc8] ss:$16 sps:$4 sm:$0xff]  }
 0x165   :  { %3087 = vmatprep.subr.bf16.mxu0 %v4361_v31  ;;  %3193 = vmatprep.subr.bf16.mxu1 %v4364_v53  ;;  %v4451_v31 = vld [vmem:[#allocation4 + $0xbe4] ss:$16 sps:$4 sm:$0xff]   ;;  %v4454_v53 = vld [vmem:[#allocation4 + $0xbec] ss:$16 sps:$4 sm:$0xff]  }
 0x167   :  { %3067 = vmatmul.mubr.bf16.vlgmr.msra.gmra.mrb[0].mxu0 %v4722_v46  ;;  %3173 = vmatmul.mubr.bf16.vlgmr.msra.gmra.mrb[0].mxu1 %v4722_v46  ;;  %v4382_v46 = vld [vmem:[#allocation4 + $0xa6c] ss:$16 sps:$4 sm:$0xff]  }
 0x168   :  { %3088 = vmatpush1.bf16.msra.mxu0 %v4359_v34  ;;  %3194 = vmatpush1.bf16.msra.mxu1 %v4362_v55  ;;  %v4449_v34 = vld [vmem:[#allocation4 + $0xbe0] ss:$16 sps:$4 sm:$0xff]   ;;  %v4452_v55 = vld [vmem:[#allocation4 + $0xbe8] ss:$16 sps:$4 sm:$0xff]  }
 0x169   :  { %3089 = vmatprep.subr.bf16.mxu0 %v4367_v37  ;;  %3195 = vmatprep.subr.bf16.mxu1 %v4370_v28 }
 0x16a   :  { %3076 = vmatprep.mubr.bf16.mxu0 %v4743_v10  ;;  %3182 = vmatprep.mubr.bf16.mxu1 %v4743_v10  ;;  %v4388_v10 = vld [vmem:[#allocation4 + $0xa8c] ss:$16 sps:$4 sm:$0xff]  }
 0x16c   :  { %3090 = vmatpush1.bf16.msra.mxu0 %v4365_v47  ;;  %3196 = vmatpush1.bf16.msra.mxu1 %v4368_v7 }
 0x16d   :  { %3091 = vmatprep.subr.bf16.mxu0 %v4373_v9  ;;  %3197 = vmatprep.subr.bf16.mxu1 %v4376_v58 }
 0x16f   :  { %3077 = vmatmul.mubr.bf16.gmra.mrb[4].mxu0 %v4749_v16  ;;  %3183 = vmatmul.mubr.bf16.gmra.mrb[4].mxu1 %v4749_v16  ;;  %v4394_v16 = vld [vmem:[#allocation4 + $0xaac] ss:$16 sps:$4 sm:$0xff]  }
 0x170   :  { %3092 = vmatpush1.bf16.msra.mxu0 %v4371_v57  ;;  %3198 = vmatpush1.bf16.msra.mxu1 %v4374_v59 }
 0x171   :  { %3093 = vmatprep.subr.bf16.mxu0 %v4379_v60  ;;  %3199 = vmatprep.subr.bf16.mxu1 %v4382_v46 }
 0x172   :  { %3119 = vmatprep.mubr.bf16.mxu0 %v4758_v42  ;;  %3225 = vmatprep.mubr.bf16.mxu1 %v4758_v42  ;;  %v4398_v42 = vld [vmem:[#allocation4 + $0xac8] ss:$16 sps:$4 sm:$0xff]  }
 0x174   :  { %3094 = vmatpush1.bf16.msra.mxu0 %v4377_v14  ;;  %3200 = vmatpush1.bf16.msra.mxu1 %v4380_v62 }
 0x175   :  { %3095 = vmatprep.subr.bf16.mxu0 %v4385_v1  ;;  %3201 = vmatprep.subr.bf16.mxu1 %v4388_v10 }
 0x178   :  { %3096 = vmatpush1.bf16.msra.mxu0 %v4383_v27  ;;  %3202 = vmatpush1.bf16.msra.mxu1 %v4386_v13 }
 0x179   :  { %3097 = vmatprep.subr.bf16.mxu0 %v4391_v2  ;;  %3203 = vmatprep.subr.bf16.mxu1 %v4394_v16 }
 0x17c   :  { %3098 = vmatpush1.bf16.msra.mxu0 %v4389_v44  ;;  %3204 = vmatpush1.bf16.msra.mxu1 %v4392_v6 }
 0x17d   :  { %3099 = vmatprep.subr.bf16.mxu0 %v4397_v0  ;;  %3205 = vmatprep.subr.bf16.mxu1 %v4400_v3 }
 0x180   :  { %3100 = vmatpush1.bf16.msra.mxu0 %v4395_v25  ;;  %3206 = vmatpush1.bf16.msra.mxu1 %v4398_v42  ;;  %v4518_v42 = vmov 1983009808  }
 0x181   :  { %3101 = vmatprep.subr.bf16.mxu0 %v4403_v17  ;;  %3207 = vmatprep.subr.bf16.mxu1 %v4406_v63  ;;  %v4823_v17 = vunpack.c.l.s4 %v4518_v42 }
 0x184   :  { %3102 = vmatpush1.bf16.msra.mxu0 %v4401_v12  ;;  %3208 = vmatpush1.bf16.msra.mxu1 %v4404_v15 }
 0x185   :  { %3103 = vmatprep.subr.bf16.mxu0 %v4409_v45  ;;  %3209 = vmatprep.subr.bf16.mxu1 %v4412_v8 }
 0x188   :  { %3104 = vmatpush1.bf16.msra.mxu0 %v4407_v19  ;;  %3210 = vmatpush1.bf16.msra.mxu1 %v4410_v20 }
 0x189   :  { %3105 = vmatprep.subr.bf16.mxu0 %v4415_v49  ;;  %3211 = vmatprep.subr.bf16.mxu1 %v4418_v22 }
 0x18c   :  { %3106 = vmatpush1.bf16.msra.mxu0 %v4413_v23  ;;  %3212 = vmatpush1.bf16.msra.mxu1 %v4416_v54 }
 0x18d   :  { %3107 = vmatprep.subr.bf16.mxu0 %v4421_v56  ;;  %3213 = vmatprep.subr.bf16.mxu1 %v4424_v26 }
 0x190   :  { %3108 = vmatpush1.bf16.msra.mxu0 %v4419_v21  ;;  %3214 = vmatpush1.bf16.msra.mxu1 %v4422_v29 }
 0x191   :  { %3109 = vmatprep.subr.bf16.mxu0 %v4427_v30  ;;  %3215 = vmatprep.subr.bf16.mxu1 %v4430_v33 }
 0x194   :  { %3110 = vmatpush1.bf16.msra.mxu0 %v4425_v36  ;;  %3216 = vmatpush1.bf16.msra.mxu1 %v4428_v38 }
 0x195   :  { %3111 = vmatprep.subr.bf16.mxu0 %v4433_v39  ;;  %3217 = vmatprep.subr.bf16.mxu1 %v4436_v41 }
 0x198   :  { %3112 = vmatpush1.bf16.msra.mxu0 %v4431_v43  ;;  %3218 = vmatpush1.bf16.msra.mxu1 %v4434_v24 }
 0x199   :  { %3113 = vmatprep.subr.bf16.mxu0 %v4439_v40  ;;  %3219 = vmatprep.subr.bf16.mxu1 %v4442_v35 }
 0x19c   :  { %3114 = vmatpush1.bf16.msra.mxu0 %v4437_v18  ;;  %3220 = vmatpush1.bf16.msra.mxu1 %v4440_v51 }
 0x19d   :  { %3115 = vmatprep.subr.bf16.mxu0 %v4445_v5  ;;  %3221 = vmatprep.subr.bf16.mxu1 %v4448_v32 }
 0x1a0   :  { %3116 = vmatpush1.bf16.msra.mxu0 %v4443_v52  ;;  %3222 = vmatpush1.bf16.msra.mxu1 %v4446_v61 }
 0x1a1   :  { %3117 = vmatprep.subr.bf16.mxu0 %v4451_v31  ;;  %3223 = vmatprep.subr.bf16.mxu1 %v4454_v53 }
 0x1a4   :  { %3118 = vmatpush1.bf16.msra.mxu0 %v4449_v34  ;;  %3224 = vmatpush1.bf16.msra.mxu1 %v4452_v55 }
 0x1a7   :  { %3120 = vmatmul.mubr.bf16.vlgmr.msra.gmra.mrb[0].mxu0 %v4763_v50  ;;  %3226 = vmatmul.mubr.bf16.vlgmr.msra.gmra.mrb[0].mxu1 %v4763_v50 }
 0x1a8   :  { %3129 = vmatprep.mubr.bf16.mxu0 %v4777_v11  ;;  %3235 = vmatprep.mubr.bf16.mxu1 %v4777_v11 }
 0x1af   :  { %3130 = vmatmul.mubr.bf16.gmra.mrb[4].mxu0 %v4779_v48  ;;  %3236 = vmatmul.mubr.bf16.gmra.mrb[4].mxu1 %v4779_v48 }
 0x27a   :  { %v3121_v37 = vpop.f32.mrb[0].mxu0  ;;  %v3227_v28 = vpop.f32.mrb[0].mxu1 }
 0x27b   :  { %3262 = vst [vmem:[%s4860_s2] sm:$0xff] %v3121_v37  ;;  %3264 = vst [vmem:[%s4860_s2 + $0x10] sm:$0xff] %v3227_v28  ;;  %v3123_v47 = vpop.f32.mrb[1].mxu0  ;;  %v3229_v50 = vpop.f32.mrb[1].mxu1  ;;  %v3314_v7 = vmul.f32 %v3121_v37, %v3121_v37  ;;  %v3316_v9 = vmul.f32 %v3227_v28, %v3227_v28 }
 0x27c   :  { %3263 = vst [vmem:[%s4860_s2 + $0x8] sm:$0xff] %v3123_v47  ;;  %v3315_v11 = vmul.f32 %v3123_v47, %v3123_v47  ;;  %3265 = vst [vmem:[%s4860_s2 + $0x18] sm:$0xff] %v3229_v50  ;;  %v3317_v48 = vmul.f32 %v3229_v50, %v3229_v50  ;;  %v3125_v58 = vpop.f32.mrb[2].mxu0  ;;  %v3231_v57 = vpop.f32.mrb[2].mxu1 }
 0x27d   :  { %3266 = vst [vmem:[%s4860_s2 + $0x20] sm:$0xff] %v3125_v58  ;;  %v3278_v59 = vadd.f32 %v3125_v58, %v3121_v37  ;;  %v3318_v60 = vmul.f32 %v3125_v58, %v3125_v58  ;;  %3268 = vst [vmem:[%s4860_s2 + $0x30] sm:$0xff] %v3231_v57  ;;  %v3296_v46 = vadd.f32 %v3231_v57, %v3227_v28  ;;  %v3127_v62 = vpop.f32.mrb[3].mxu0  ;;  %v3233_v1 = vpop.f32.mrb[3].mxu1 }
 0x27e   :  { %v3320_v14 = vmul.f32 %v3231_v57, %v3231_v57  ;;  %3267 = vst [vmem:[%s4860_s2 + $0x28] sm:$0xff] %v3127_v62  ;;  %v3287_v10 = vadd.f32 %v3127_v62, %v3123_v47  ;;  %v3319_v27 = vmul.f32 %v3127_v62, %v3127_v62  ;;  %3269 = vst [vmem:[%s4860_s2 + $0x38] sm:$0xff] %v3233_v1 }
 0x27f   :  { %v3305_v13 = vadd.f32 %v3233_v1, %v3229_v50  ;;  %v3321_v2 = vmul.f32 %v3233_v1, %v3233_v1  ;;  %v3330_v16 = vadd.f32 %v3318_v60, %v3314_v7 }
 0x280   :  { %v3348_v44 = vadd.f32 %v3320_v14, %v3316_v9  ;;  %v3339_v6 = vadd.f32 %v3319_v27, %v3315_v11 }
 0x281   :  { %v3357_v0 = vadd.f32 %v3321_v2, %v3317_v48 }
 0x282   :  { %v3131_v3 = vpop.f32.mrb[4].mxu0  ;;  %v3237_v25 = vpop.f32.mrb[4].mxu1 }
 0x283   :  { %3270 = vst [vmem:[%s4860_s2 + $0x40] sm:$0xff] %v3131_v3  ;;  %v3279_v63 = vadd.f32 %v3278_v59, %v3131_v3  ;;  %v3322_v12 = vmul.f32 %v3131_v3, %v3131_v3  ;;  %3272 = vst [vmem:[%s4860_s2 + $0x50] sm:$0xff] %v3237_v25  ;;  %v3297_v15 = vadd.f32 %v3296_v46, %v3237_v25  ;;  %v3133_v8 = vpop.f32.mrb[5].mxu0  ;;  %v3239_v19 = vpop.f32.mrb[5].mxu1 }
 0x284   :  { %v3324_v45 = vmul.f32 %v3237_v25, %v3237_v25  ;;  %3271 = vst [vmem:[%s4860_s2 + $0x48] sm:$0xff] %v3133_v8  ;;  %v3288_v20 = vadd.f32 %v3287_v10, %v3133_v8  ;;  %v3323_v49 = vmul.f32 %v3133_v8, %v3133_v8  ;;  %3273 = vst [vmem:[%s4860_s2 + $0x58] sm:$0xff] %v3239_v19  ;;  %v3135_v54 = vpop.f32.mrb[6].mxu0  ;;  %v3241_v56 = vpop.f32.mrb[6].mxu1  ;;  %v3378_v8 = vunpack.c.0.s8 %v4823_v17 }
 0x285   :  { %v3306_v22 = vadd.f32 %v3305_v13, %v3239_v19  ;;  %v3325_v23 = vmul.f32 %v3239_v19, %v3239_v19  ;;  %v3331_v26 = vadd.f32 %v3330_v16, %v3322_v12  ;;  %3274 = vst [vmem:[%s4860_s2 + $0x60] sm:$0xff] %v3135_v54  ;;  %v3280_v29 = vadd.f32 %v3279_v63, %v3135_v54  ;;  %v3137_v33 = vpop.f32.mrb[7].mxu0  ;;  %v3243_v36 = vpop.f32.mrb[7].mxu1 }
 0x286   :  { %v3349_v21 = vadd.f32 %v3348_v44, %v3324_v45  ;;  %v3326_v30 = vmul.f32 %v3135_v54, %v3135_v54  ;;  %3276 = vst [vmem:[%s4860_s2 + $0x70] sm:$0xff] %v3241_v56  ;;  %v3340_v38 = vadd.f32 %v3339_v6, %v3323_v49  ;;  %v3298_v41 = vadd.f32 %v3297_v15, %v3241_v56 }
 0x287   :  { %v3358_v39 = vadd.f32 %v3357_v0, %v3325_v23  ;;  %v3328_v43 = vmul.f32 %v3241_v56, %v3241_v56  ;;  %3275 = vst [vmem:[%s4860_s2 + $0x68] sm:$0xff] %v3137_v33  ;;  %3277 = vst [vmem:[%s4860_s2 + $0x78] sm:$0xff] %v3243_v36  ;;  %v3281_v24 = vrot.slane %v3280_v29, 4  ;;  %v3289_v35 = vadd.f32 %v3288_v20, %v3137_v33 }
 0x288   :  { %v3332_v40 = vadd.f32 %v3331_v26, %v3326_v30  ;;  %v3327_v18 = vmul.f32 %v3137_v33, %v3137_v33  ;;  %v3299_v51 = vrot.slane %v3298_v41, 4  ;;  %v3307_v32 = vadd.f32 %v3306_v22, %v3243_v36 }
 0x289   :  { %v3350_v5 = vadd.f32 %v3349_v21, %v3328_v43  ;;  %v3329_v52 = vmul.f32 %v3243_v36, %v3243_v36  ;;  %v3282_v61 = vadd.f32 %v3281_v24, %v3280_v29  ;;  %v3290_v53 = vrot.slane %v3289_v35, 4 }
 0x28a   :  { %v3333_v31 = vrot.slane %v3332_v40, 4  ;;  %v3341_v34 = vadd.f32 %v3340_v38, %v3327_v18  ;;  %v3300_v55 = vadd.f32 %v3299_v51, %v3298_v41  ;;  %v3308_v28 = vrot.slane %v3307_v32, 4 }
 0x28b   :  { %v3351_v37 = vrot.slane %v3350_v5, 4  ;;  %v3359_v47 = vadd.f32 %v3358_v39, %v3329_v52  ;;  %v3283_v50 = vrot.slane %v3282_v61, 2  ;;  %v3291_v9 = vadd.f32 %v3290_v53, %v3289_v35 }
 0x28c   :  { %v3334_v7 = vadd.f32 %v3333_v31, %v3332_v40  ;;  %v3342_v11 = vrot.slane %v3341_v34, 4  ;;  %v3301_v48 = vrot.slane %v3300_v55, 2  ;;  %v3309_v57 = vadd.f32 %v3308_v28, %v3307_v32 }
 0x28d   :  { %v3352_v58 = vadd.f32 %v3351_v37, %v3350_v5  ;;  %v3360_v59 = vrot.slane %v3359_v47, 4  ;;  %v3284_v60 = vadd.f32 %v3283_v50, %v3282_v61  ;;  %v3292_v14 = vrot.slane %v3291_v9, 2 }
 0x28e   :  { %v3335_v46 = vrot.slane %v3334_v7, 2  ;;  %v3343_v62 = vadd.f32 %v3342_v11, %v3341_v34  ;;  %v3302_v1 = vadd.f32 %v3301_v48, %v3300_v55  ;;  %v3310_v27 = vrot.slane %v3309_v57, 2 }
 0x28f   :  { %v3353_v10 = vrot.slane %v3352_v58, 2  ;;  %v3361_v13 = vadd.f32 %v3360_v59, %v3359_v47  ;;  %v3285_v2 = vrot.slane %v3284_v60, 1  ;;  %v3293_v44 = vadd.f32 %v3292_v14, %v3291_v9 }
 0x290   :  { %v3336_v16 = vadd.f32 %v3335_v46, %v3334_v7  ;;  %v3344_v6 = vrot.slane %v3343_v62, 2  ;;  %v3303_v0 = vrot.slane %v3302_v1, 1  ;;  %v3311_v25 = vadd.f32 %v3310_v27, %v3309_v57 }
 0x291   :  { %v3354_v3 = vadd.f32 %v3353_v10, %v3352_v58  ;;  %v3362_v42 = vrot.slane %v3361_v13, 2  ;;  %v3294_v12 = vrot.slane %v3293_v44, 1  ;;  %v3286_v49 = vadd.f32 %v3285_v2, %v3284_v60 }
 0x292   :  { %v3337_v63 = vrot.slane %v3336_v16, 1  ;;  %v3345_v15 = vadd.f32 %v3344_v6, %v3343_v62  ;;  %v3312_v19 = vrot.slane %v3311_v25, 1  ;;  %v3304_v54 = vadd.f32 %v3303_v0, %v3302_v1 }
 0x293   :  { %v3355_v45 = vrot.slane %v3354_v3, 1  ;;  %v3363_v20 = vadd.f32 %v3362_v42, %v3361_v13  ;;  %v3295_v29 = vadd.f32 %v3294_v12, %v3293_v44  ;;  %v3381_v36 = vsub.s32 %v3378_v8, %v4569_v4 }
 0x294   :  { %v3338_v22 = vadd.f32 %v3337_v63, %v3336_v16  ;;  %v3346_v23 = vrot.slane %v3345_v15, 1  ;;  %v3313_v38 = vadd.f32 %v3312_v19, %v3311_v25 }
 0x295   :  { %v3356_v56 = vadd.f32 %v3355_v45, %v3354_v3  ;;  %v3364_v26 = vrot.slane %v3363_v20, 1 }
 0x296   :  { %v3366_v21 = vsel %vm73_vm0, %v3286_v49, %v3338_v22  ;;  %v3347_v30 = vadd.f32 %v3346_v23, %v3345_v15 }
 0x297   :  { %v3368_v33 = vsel %vm73_vm0, %v3304_v54, %v3356_v56  ;;  %v3365_v39 = vadd.f32 %v3364_v26, %v3363_v20 }
 0x298   :  { %v3367_v17 = vsel %vm73_vm0, %v3295_v29, %v3347_v30 }
 0x299   :  { %v3374_v41 = vcombine.low %v3366_v21, %v3367_v17  ;;  %v3369_v43 = vsel %vm73_vm0, %v3313_v38, %v3365_v39 }
 0x29a   :  { %v3375_v24 = vcombine.low %v3368_v33, %v3369_v43 }
 0x29b   :  { %v3382_v40 = vrot.slane %v3374_v41, %v3381_v36 }
 0x29c   :  { %v3389_v35 = vrot.slane %v3375_v24, %v3381_v36 }
 0x29e   :  { %v3390_v18 = vcombine.low %v3382_v40, %v3389_v35 }
 0x2a0   :  { %3392 = vst [vmem:[%s4861_s3] sm:$0xff] %v3390_v18 }
 0x2a1   :  { %3401 = vsyncpa [#allocation3], 1 }
 0x2a2   :  { %3402 = vsyncpa [#allocation5], 1 }

// kernel: closed_call.20
= control target key start
LH: loop header
LB: loop body
LE: loop exit
PB: predicated region body
PF: predicated region fallthrough
CT: control target
= control target key end

     0   :  { %s1456_s2 = inlined_call_operand.vmem [shape: f32[256,512], index: 2, kind: input, shape index: {}]   ;;  %s1457_s0 = inlined_call_operand.vmem [shape: f32[32,256], index: 0, kind: input, shape index: {}]   ;;  %s1458_s1 = inlined_call_operand.vmem [shape: f32[1,256], index: 1, kind: input, shape index: {}]   ;;  %s1459_s3 = inlined_call_operand.vmem [shape: f32[32,512], index: 3, kind: input, shape index: {}]   ;;  %s1460_s5 = inlined_call_operand.vmem [shape: f32[32,512], index: 5, kind: output, shape index: {1}]   ;;  %s1461_s4 = inlined_call_operand.vmem [shape: f32[32,512], index: 4, kind: output, shape index: {0}]  }
   0x1   :  { %v48_v0 = vld [vmem:[%s1456_s2 + $0x8] sm:$0xff]  ;;  %v50_v2 = vld [vmem:[%s1456_s2 + $0x18] sm:$0xff]  ;;  %v47_v5 = vld [vmem:[%s1456_s2] sm:$0xff] }
   0x2   :  { %v52_v1 = vld [vmem:[%s1456_s2 + $0x28] sm:$0xff]  ;;  %v54_v4 = vld [vmem:[%s1456_s2 + $0x38] sm:$0xff]  ;;  %v51_v6 = vld [vmem:[%s1456_s2 + $0x20] sm:$0xff] }
   0x3   :  { %v553_v3 = vpack.c.bf16 %v52_v1, %v48_v0  ;;  %v617_v7 = vpack.c.bf16 %v54_v4, %v50_v2  ;;  %v555_v8 = vpack.c.bf16 %v51_v6, %v47_v5  ;;  %v49_v9 = vld [vmem:[%s1456_s2 + $0x10] sm:$0xff]  ;;  %v56_v11 = vld [vmem:[%s1456_s2 + $0x48] sm:$0xff]  ;;  %v58_v14 = vld [vmem:[%s1456_s2 + $0x58] sm:$0xff] }
   0x4   :  { %v53_v10 = vld [vmem:[%s1456_s2 + $0x30] sm:$0xff]  ;;  %v60_v13 = vld [vmem:[%s1456_s2 + $0x68] sm:$0xff]  ;;  %v62_v15 = vld [vmem:[%s1456_s2 + $0x78] sm:$0xff] }
   0x5   :  { %554 = vmatprep.subr.bf16.mxu0 %v553_v3  ;;  %v619_v12 = vpack.c.bf16 %v53_v10, %v49_v9  ;;  %618 = vmatprep.subr.bf16.mxu1 %v617_v7  ;;  %v557_v16 = vpack.c.bf16 %v60_v13, %v56_v11  ;;  %v621_v17 = vpack.c.bf16 %v62_v15, %v58_v14  ;;  %v55_v18 = vld [vmem:[%s1456_s2 + $0x40] sm:$0xff]  ;;  %v57_v20 = vld [vmem:[%s1456_s2 + $0x50] sm:$0xff]  ;;  %v64_v23 = vld [vmem:[%s1456_s2 + $0x88] sm:$0xff] }
   0x6   :  { %556 = vmatpush1.bf16.msra.mxu0 %v555_v8  ;;  %v59_v19 = vld [vmem:[%s1456_s2 + $0x60] sm:$0xff]  ;;  %v61_v22 = vld [vmem:[%s1456_s2 + $0x70] sm:$0xff]  ;;  %v68_v24 = vld [vmem:[%s1456_s2 + $0xa8] sm:$0xff] }
   0x7   :  { %620 = vmatpush1.bf16.msra.mxu1 %v619_v12  ;;  %v559_v21 = vpack.c.bf16 %v59_v19, %v55_v18  ;;  %558 = vmatprep.subr.bf16.mxu0 %v557_v16  ;;  %v623_v25 = vpack.c.bf16 %v61_v22, %v57_v20  ;;  %v561_v26 = vpack.c.bf16 %v68_v24, %v64_v23  ;;  %v66_v27 = vld [vmem:[%s1456_s2 + $0x98] sm:$0xff]  ;;  %v63_v29 = vld [vmem:[%s1456_s2 + $0x80] sm:$0xff]  ;;  %v65_v32 = vld [vmem:[%s1456_s2 + $0x90] sm:$0xff] }
   0x8   :  { %622 = vmatprep.subr.bf16.mxu1 %v621_v17  ;;  %v70_v28 = vld [vmem:[%s1456_s2 + $0xb8] sm:$0xff]  ;;  %v67_v31 = vld [vmem:[%s1456_s2 + $0xa0] sm:$0xff]  ;;  %v69_v33 = vld [vmem:[%s1456_s2 + $0xb0] sm:$0xff] }
   0x9   :  { %v625_v30 = vpack.c.bf16 %v70_v28, %v66_v27  ;;  %v563_v34 = vpack.c.bf16 %v67_v31, %v63_v29  ;;  %v72_v35 = vld [vmem:[%s1456_s2 + $0xc8] sm:$0xff]  ;;  %v74_v37 = vld [vmem:[%s1456_s2 + $0xd8] sm:$0xff]  ;;  %v627_v38 = vpack.c.bf16 %v69_v33, %v65_v32  ;;  %v71_v41 = vld [vmem:[%s1456_s2 + $0xc0] sm:$0xff] }
   0xa   :  { %560 = vmatpush1.bf16.msra.mxu0 %v559_v21  ;;  %v76_v36 = vld [vmem:[%s1456_s2 + $0xe8] sm:$0xff]  ;;  %v78_v40 = vld [vmem:[%s1456_s2 + $0xf8] sm:$0xff]  ;;  %v75_v42 = vld [vmem:[%s1456_s2 + $0xe0] sm:$0xff] }
   0xb   :  { %624 = vmatpush1.bf16.msra.mxu1 %v623_v25  ;;  %562 = vmatprep.subr.bf16.mxu0 %v561_v26  ;;  %v565_v39 = vpack.c.bf16 %v76_v36, %v72_v35  ;;  %v629_v43 = vpack.c.bf16 %v78_v40, %v74_v37  ;;  %v73_v44 = vld [vmem:[%s1456_s2 + $0xd0] sm:$0xff]  ;;  %v80_v46 = vld [vmem:[%s1456_s2 + $0x108] sm:$0xff]  ;;  %v82_v48 = vld [vmem:[%s1456_s2 + $0x118] sm:$0xff]  ;;  %v567_v50 = vpack.c.bf16 %v75_v42, %v71_v41 }
   0xc   :  { %626 = vmatprep.subr.bf16.mxu1 %v625_v30  ;;  %v77_v45 = vld [vmem:[%s1456_s2 + $0xf0] sm:$0xff]  ;;  %v84_v47 = vld [vmem:[%s1456_s2 + $0x128] sm:$0xff]  ;;  %v86_v49 = vld [vmem:[%s1456_s2 + $0x138] sm:$0xff] }
   0xd   :  { %v631_v51 = vpack.c.bf16 %v77_v45, %v73_v44  ;;  %v569_v52 = vpack.c.bf16 %v84_v47, %v80_v46  ;;  %v79_v53 = vld [vmem:[%s1456_s2 + $0x100] sm:$0xff]  ;;  %v81_v55 = vld [vmem:[%s1456_s2 + $0x110] sm:$0xff]  ;;  %v633_v56 = vpack.c.bf16 %v86_v49, %v82_v48  ;;  %v88_v58 = vld [vmem:[%s1456_s2 + $0x148] sm:$0xff]  ;;  %v29_v47 = vlaneseq }
   0xe   :  { %564 = vmatpush1.bf16.msra.mxu0 %v563_v34  ;;  %v83_v54 = vld [vmem:[%s1456_s2 + $0x120] sm:$0xff]  ;;  %v85_v57 = vld [vmem:[%s1456_s2 + $0x130] sm:$0xff]  ;;  %v92_v59 = vld [vmem:[%s1456_s2 + $0x168] sm:$0xff] }
   0xf   :  { %628 = vmatpush1.bf16.msra.mxu1 %v627_v38  ;;  %566 = vmatprep.subr.bf16.mxu0 %v565_v39  ;;  %v90_v60 = vld [vmem:[%s1456_s2 + $0x158] sm:$0xff]  ;;  %v571_v62 = vpack.c.bf16 %v83_v54, %v79_v53  ;;  %v635_v63 = vpack.c.bf16 %v85_v57, %v81_v55  ;;  %v573_v0 = vpack.c.bf16 %v92_v59, %v88_v58  ;;  %v87_v1 = vld [vmem:[%s1456_s2 + $0x140] sm:$0xff]  ;;  %v89_v3 = vld [vmem:[%s1456_s2 + $0x150] sm:$0xff] }
  0x10   :  { %630 = vmatprep.subr.bf16.mxu1 %v629_v43  ;;  %v94_v61 = vld [vmem:[%s1456_s2 + $0x178] sm:$0xff]  ;;  %v91_v2 = vld [vmem:[%s1456_s2 + $0x160] sm:$0xff]  ;;  %v93_v5 = vld [vmem:[%s1456_s2 + $0x170] sm:$0xff] }
  0x11   :  { %v637_v4 = vpack.c.bf16 %v94_v61, %v90_v60  ;;  %v96_v6 = vld [vmem:[%s1456_s2 + $0x188] sm:$0xff]  ;;  %v98_v8 = vld [vmem:[%s1456_s2 + $0x198] sm:$0xff]  ;;  %v575_v10 = vpack.c.bf16 %v91_v2, %v87_v1  ;;  %v639_v11 = vpack.c.bf16 %v93_v5, %v89_v3  ;;  %v95_v13 = vld [vmem:[%s1456_s2 + $0x180] sm:$0xff]  ;;  %v995_v60 = vshrl.u32 %v29_v47, 7 }
  0x12   :  { %568 = vmatpush1.bf16.msra.mxu0 %v567_v50  ;;  %v100_v7 = vld [vmem:[%s1456_s2 + $0x1a8] sm:$0xff]  ;;  %v102_v9 = vld [vmem:[%s1456_s2 + $0x1b8] sm:$0xff]  ;;  %v99_v14 = vld [vmem:[%s1456_s2 + $0x1a0] sm:$0xff] }
  0x13   :  { %632 = vmatpush1.bf16.msra.mxu1 %v631_v51  ;;  %570 = vmatprep.subr.bf16.mxu0 %v569_v52  ;;  %v577_v12 = vpack.c.bf16 %v100_v7, %v96_v6  ;;  %v97_v15 = vld [vmem:[%s1456_s2 + $0x190] sm:$0xff]  ;;  %v641_v16 = vpack.c.bf16 %v102_v9, %v98_v8  ;;  %v104_v18 = vld [vmem:[%s1456_s2 + $0x1c8] sm:$0xff]  ;;  %v106_v20 = vld [vmem:[%s1456_s2 + $0x1d8] sm:$0xff]  ;;  %v579_v22 = vpack.c.bf16 %v99_v14, %v95_v13 }
  0x14   :  { %634 = vmatprep.subr.bf16.mxu1 %v633_v56  ;;  %v101_v17 = vld [vmem:[%s1456_s2 + $0x1b0] sm:$0xff]  ;;  %v108_v19 = vld [vmem:[%s1456_s2 + $0x1e8] sm:$0xff]  ;;  %v110_v21 = vld [vmem:[%s1456_s2 + $0x1f8] sm:$0xff] }
  0x15   :  { %v643_v23 = vpack.c.bf16 %v101_v17, %v97_v15  ;;  %v581_v24 = vpack.c.bf16 %v108_v19, %v104_v18  ;;  %v103_v25 = vld [vmem:[%s1456_s2 + $0x1c0] sm:$0xff]  ;;  %v105_v27 = vld [vmem:[%s1456_s2 + $0x1d0] sm:$0xff]  ;;  %v645_v28 = vpack.c.bf16 %v110_v21, %v106_v20  ;;  %v112_v30 = vld [vmem:[%s1456_s2 + $0x208] sm:$0xff] }
  0x16   :  { %572 = vmatpush1.bf16.msra.mxu0 %v571_v62  ;;  %v107_v26 = vld [vmem:[%s1456_s2 + $0x1e0] sm:$0xff]  ;;  %v109_v29 = vld [vmem:[%s1456_s2 + $0x1f0] sm:$0xff]  ;;  %v116_v31 = vld [vmem:[%s1456_s2 + $0x228] sm:$0xff] }
  0x17   :  { %636 = vmatpush1.bf16.msra.mxu1 %v635_v63  ;;  %574 = vmatprep.subr.bf16.mxu0 %v573_v0  ;;  %v114_v32 = vld [vmem:[%s1456_s2 + $0x218] sm:$0xff]  ;;  %v583_v34 = vpack.c.bf16 %v107_v26, %v103_v25  ;;  %v647_v35 = vpack.c.bf16 %v109_v29, %v105_v27  ;;  %v585_v36 = vpack.c.bf16 %v116_v31, %v112_v30  ;;  %v111_v37 = vld [vmem:[%s1456_s2 + $0x200] sm:$0xff]  ;;  %v113_v39 = vld [vmem:[%s1456_s2 + $0x210] sm:$0xff] }
  0x18   :  { %638 = vmatprep.subr.bf16.mxu1 %v637_v4  ;;  %v118_v33 = vld [vmem:[%s1456_s2 + $0x238] sm:$0xff]  ;;  %v115_v38 = vld [vmem:[%s1456_s2 + $0x220] sm:$0xff]  ;;  %v117_v41 = vld [vmem:[%s1456_s2 + $0x230] sm:$0xff] }
  0x19   :  { %v649_v40 = vpack.c.bf16 %v118_v33, %v114_v32  ;;  %v120_v42 = vld [vmem:[%s1456_s2 + $0x248] sm:$0xff]  ;;  %v122_v44 = vld [vmem:[%s1456_s2 + $0x258] sm:$0xff]  ;;  %v587_v46 = vpack.c.bf16 %v115_v38, %v111_v37  ;;  %v651_v48 = vpack.c.bf16 %v117_v41, %v113_v39  ;;  %v119_v50 = vld [vmem:[%s1456_s2 + $0x240] sm:$0xff] }
  0x1a   :  { %576 = vmatpush1.bf16.msra.mxu0 %v575_v10  ;;  %v124_v43 = vld [vmem:[%s1456_s2 + $0x268] sm:$0xff]  ;;  %v126_v45 = vld [vmem:[%s1456_s2 + $0x278] sm:$0xff]  ;;  %v123_v51 = vld [vmem:[%s1456_s2 + $0x260] sm:$0xff]  ;;  %v35_v10 = vsub.s32 1, %v995_v60 }
  0x1b   :  { %640 = vmatpush1.bf16.msra.mxu1 %v639_v11  ;;  %578 = vmatprep.subr.bf16.mxu0 %v577_v12  ;;  %v589_v49 = vpack.c.bf16 %v124_v43, %v120_v42  ;;  %v121_v52 = vld [vmem:[%s1456_s2 + $0x250] sm:$0xff]  ;;  %v653_v53 = vpack.c.bf16 %v126_v45, %v122_v44  ;;  %v128_v55 = vld [vmem:[%s1456_s2 + $0x288] sm:$0xff]  ;;  %v130_v57 = vld [vmem:[%s1456_s2 + $0x298] sm:$0xff]  ;;  %v591_v59 = vpack.c.bf16 %v123_v51, %v119_v50 }
  0x1c   :  { %642 = vmatprep.subr.bf16.mxu1 %v641_v16  ;;  %v125_v54 = vld [vmem:[%s1456_s2 + $0x270] sm:$0xff]  ;;  %v132_v56 = vld [vmem:[%s1456_s2 + $0x2a8] sm:$0xff]  ;;  %v134_v58 = vld [vmem:[%s1456_s2 + $0x2b8] sm:$0xff] }
  0x1d   :  { %v655_v61 = vpack.c.bf16 %v125_v54, %v121_v52  ;;  %v593_v62 = vpack.c.bf16 %v132_v56, %v128_v55  ;;  %v127_v63 = vld [vmem:[%s1456_s2 + $0x280] sm:$0xff]  ;;  %v129_v1 = vld [vmem:[%s1456_s2 + $0x290] sm:$0xff]  ;;  %v657_v2 = vpack.c.bf16 %v134_v58, %v130_v57  ;;  %v136_v4 = vld [vmem:[%s1456_s2 + $0x2c8] sm:$0xff] }
  0x1e   :  { %580 = vmatpush1.bf16.msra.mxu0 %v579_v22  ;;  %v131_v0 = vld [vmem:[%s1456_s2 + $0x2a0] sm:$0xff]  ;;  %v133_v3 = vld [vmem:[%s1456_s2 + $0x2b0] sm:$0xff]  ;;  %v140_v5 = vld [vmem:[%s1456_s2 + $0x2e8] sm:$0xff] }
  0x1f   :  { %644 = vmatpush1.bf16.msra.mxu1 %v643_v23  ;;  %582 = vmatprep.subr.bf16.mxu0 %v581_v24  ;;  %v138_v6 = vld [vmem:[%s1456_s2 + $0x2d8] sm:$0xff]  ;;  %v595_v8 = vpack.c.bf16 %v131_v0, %v127_v63  ;;  %v135_v9 = vld [vmem:[%s1456_s2 + $0x2c0] sm:$0xff]  ;;  %v659_v11 = vpack.c.bf16 %v133_v3, %v129_v1  ;;  %v597_v12 = vpack.c.bf16 %v140_v5, %v136_v4  ;;  %v137_v14 = vld [vmem:[%s1456_s2 + $0x2d0] sm:$0xff] }
  0x20   :  { %646 = vmatprep.subr.bf16.mxu1 %v645_v28  ;;  %v142_v7 = vld [vmem:[%s1456_s2 + $0x2f8] sm:$0xff]  ;;  %v139_v13 = vld [vmem:[%s1456_s2 + $0x2e0] sm:$0xff]  ;;  %v141_v15 = vld [vmem:[%s1456_s2 + $0x2f0] sm:$0xff] }
  0x21   :  { %v661_v16 = vpack.c.bf16 %v142_v7, %v138_v6  ;;  %v144_v17 = vld [vmem:[%s1456_s2 + $0x308] sm:$0xff]  ;;  %v146_v19 = vld [vmem:[%s1456_s2 + $0x318] sm:$0xff]  ;;  %v1052_v22 = vld [vmem:[%s1458_s1] sm:$0x3]  ;;  %v599_v23 = vpack.c.bf16 %v139_v13, %v135_v9  ;;  %v663_v25 = vpack.c.bf16 %v141_v15, %v137_v14 }
  0x22   :  { %584 = vmatpush1.bf16.msra.mxu0 %v583_v34  ;;  %v148_v18 = vld [vmem:[%s1456_s2 + $0x328] sm:$0xff]  ;;  %v150_v20 = vld [vmem:[%s1456_s2 + $0x338] sm:$0xff]  ;;  %v1055_v24 = vrot.slane %v1052_v22, %v35_v10  ;;  %v143_v27 = vld [vmem:[%s1456_s2 + $0x300] sm:$0xff] }
  0x23   :  { %648 = vmatpush1.bf16.msra.mxu1 %v647_v35  ;;  %586 = vmatprep.subr.bf16.mxu0 %v585_v36  ;;  %v20_v21 = vld [vmem:[%s1457_s0 + $0x8] sm:$0xff]  ;;  %v601_v26 = vpack.c.bf16 %v148_v18, %v144_v17  ;;  %v147_v28 = vld [vmem:[%s1456_s2 + $0x320] sm:$0xff]  ;;  %v145_v29 = vld [vmem:[%s1456_s2 + $0x310] sm:$0xff]  ;;  %v665_v30 = vpack.c.bf16 %v150_v20, %v146_v19 }
  0x24   :  { %650 = vmatprep.subr.bf16.mxu1 %v649_v40  ;;  %v149_v31 = vld [vmem:[%s1456_s2 + $0x330] sm:$0xff]  ;;  %v152_v32 = vld [vmem:[%s1456_s2 + $0x348] sm:$0xff]  ;;  %v40_v34 = vmul.f32 %v1055_v24, %v20_v21  ;;  %v154_v35 = vld [vmem:[%s1456_s2 + $0x358] sm:$0xff]  ;;  %v603_v37 = vpack.c.bf16 %v147_v28, %v143_v27 }
  0x25   :  { %v156_v33 = vld [vmem:[%s1456_s2 + $0x368] sm:$0xff]  ;;  %v158_v36 = vld [vmem:[%s1456_s2 + $0x378] sm:$0xff]  ;;  %v667_v38 = vpack.c.bf16 %v149_v31, %v145_v29  ;;  %v151_v40 = vld [vmem:[%s1456_s2 + $0x340] sm:$0xff] }
  0x26   :  { %588 = vmatpush1.bf16.msra.mxu0 %v587_v46  ;;  %239 = vmatprep.mubr.f32.mxu0 %v40_v34  ;;  %v605_v39 = vpack.c.bf16 %v156_v33, %v152_v32  ;;  %v155_v41 = vld [vmem:[%s1456_s2 + $0x360] sm:$0xff]  ;;  %v153_v42 = vld [vmem:[%s1456_s2 + $0x350] sm:$0xff]  ;;  %v669_v43 = vpack.c.bf16 %v158_v36, %v154_v35  ;;  %v160_v45 = vld [vmem:[%s1456_s2 + $0x388] sm:$0xff] }
  0x27   :  { %652 = vmatpush1.bf16.msra.mxu1 %v651_v48  ;;  %590 = vmatprep.subr.bf16.mxu0 %v589_v49  ;;  %v157_v44 = vld [vmem:[%s1456_s2 + $0x370] sm:$0xff]  ;;  %v164_v46 = vld [vmem:[%s1456_s2 + $0x3a8] sm:$0xff]  ;;  %v162_v47 = vld [vmem:[%s1456_s2 + $0x398] sm:$0xff]  ;;  %v607_v49 = vpack.c.bf16 %v155_v41, %v151_v40 }
  0x28   :  { %654 = vmatprep.subr.bf16.mxu1 %v653_v53  ;;  %328 = vmatprep.mubr.f32.mxu1 %v40_v34  ;;  %v166_v48 = vld [vmem:[%s1456_s2 + $0x3b8] sm:$0xff]  ;;  %v671_v50 = vpack.c.bf16 %v157_v44, %v153_v42  ;;  %v609_v51 = vpack.c.bf16 %v164_v46, %v160_v45  ;;  %v159_v52 = vld [vmem:[%s1456_s2 + $0x380] sm:$0xff]  ;;  %v161_v54 = vld [vmem:[%s1456_s2 + $0x390] sm:$0xff] }
  0x29   :  { %v163_v53 = vld [vmem:[%s1456_s2 + $0x3a0] sm:$0xff]  ;;  %v673_v55 = vpack.c.bf16 %v166_v48, %v162_v47  ;;  %v165_v56 = vld [vmem:[%s1456_s2 + $0x3b0] sm:$0xff]  ;;  %v168_v57 = vld [vmem:[%s1456_s2 + $0x3c8] sm:$0xff] }
  0x2a   :  { %592 = vmatpush1.bf16.msra.mxu0 %v591_v59  ;;  %v172_v58 = vld [vmem:[%s1456_s2 + $0x3e8] sm:$0xff]  ;;  %v170_v59 = vld [vmem:[%s1456_s2 + $0x3d8] sm:$0xff]  ;;  %v611_v63 = vpack.c.bf16 %v163_v53, %v159_v52  ;;  %v675_v0 = vpack.c.bf16 %v165_v56, %v161_v54  ;;  %v171_v3 = vld [vmem:[%s1456_s2 + $0x3e0] sm:$0xff] }
  0x2b   :  { %656 = vmatpush1.bf16.msra.mxu1 %v655_v61  ;;  %594 = vmatprep.subr.bf16.mxu0 %v593_v62  ;;  %v174_v61 = vld [vmem:[%s1456_s2 + $0x3f8] sm:$0xff]  ;;  %v31_v62 = vsub.s32 0, %v995_v60  ;;  %v613_v1 = vpack.c.bf16 %v172_v58, %v168_v57  ;;  %v169_v60 = vld [vmem:[%s1456_s2 + $0x3d0] sm:$0xff]  ;;  %v24_v14 = vld [vmem:[%s1457_s0 + $0x28] sm:$0xff] }
  0x2c   :  { %658 = vmatprep.subr.bf16.mxu1 %v657_v2  ;;  %v167_v2 = vld [vmem:[%s1456_s2 + $0x3c0] sm:$0xff]  ;;  %v677_v4 = vpack.c.bf16 %v174_v61, %v170_v59  ;;  %v173_v5 = vld [vmem:[%s1456_s2 + $0x3f0] sm:$0xff]  ;;  %v22_v10 = vld [vmem:[%s1457_s0 + $0x18] sm:$0xff] }
  0x2d   :  { %v32_v6 = vrot.slane %v1052_v22, %v31_v62  ;;  %v615_v7 = vpack.c.bf16 %v171_v3, %v167_v2  ;;  %v679_v9 = vpack.c.bf16 %v173_v5, %v169_v60  ;;  %v21_v13 = vld [vmem:[%s1457_s0 + $0x10] sm:$0xff]  ;;  %v23_v17 = vld [vmem:[%s1457_s0 + $0x20] sm:$0xff]  ;;  %v26_v18 = vld [vmem:[%s1457_s0 + $0x38] sm:$0xff] }
  0x2e   :  { %596 = vmatpush1.bf16.msra.mxu0 %v595_v8  ;;  %v19_v8 = vld [vmem:[%s1457_s0] sm:$0xff]  ;;  %v46_v20 = vmul.f32 %v1055_v24, %v26_v18  ;;  %v25_v21 = vld [vmem:[%s1457_s0 + $0x30] sm:$0xff]  ;;  %v358_v33 = vld [vmem:[%s1459_s3 + $0x28] sm:$0xff] }
  0x2f   :  { %660 = vmatpush1.bf16.msra.mxu1 %v659_v11  ;;  %598 = vmatprep.subr.bf16.mxu0 %v597_v12  ;;  %v39_v11 = vmul.f32 %v32_v6, %v19_v8  ;;  %v42_v12 = vmul.f32 %v1055_v24, %v22_v10  ;;  %v41_v15 = vmul.f32 %v32_v6, %v21_v13  ;;  %v359_v32 = vld [vmem:[%s1459_s3 + $0x30] sm:$0xff]  ;;  %v360_v35 = vld [vmem:[%s1459_s3 + $0x38] sm:$0xff]  ;;  %v374_v44 = vmul.f32 0.49748743, %v358_v33  ;;  %v361_v45 = vld [vmem:[%s1459_s3 + $0x40] sm:$0xff] }
  0x30   :  { %662 = vmatprep.subr.bf16.mxu1 %v661_v16  ;;  %v44_v16 = vmul.f32 %v1055_v24, %v24_v14  ;;  %v43_v19 = vmul.f32 %v32_v6, %v23_v17  ;;  %v45_v22 = vmul.f32 %v32_v6, %v25_v21  ;;  %v355_v24 = vld [vmem:[%s1459_s3 + $0x10] sm:$0xff]  ;;  %v376_v48 = vmul.f32 0.49748743, %v360_v35  ;;  %v362_v53 = vld [vmem:[%s1459_s3 + $0x48] sm:$0xff]  ;;  %v364_v54 = vld [vmem:[%s1459_s3 + $0x58] sm:$0xff] }
  0x31   :  { %v371_v28 = vmul.f32 0.49748743, %v355_v24  ;;  %v377_v59 = vmul.f32 0.49748743, %v361_v45  ;;  %v365_v2 = vld [vmem:[%s1459_s3 + $0x60] sm:$0xff]  ;;  %v367_v8 = vld [vmem:[%s1459_s3 + $0x70] sm:$0xff] }
  0x32   :  { %600 = vmatpush1.bf16.msra.mxu0 %v599_v23  ;;  %v353_v23 = vld [vmem:[%s1459_s3] sm:$0xff]  ;;  %v378_v60 = vmul.f32 0.49748743, %v362_v53  ;;  %v380_v5 = vmul.f32 0.49748743, %v364_v54  ;;  %v368_v18 = vld [vmem:[%s1459_s3 + $0x78] sm:$0xff] }
  0x33   :  { %664 = vmatpush1.bf16.msra.mxu1 %v663_v25  ;;  %602 = vmatprep.subr.bf16.mxu0 %v601_v26  ;;  %v354_v25 = vld [vmem:[%s1459_s3 + $0x8] sm:$0xff]  ;;  %v356_v26 = vld [vmem:[%s1459_s3 + $0x18] sm:$0xff]  ;;  %v369_v27 = vmul.f32 0.49748743, %v353_v23  ;;  %v384_v33 = vmul.f32 0.49748743, %v368_v18 }
  0x34   :  { %666 = vmatprep.subr.bf16.mxu1 %v665_v30  ;;  %v370_v29 = vmul.f32 0.49748743, %v354_v25  ;;  %v357_v30 = vld [vmem:[%s1459_s3 + $0x20] sm:$0xff]  ;;  %v372_v31 = vmul.f32 0.49748743, %v356_v26 }
  0x36   :  { %604 = vmatpush1.bf16.msra.mxu0 %v603_v37 }
  0x37   :  { %668 = vmatpush1.bf16.msra.mxu1 %v667_v38  ;;  %606 = vmatprep.subr.bf16.mxu0 %v605_v39  ;;  %v373_v39 = vmul.f32 0.49748743, %v357_v30 }
  0x38   :  { %670 = vmatprep.subr.bf16.mxu1 %v669_v43  ;;  %v375_v43 = vmul.f32 0.49748743, %v359_v32 }
  0x3a   :  { %608 = vmatpush1.bf16.msra.mxu0 %v607_v49  ;;  %v363_v49 = vld [vmem:[%s1459_s3 + $0x50] sm:$0xff] }
  0x3b   :  { %672 = vmatpush1.bf16.msra.mxu1 %v671_v50  ;;  %610 = vmatprep.subr.bf16.mxu0 %v609_v51 }
  0x3c   :  { %674 = vmatprep.subr.bf16.mxu1 %v673_v55 }
  0x3e   :  { %612 = vmatpush1.bf16.msra.mxu0 %v611_v63 }
  0x3f   :  { %676 = vmatpush1.bf16.msra.mxu1 %v675_v0  ;;  %614 = vmatprep.subr.bf16.mxu0 %v613_v1  ;;  %v379_v1 = vmul.f32 0.49748743, %v363_v49 }
  0x40   :  { %678 = vmatprep.subr.bf16.mxu1 %v677_v4 }
  0x42   :  { %616 = vmatpush1.bf16.msra.mxu0 %v615_v7 }
  0x43   :  { %680 = vmatpush1.bf16.msra.mxu1 %v679_v9 }
  0x45   :  { %240 = vmatmul.mubr.f32.vlgmr.msra.gmra.mrb[0].mxu0 %v39_v11 }
  0x46   :  { %329 = vmatmul.mubr.f32.vlgmr.msra.gmra.mrb[0].mxu1 %v39_v11  ;;  %245 = vmatprep.mubr.f32.mxu0 %v42_v12  ;;  %v381_v11 = vmul.f32 0.49748743, %v365_v2 }
  0x47   :  { %334 = vmatprep.mubr.f32.mxu1 %v42_v12  ;;  %v366_v12 = vld [vmem:[%s1459_s3 + $0x68] sm:$0xff] }
  0x49   :  { %246 = vmatmul.mubr.f32.gmra.mrb[2].mxu0 %v41_v15 }
  0x4a   :  { %335 = vmatmul.mubr.f32.gmra.mrb[2].mxu1 %v41_v15  ;;  %251 = vmatprep.mubr.f32.mxu0 %v44_v16 }
  0x4b   :  { %340 = vmatprep.mubr.f32.mxu1 %v44_v16 }
  0x4d   :  { %252 = vmatmul.mubr.f32.gmra.mrb[4].mxu0 %v43_v19 }
  0x4e   :  { %341 = vmatmul.mubr.f32.gmra.mrb[4].mxu1 %v43_v19  ;;  %257 = vmatprep.mubr.f32.mxu0 %v46_v20 }
  0x4f   :  { %346 = vmatprep.mubr.f32.mxu1 %v46_v20 }
  0x51   :  { %258 = vmatmul.mubr.f32.gmra.mrb[6].mxu0 %v45_v22 }
  0x52   :  { %347 = vmatmul.mubr.f32.gmra.mrb[6].mxu1 %v45_v22  ;;  %v383_v22 = vmul.f32 0.49748743, %v367_v8 }
 0x118   :  { %v241_v34 = vpop.f32.mrb[0].mxu0 }
 0x119   :  { %v1192_v36 = vsub.f32 %v241_v34, %v369_v27  ;;  %529 = vst [vmem:[%s1460_s5] sm:$0xff] %v241_v34  ;;  %v330_v37 = vpop.f32.mrb[0].mxu1  ;;  %v243_v38 = vpop.f32.mrb[1].mxu0  ;;  %v382_v27 = vmul.f32 0.49748743, %v366_v12 }
 0x11a   :  { %v1197_v40 = vsub.f32 %v330_v37, %v371_v28  ;;  %531 = vst [vmem:[%s1460_s5 + $0x10] sm:$0xff] %v330_v37  ;;  %v1202_v41 = vsub.f32 %v243_v38, %v370_v29  ;;  %530 = vst [vmem:[%s1460_s5 + $0x8] sm:$0xff] %v243_v38  ;;  %v332_v42 = vpop.f32.mrb[1].mxu1 }
 0x11b   :  { %v401_v46 = vmul.f32 %v1192_v36, %v1192_v36  ;;  %v1212_v47 = vsub.f32 %v332_v42, %v372_v31  ;;  %532 = vst [vmem:[%s1460_s5 + $0x18] sm:$0xff] %v332_v42 }
 0x11c   :  { %v409_v50 = vmul.f32 %v1197_v40, %v1197_v40  ;;  %v402_v51 = vmul.f32 %v1202_v41, %v1202_v41  ;;  %v247_v52 = vpop.f32.mrb[2].mxu0 }
 0x11d   :  { %v410_v55 = vmul.f32 %v1212_v47, %v1212_v47  ;;  %v1232_v56 = vsub.f32 %v247_v52, %v373_v39  ;;  %533 = vst [vmem:[%s1460_s5 + $0x20] sm:$0xff] %v247_v52  ;;  %v336_v57 = vpop.f32.mrb[2].mxu1  ;;  %v249_v58 = vpop.f32.mrb[3].mxu0 }
 0x11e   :  { %v1237_v61 = vadd.f32 %v409_v50, %v401_v46  ;;  %v1239_v62 = vsub.f32 %v336_v57, %v375_v43  ;;  %535 = vst [vmem:[%s1460_s5 + $0x30] sm:$0xff] %v336_v57  ;;  %v1244_v63 = vsub.f32 %v249_v58, %v374_v44  ;;  %534 = vst [vmem:[%s1460_s5 + $0x28] sm:$0xff] %v249_v58  ;;  %v338_v0 = vpop.f32.mrb[3].mxu1 }
 0x11f   :  { %v1252_v3 = vadd.f32 %v410_v55, %v402_v51  ;;  %v1254_v4 = vsub.f32 %v338_v0, %v376_v48  ;;  %536 = vst [vmem:[%s1460_s5 + $0x38] sm:$0xff] %v338_v0  ;;  %v403_v6 = vmul.f32 %v1232_v56, %v1232_v56 }
 0x120   :  { %681 = vrsqrt.f32 %v1237_v61  ;;  %v253_v7 = vpop.f32.mrb[4].mxu0  ;;  %v411_v13 = vmul.f32 %v1239_v62, %v1239_v62  ;;  %v404_v14 = vmul.f32 %v1244_v63, %v1244_v63  ;;  %vm427_vm0 = vcmp.eq.f32.partialorder %v1237_v61, inf }
 0x121   :  { %683 = vrsqrt.f32 %v1252_v3  ;;  %537 = vst [vmem:[%s1460_s5 + $0x40] sm:$0xff] %v253_v7  ;;  %v342_v9 = vpop.f32.mrb[4].mxu1  ;;  %v255_v10 = vpop.f32.mrb[5].mxu0  ;;  %v412_v15 = vmul.f32 %v1254_v4, %v1254_v4  ;;  %v1278_v16 = vsub.f32 %v253_v7, %v377_v59  ;;  %vm429_vm1 = vcmp.eq.f32.partialorder %v1237_v61, 0.0 }
 0x122   :  { %539 = vst [vmem:[%s1460_s5 + $0x50] sm:$0xff] %v342_v9  ;;  %538 = vst [vmem:[%s1460_s5 + $0x48] sm:$0xff] %v255_v10  ;;  %v344_v17 = vpop.f32.mrb[5].mxu1  ;;  %v1289_v19 = vsub.f32 %v342_v9, %v379_v1  ;;  %v1291_v20 = vsub.f32 %v255_v10, %v378_v60  ;;  %v1298_v23 = vadd.f32 %v411_v13, %v403_v6  ;;  %v430_v49 = vand.u32 2147483648, %v1237_v61 }
 0x123   :  { %v1293_v21 = vsub.f32 %v344_v17, %v380_v5  ;;  %540 = vst [vmem:[%s1460_s5 + $0x58] sm:$0xff] %v344_v17  ;;  %v1300_v24 = vadd.f32 %v412_v15, %v404_v14  ;;  %v405_v25 = vmul.f32 %v1278_v16, %v1278_v16  ;;  %vm434_vm2 = vcmp.eq.f32.partialorder %v1252_v3, inf }
 0x124   :  { %v259_v26 = vpop.f32.mrb[6].mxu0  ;;  %v413_v28 = vmul.f32 %v1289_v19, %v1289_v19  ;;  %v406_v29 = vmul.f32 %v1291_v20, %v1291_v20  ;;  %685 = vrsqrt.f32 %v1298_v23  ;;  %v437_v54 = vand.u32 2147483648, %v1252_v3 }
 0x125   :  { %v414_v30 = vmul.f32 %v1293_v21, %v1293_v21  ;;  %541 = vst [vmem:[%s1460_s5 + $0x60] sm:$0xff] %v259_v26  ;;  %v348_v31 = vpop.f32.mrb[6].mxu1  ;;  %v261_v32 = vpop.f32.mrb[7].mxu0  ;;  %v1314_v34 = vsub.f32 %v259_v26, %v381_v11  ;;  %687 = vrsqrt.f32 %v1300_v24  ;;  %vm436_vm3 = vcmp.eq.f32.partialorder %v1252_v3, 0.0 }
 0x126   :  { %543 = vst [vmem:[%s1460_s5 + $0x70] sm:$0xff] %v348_v31  ;;  %542 = vst [vmem:[%s1460_s5 + $0x68] sm:$0xff] %v261_v32  ;;  %v350_v35 = vpop.f32.mrb[7].mxu1  ;;  %v1326_v37 = vadd.f32 %v413_v28, %v405_v25  ;;  %v1330_v39 = vsub.f32 %v348_v31, %v383_v22  ;;  %v1332_v42 = vsub.f32 %v261_v32, %v382_v27  ;;  %vm441_vm4 = vcmp.eq.f32.partialorder %v1298_v23, inf }
 0x127   :  { %544 = vst [vmem:[%s1460_s5 + $0x78] sm:$0xff] %v350_v35  ;;  %v1328_v38 = vadd.f32 %v414_v30, %v406_v29  ;;  %v1334_v43 = vsub.f32 %v350_v35, %v384_v33  ;;  %v407_v45 = vmul.f32 %v1314_v34, %v1314_v34  ;;  %vm443_vm5 = vcmp.eq.f32.partialorder %v1298_v23, 0.0 }
 0x128   :  { %689 = vrsqrt.f32 %v1326_v37  ;;  %v415_v51 = vmul.f32 %v1330_v39, %v1330_v39  ;;  %v408_v52 = vmul.f32 %v1332_v42, %v1332_v42  ;;  %vm448_vm6 = vcmp.eq.f32.partialorder %v1300_v24, inf }
 0x129   :  { %691 = vrsqrt.f32 %v1328_v38  ;;  %v416_v55 = vmul.f32 %v1334_v43, %v1334_v43  ;;  %v451_v9 = vand.u32 2147483648, %v1300_v24  ;;  %vm450_vm7 = vcmp.eq.f32.partialorder %v1300_v24, 0.0 }
 0x12a   :  { %v682_v44 = vpop.eup %681  ;;  %v1356_v59 = vadd.f32 %v415_v51, %v407_v45  ;;  %vm455_vm8 = vcmp.eq.f32.partialorder %v1326_v37, inf  ;;  %vm457_vm9 = vcmp.eq.f32.partialorder %v1326_v37, 0.0  ;;  %v458_v22 = vand.u32 2147483648, %v1326_v37 }
 0x12b   :  { %v684_v46 = vpop.eup %683  ;;  %v426_v48 = vmul.f32 %v682_v44, %v1237_v61  ;;  %v1358_v2 = vadd.f32 %v416_v55, %v408_v52  ;;  %vm462_vm10 = vcmp.eq.f32.partialorder %v1328_v38, inf  ;;  %vm464_vm11 = vcmp.eq.f32.partialorder %v1328_v38, 0.0 }
 0x12c   :  { %v433_v50 = vmul.f32 %v684_v46, %v1252_v3  ;;  %693 = vrsqrt.f32 %v1356_v59  ;;  %vm469_vm12 = vcmp.eq.f32.partialorder %v1356_v59, inf  ;;  %v472_v45 = vand.u32 2147483648, %v1356_v59 }
 0x12d   :  { %v428_v53 = vsel %vm427_vm0, %v1237_v61, %v426_v48  ;;  %vm471_vm13 = vcmp.eq.f32.partialorder %v1356_v59, 0.0  ;;  %vm476_vm14 = vcmp.eq.f32.partialorder %v1358_v2, inf  ;;  %vm478_vm15 = vcmp.eq.f32.partialorder %v1358_v2, 0.0 }
 0x12e   :  { %v431_v57 = vsel %vm429_vm1, %v430_v49, %v428_v53  ;;  %v435_v58 = vsel %vm434_vm2, %v1252_v3, %v433_v50  ;;  %v686_v60 = vpop.eup %685  ;;  %v444_v3 = vand.u32 2147483648, %v1298_v23 }
 0x12f   :  { %v481_v0 = vadd.f32 1e-16, %v431_v57  ;;  %v438_v1 = vsel %vm436_vm3, %v437_v54, %v435_v58  ;;  %v688_v5 = vpop.eup %687  ;;  %v440_v6 = vmul.f32 %v686_v60, %v1298_v23 }
 0x130   :  { %v482_v61 = vadd.f32 1e-16, %v438_v1  ;;  %v447_v7 = vmul.f32 %v688_v5, %v1300_v24 }
 0x131   :  { %695 = vrcp.f32 %v481_v0  ;;  %v442_v8 = vsel %vm441_vm4, %v1298_v23, %v440_v6 }
 0x132   :  { %697 = vrcp.f32 %v482_v61  ;;  %v690_v10 = vpop.eup %689  ;;  %v445_v11 = vsel %vm443_vm5, %v444_v3, %v442_v8  ;;  %v449_v12 = vsel %vm448_vm6, %v1300_v24, %v447_v7  ;;  %v465_v24 = vand.u32 2147483648, %v1328_v38 }
 0x133   :  { %699 = vrsqrt.f32 %v1358_v2  ;;  %v692_v13 = vpop.eup %691  ;;  %v483_v14 = vadd.f32 1e-16, %v445_v11  ;;  %v452_v15 = vsel %vm450_vm7, %v451_v9, %v449_v12  ;;  %v454_v17 = vmul.f32 %v690_v10, %v1326_v37 }
 0x134   :  { %v484_v18 = vadd.f32 1e-16, %v452_v15  ;;  %v461_v23 = vmul.f32 %v692_v13, %v1328_v38 }
 0x135   :  { %701 = vrcp.f32 %v483_v14  ;;  %v456_v25 = vsel %vm455_vm8, %v1326_v37, %v454_v17 }
 0x136   :  { %703 = vrcp.f32 %v484_v18  ;;  %v459_v26 = vsel %vm457_vm9, %v458_v22, %v456_v25  ;;  %v463_v27 = vsel %vm462_vm10, %v1328_v38, %v461_v23  ;;  %v694_v30 = vpop.eup %693 }
 0x137   :  { %v485_v28 = vadd.f32 1e-16, %v459_v26  ;;  %v466_v29 = vsel %vm464_vm11, %v465_v24, %v463_v27  ;;  %v468_v33 = vmul.f32 %v694_v30, %v1356_v59 }
 0x138   :  { %v486_v31 = vadd.f32 1e-16, %v466_v29 }
 0x139   :  { %705 = vrcp.f32 %v485_v28  ;;  %v470_v49 = vsel %vm469_vm12, %v1356_v59, %v468_v33 }
 0x13a   :  { %707 = vrcp.f32 %v486_v31 }
 0x13b   :  { %v696_v32 = vpop.eup %695 }
 0x13c   :  { %v698_v35 = vpop.eup %697  ;;  %v490_v37 = vmul.f32 %v696_v32, %v1192_v36  ;;  %v505_v44 = vmul.f32 %v696_v32, %v1197_v40  ;;  %v473_v36 = vsel %vm471_vm13, %v472_v45, %v470_v49 }
 0x13d   :  { %v700_v46 = vpop.eup %699  ;;  %v492_v38 = vmul.f32 %v698_v35, %v1202_v41  ;;  %v506_v48 = vmul.f32 %v698_v35, %v1212_v47  ;;  %v487_v41 = vadd.f32 1e-16, %v473_v36  ;;  %v479_v47 = vand.u32 2147483648, %v1358_v2 }
 0x13e   :  { %513 = vst [vmem:[%s1461_s4] sm:$0xff] %v490_v37  ;;  %515 = vst [vmem:[%s1461_s4 + $0x10] sm:$0xff] %v505_v44  ;;  %v475_v40 = vmul.f32 %v700_v46, %v1358_v2 }
 0x13f   :  { %514 = vst [vmem:[%s1461_s4 + $0x8] sm:$0xff] %v492_v38  ;;  %516 = vst [vmem:[%s1461_s4 + $0x18] sm:$0xff] %v506_v48  ;;  %v702_v51 = vpop.eup %701  ;;  %709 = vrcp.f32 %v487_v41 }
 0x140   :  { %v477_v50 = vsel %vm476_vm14, %v1358_v2, %v475_v40  ;;  %v704_v53 = vpop.eup %703  ;;  %v494_v54 = vmul.f32 %v702_v51, %v1232_v56  ;;  %v507_v55 = vmul.f32 %v702_v51, %v1239_v62 }
 0x141   :  { %v480_v52 = vsel %vm478_vm15, %v479_v47, %v477_v50  ;;  %v496_v58 = vmul.f32 %v704_v53, %v1244_v63  ;;  %v508_v59 = vmul.f32 %v704_v53, %v1254_v4 }
 0x142   :  { %v488_v57 = vadd.f32 1e-16, %v480_v52  ;;  %517 = vst [vmem:[%s1461_s4 + $0x20] sm:$0xff] %v494_v54  ;;  %519 = vst [vmem:[%s1461_s4 + $0x30] sm:$0xff] %v507_v55 }
 0x143   :  { %v706_v0 = vpop.eup %705  ;;  %518 = vst [vmem:[%s1461_s4 + $0x28] sm:$0xff] %v496_v58  ;;  %520 = vst [vmem:[%s1461_s4 + $0x38] sm:$0xff] %v508_v59 }
 0x144   :  { %711 = vrcp.f32 %v488_v57  ;;  %v708_v56 = vpop.eup %707  ;;  %v498_v62 = vmul.f32 %v706_v0, %v1278_v16  ;;  %v509_v63 = vmul.f32 %v706_v0, %v1289_v19 }
 0x145   :  { %v500_v4 = vmul.f32 %v708_v56, %v1291_v20  ;;  %v510_v1 = vmul.f32 %v708_v56, %v1293_v21 }
 0x146   :  { %521 = vst [vmem:[%s1461_s4 + $0x40] sm:$0xff] %v498_v62  ;;  %523 = vst [vmem:[%s1461_s4 + $0x50] sm:$0xff] %v509_v63 }
 0x147   :  { %522 = vst [vmem:[%s1461_s4 + $0x48] sm:$0xff] %v500_v4  ;;  %524 = vst [vmem:[%s1461_s4 + $0x58] sm:$0xff] %v510_v1 }
 0x149   :  { %v710_v16 = vpop.eup %709 }
 0x14a   :  { %v502_v19 = vmul.f32 %v710_v16, %v1314_v34  ;;  %v511_v20 = vmul.f32 %v710_v16, %v1330_v39 }
 0x14c   :  { %525 = vst [vmem:[%s1461_s4 + $0x60] sm:$0xff] %v502_v19  ;;  %527 = vst [vmem:[%s1461_s4 + $0x70] sm:$0xff] %v511_v20 }
 0x14e   :  { %v712_v21 = vpop.eup %711 }
 0x14f   :  { %v504_v2 = vmul.f32 %v712_v21, %v1332_v42  ;;  %v512_v60 = vmul.f32 %v712_v21, %v1334_v43 }
 0x151   :  { %526 = vst [vmem:[%s1461_s4 + $0x68] sm:$0xff] %v504_v2  ;;  %528 = vst [vmem:[%s1461_s4 + $0x78] sm:$0xff] %v512_v60 }

</bundles_post_ra>
